<compile_context>
chip_gen: v5e
topology: v5e:2x2
jax: 0.10.0
libtpu: 0.0.40
codegen_flags: <defaults>
</compile_context>

<pallas_src>
import functools

import jax
import jax.numpy as jnp
from jax.experimental import pallas as pl
from jax.experimental.pallas import tpu as pltpu

# ---------------------------------------------------------------------------
# Scaled-down xrv DenseNet configuration (single-channel x-ray input).
GROWTH_RATE = 8
NUM_INIT_FEATURES = 16
BLOCK_CONFIG = (2, 2)
BN_SIZE = 4
N_CLASSES = 3
IN_CHANNELS = 1
BN_EPS = 1e-5

LANE = 128                     # pad matmul output channels to 128 lanes
TILE_M_MAX = 256               # row tile (multiple of 8); bump to 512+ at real sizes
VMEM_LIMIT = 32 * 1024 * 1024  # safe under v5e 16MiB-default-override and v7x 64MiB


def _round_up(x, m):
    return ((x + m - 1) // m) * m


# ---------------------------------------------------------------------------
# Pallas kernels
def _conv_matmul_kernel(*refs, prologue, epilogue):
    """(TILE_M, K) @ (K, NP) matmul with fused BN+ReLU prologue / epilogue."""
    o_ref = refs[-1]
    a_ref, w_ref = refs[0], refs[1]
    idx = 2
    if prologue:
        ps_ref, pb_ref = refs[idx], refs[idx + 1]
        idx += 2
    if epilogue:
        es_ref, eb_ref = refs[idx], refs[idx + 1]
    a = a_ref[...]
    if prologue:                 # pre-activation BN+ReLU on the input tile (f32)
        a = jnp.maximum(a * ps_ref[...] + pb_ref[...], 0.0)
    y = jnp.dot(a.astype(jnp.bfloat16), w_ref[...],
                preferred_element_type=jnp.float32)
    if epilogue:                 # following BN+ReLU on output channels (f32)
        y = jnp.maximum(y * es_ref[...] + eb_ref[...], 0.0)
    o_ref[...] = y


def _transition_kernel(x_ref, s_ref, b_ref, w_ref, o_ref):
    """Fused DenseNet transition: BN+ReLU -> 2x2/2 avgpool -> 1x1 conv.

    avgpool and a 1x1 conv commute (both linear), so pool the activated taps
    first, then one lane-dense matmul.  x_ref: (4, TILE_M, Cin)."""
    s = s_ref[...]
    b = b_ref[...]
    acc = jnp.maximum(x_ref[0] * s + b, 0.0)
    for t in range(1, x_ref.shape[0]):
        acc = acc + jnp.maximum(x_ref[t] * s + b, 0.0)
    a = (acc * (1.0 / x_ref.shape[0])).astype(jnp.bfloat16)
    o_ref[...] = jnp.dot(a, w_ref[...], preferred_element_type=jnp.float32)


def _maxpool_kernel(x_ref, o_ref):
    """Elementwise VPU max over stacked window taps (no sublane reduce)."""
    m = x_ref[0]
    for t in range(1, x_ref.shape[0]):
        m = jnp.maximum(m, x_ref[t])
    o_ref[...] = m


def _head_kernel(x_ref, s_ref, b_ref, w_ref, bias_ref, o_ref):
    """Fused norm5 + F.relu + adaptive_avg_pool2d((1,1)) + classifier linear."""
    y = jnp.maximum(x_ref[...] * s_ref[...] + b_ref[...], 0.0)   # (N, HW, C)
    feat = jnp.mean(y, axis=1)                                    # (N, C)
    o_ref[...] = (jnp.dot(feat.astype(jnp.bfloat16), w_ref[...],
                          preferred_element_type=jnp.float32) + bias_ref[...])


# ---------------------------------------------------------------------------
# Kernel wrappers (grids, tiling, padding).
def _m_tiles(m):
    tile = min(TILE_M_MAX, _round_up(m, 8))
    return tile, _round_up(m, tile)


def _compiler_params():
    return pltpu.CompilerParams(dimension_semantics=("parallel",),
                                vmem_limit_bytes=VMEM_LIMIT)


def fused_conv_matmul(a, w_pad, out_cols, pre=None, post=None):
    """y = conv(relu(bn(a))) [+ relu(bn(.)) epilogue], lane-dense padded output.

    a: (M, K) patches/activations; w_pad: (K, NP) bf16, NP multiple of 128.
    Returns (M, out_cols) f32 (padding rows / lanes sliced off)."""
    m, k = a.shape
    _, npad = w_pad.shape
    tile_m, mp = _m_tiles(m)
    if pre is None:
        a = a.astype(jnp.bfloat16)          # no prologue -> ship bf16, halve HBM
    if mp != m:
        a = jnp.pad(a, ((0, mp - m), (0, 0)))
    operands = [a, w_pad]
    in_specs = [pl.BlockSpec((tile_m, k), lambda i: (i, 0)),
                pl.BlockSpec((k, npad), lambda i: (0, 0))]
    if pre is not None:
        ps, pb = pre
        operands += [ps.reshape(1, k).astype(jnp.float32),
                     pb.reshape(1, k).astype(jnp.float32)]
        in_specs += [pl.BlockSpec((1, k), lambda i: (0, 0)) for _ in range(2)]
    if post is not None:
        es, eb = post
        c = es.shape[0]
        operands += [
            jnp.pad(es, (0, npad - c)).reshape(1, npad).astype(jnp.float32),
            jnp.pad(eb, (0, npad - c)).reshape(1, npad).astype(jnp.float32)]
        in_specs += [pl.BlockSpec((1, npad), lambda i: (0, 0)) for _ in range(2)]
    kern = functools.partial(_conv_matmul_kernel,
                             prologue=pre is not None,
                             epilogue=post is not None)
    bytes_accessed = int(sum(op.size * op.dtype.itemsize for op in operands)
                         + mp * npad * 4)
    out = pl.pallas_call(
        kern,
        grid=(mp // tile_m,),
        in_specs=in_specs,
        out_specs=pl.BlockSpec((tile_m, npad), lambda i: (i, 0)),
        out_shape=jax.ShapeDtypeStruct((mp, npad), jnp.float32),
        compiler_params=_compiler_params(),
        cost_estimate=pl.CostEstimate(flops=2 * mp * k * npad,
                                      transcendentals=0,
                                      bytes_accessed=bytes_accessed),
    )(*operands)
    return out[:m, :out_cols]


def transition_call(taps, scale, shift, w_pad, out_cols):
    t, m, c = taps.shape
    _, npad = w_pad.shape
    tile_m, mp = _m_tiles(m)
    if mp != m:
        taps = jnp.pad(taps, ((0, 0), (0, mp - m), (0, 0)))
    out = pl.pallas_call(
        _transition_kernel,
        grid=(mp // tile_m,),
        in_specs=[pl.BlockSpec((t, tile_m, c), lambda i: (0, i, 0)),
                  pl.BlockSpec((1, c), lambda i: (0, 0)),
                  pl.BlockSpec((1, c), lambda i: (0, 0)),
                  pl.BlockSpec((c, npad), lambda i: (0, 0))],
        out_specs=pl.BlockSpec((tile_m, npad), lambda i: (i, 0)),
        out_shape=jax.ShapeDtypeStruct((mp, npad), jnp.float32),
        compiler_params=_compiler_params(),
    )(taps, scale.reshape(1, c).astype(jnp.float32),
      shift.reshape(1, c).astype(jnp.float32), w_pad)
    return out[:m, :out_cols]


def maxpool_call(taps):
    t, m, c = taps.shape
    tile_m, mp = _m_tiles(m)
    if mp != m:
        taps = jnp.pad(taps, ((0, 0), (0, mp - m), (0, 0)))
    out = pl.pallas_call(
        _maxpool_kernel,
        grid=(mp // tile_m,),
        in_specs=[pl.BlockSpec((t, tile_m, c), lambda i: (0, i, 0))],
        out_specs=pl.BlockSpec((tile_m, c), lambda i: (i, 0)),
        out_shape=jax.ShapeDtypeStruct((mp, c), jnp.float32),
        compiler_params=_compiler_params(),
    )(taps)
    return out[:m]


def head_call(x_nhwc, norm5, cls_w, cls_b):
    n, h, w, c = x_nhwc.shape
    s5, b5 = _bn_fold(norm5)
    npad = _round_up(N_CLASSES, LANE)
    w_pad = jnp.pad(cls_w, ((0, 0), (0, npad - N_CLASSES))).astype(jnp.bfloat16)
    b_pad = jnp.pad(cls_b, (0, npad - N_CLASSES)).reshape(1, npad).astype(jnp.float32)
    out = pl.pallas_call(
        _head_kernel,
        out_shape=jax.ShapeDtypeStruct((n, npad), jnp.float32),
        in_specs=[pl.BlockSpec(memory_space=pltpu.MemorySpace.VMEM)
                  for _ in range(5)],
        out_specs=pl.BlockSpec(memory_space=pltpu.MemorySpace.VMEM),
        compiler_params=pltpu.CompilerParams(vmem_limit_bytes=VMEM_LIMIT),
    )(x_nhwc.reshape(n, h * w, c),
      s5.reshape(1, 1, c).astype(jnp.float32),
      b5.reshape(1, 1, c).astype(jnp.float32),
      w_pad, b_pad)
    return out[:, :N_CLASSES]


# ---------------------------------------------------------------------------
# Plain-JAX glue: BN folding, weight prep, patch / tap extraction.
def _bn_fold(p):
    # Inference BatchNorm with running stats folded to scale/shift.
    scale = p["gamma"] * jax.lax.rsqrt(p["var"] + BN_EPS)
    shift = p["beta"] - p["mean"] * scale
    return scale, shift


def _prep_weight(w4d):
    """(KH, KW, Cin, Cout) -> (KH*KW*Cin, Cout padded to 128) bf16."""
    kh, kw, cin, cout = w4d.shape
    w2 = w4d.reshape(kh * kw * cin, cout)
    npad = _round_up(cout, LANE)
    return jnp.pad(w2, ((0, 0), (0, npad - cout))).astype(jnp.bfloat16)


def extract_patches(x, kh, kw, stride, pad):
    """im2col: (N,H,W,C) -> ((N*Ho*Wo, kh*kw*C), Ho, Wo); patch order (ki,kj,c)."""
    # TODO(synk): at real DenseNet-121 sizes, replace this JAX-side im2col with an
    # in-kernel tap-reduction grid (windowed index_map + VMEM accumulator) to avoid
    # the 9x/49x HBM inflation; at these toy shapes the materialized slab is tiny.
    n, h, w, c = x.shape
    if pad > 0:
        x = jnp.pad(x, ((0, 0), (pad, pad), (pad, pad), (0, 0)))
    hp, wp = h + 2 * pad, w + 2 * pad
    ho = (hp - kh) // stride + 1
    wo = (wp - kw) // stride + 1
    pieces = []
    for i in range(kh):
        for j in range(kw):
            pieces.append(x[:, i:i + (ho - 1) * stride + 1:stride,
                             j:j + (wo - 1) * stride + 1:stride, :])
    patches = jnp.concatenate(pieces, axis=-1).reshape(n * ho * wo, kh * kw * c)
    return patches, ho, wo


def _window_taps(x, kh, kw, stride, pad, pad_value):
    """(N,H,W,C) -> stacked pooling taps (kh*kw, N*Ho*Wo, C)."""
    n, h, w, c = x.shape
    if pad > 0:
        x = jnp.pad(x, ((0, 0), (pad, pad), (pad, pad), (0, 0)),
                    constant_values=pad_value)
    hp, wp = h + 2 * pad, w + 2 * pad
    ho = (hp - kh) // stride + 1
    wo = (wp - kw) // stride + 1
    taps = [x[:, i:i + (ho - 1) * stride + 1:stride,
               j:j + (wo - 1) * stride + 1:stride, :].reshape(n * ho * wo, c)
            for i in range(kh) for j in range(kw)]
    return jnp.stack(taps, axis=0), ho, wo


# ---------------------------------------------------------------------------
# DenseNet structure (matches xrv.models.DenseNet / torchvision _DenseLayer).
def dense_layer(x, lp):
    # norm1 -> relu -> conv1(1x1) -> norm2 -> relu -> conv2(3x3, p1) -> concat.
    # norm1+relu fused as conv1's prologue; norm2+relu fused as its epilogue
    # (BN cannot be folded into the weights because ReLU sits in between).
    n, h, w, c = x.shape
    mid = fused_conv_matmul(
        x.reshape(n * h * w, c), _prep_weight(lp["conv1"]),
        out_cols=BN_SIZE * GROWTH_RATE,
        pre=_bn_fold(lp["norm1"]), post=_bn_fold(lp["norm2"]))
    mid = mid.reshape(n, h, w, BN_SIZE * GROWTH_RATE)
    patches, ho, wo = extract_patches(mid, 3, 3, 1, 1)   # zero-pads the post-ReLU input
    out = fused_conv_matmul(patches, _prep_weight(lp["conv2"]),
                            out_cols=GROWTH_RATE)
    out = out.reshape(n, ho, wo, GROWTH_RATE)
    # TODO(synk): at real scale, write `out` in place into a preallocated channel
    # slab (out_specs channel offset / input_output_aliases) instead of concat.
    return jnp.concatenate([x, out], axis=-1)


def transition(x, tp):
    # norm -> relu -> conv(1x1) -> avgpool(2,2), all in one fused kernel.
    n, h, w, c = x.shape
    cout = tp["conv"].shape[-1]
    taps, ho, wo = _window_taps(x, 2, 2, 2, 0, 0.0)
    scale, shift = _bn_fold(tp["norm"])
    y = transition_call(taps, scale, shift, _prep_weight(tp["conv"]), cout)
    return y.reshape(n, ho, wo, cout)


def forward(params, x_nchw):
    # TODO(synk): xrv's fix_resolution (F.interpolate resize to 224x224) and the
    # normalization-range warning are skipped; input is assumed to already be at
    # the model's working resolution.
    x = jnp.transpose(x_nchw, (0, 2, 3, 1)).astype(jnp.float32)   # NCHW -> NHWC
    n = x.shape[0]

    # conv0 (7x7 s2 p3, bias-free) with fused norm0 + relu0 epilogue.
    patches, ho, wo = extract_patches(x, 7, 7, 2, 3)
    x = fused_conv_matmul(patches, _prep_weight(params["conv0"]),
                          out_cols=NUM_INIT_FEATURES,
                          post=_bn_fold(params["norm0"]))
    x = x.reshape(n, ho, wo, NUM_INIT_FEATURES)

    # pool0: maxpool 3x3 s2 p1 (elementwise VPU max over stacked taps).
    taps, ho, wo = _window_taps(x, 3, 3, 2, 1, -jnp.inf)
    x = maxpool_call(taps).reshape(n, ho, wo, NUM_INIT_FEATURES)

    for bi, layers in enumerate(params["blocks"]):
        for lp in layers:
            x = dense_layer(x, lp)
        if bi != len(params["blocks"]) - 1:
            x = transition(x, params["transitions"][bi])

    # norm5 -> F.relu -> adaptive_avg_pool2d((1,1)).view(N,-1) -> Linear, fused.
    logits = head_call(x, params["norm5"], params["classifier_w"],
                       params["classifier_b"])
    # forward() returns base_model(x); op_threshs is None and self.sigm is
    # unused -> raw logits.
    return logits


# ---------------------------------------------------------------------------
# Deterministic synthetic parameter initialization.
def _conv_init(key, kh, kw, cin, cout):
    fan_in = kh * kw * cin
    return jax.random.normal(key, (kh, kw, cin, cout), jnp.float32) / jnp.sqrt(
        float(fan_in)
    )


def _bn_init(key, c):
    k1, k2, k3, k4 = jax.random.split(key, 4)
    return dict(
        gamma=1.0 + 0.1 * jax.random.normal(k1, (c,), jnp.float32),
        beta=0.1 * jax.random.normal(k2, (c,), jnp.float32),
        mean=0.1 * jax.random.normal(k3, (c,), jnp.float32),
        var=1.0 + 0.1 * jax.random.uniform(k4, (c,), jnp.float32),
    )


def init_params(key):
    keys = iter(jax.random.split(key, 256))
    params = {
        "conv0": _conv_init(next(keys), 7, 7, IN_CHANNELS, NUM_INIT_FEATURES),
        "norm0": _bn_init(next(keys), NUM_INIT_FEATURES),
    }
    num_features = NUM_INIT_FEATURES
    blocks, transitions = [], []
    for bi, num_layers in enumerate(BLOCK_CONFIG):
        layers = []
        for _ in range(num_layers):
            layers.append(
                dict(
                    norm1=_bn_init(next(keys), num_features),
                    conv1=_conv_init(next(keys), 1, 1, num_features,
                                     BN_SIZE * GROWTH_RATE),
                    norm2=_bn_init(next(keys), BN_SIZE * GROWTH_RATE),
                    conv2=_conv_init(next(keys), 3, 3, BN_SIZE * GROWTH_RATE,
                                     GROWTH_RATE),
                )
            )
            num_features += GROWTH_RATE
        blocks.append(layers)
        if bi != len(BLOCK_CONFIG) - 1:
            transitions.append(
                dict(
                    norm=_bn_init(next(keys), num_features),
                    conv=_conv_init(next(keys), 1, 1, num_features,
                                    num_features // 2),
                )
            )
            num_features //= 2
    params["blocks"] = blocks
    params["transitions"] = transitions
    params["norm5"] = _bn_init(next(keys), num_features)
    params["classifier_w"] = jax.random.normal(
        next(keys), (num_features, N_CLASSES), jnp.float32
    ) / jnp.sqrt(float(num_features))
    params["classifier_b"] = 0.01 * jax.random.normal(
        next(keys), (N_CLASSES,), jnp.float32
    )
    return params


if __name__ == "__main__":
    key = jax.random.PRNGKey(0)
    kx, kp = jax.random.split(key)
    # PyTorch-style NCHW single-channel x-ray input at a small synthetic resolution.
    x = jax.random.normal(kx, (2, IN_CHANNELS, 32, 32), jnp.float32)
    params = init_params(kp)
    out = jax.jit(forward)(params, x)
    out = jax.block_until_ready(out)
    assert out.shape == (2, N_CLASSES)
    assert out.dtype == jnp.float32
    assert bool(jnp.all(jnp.isfinite(out)))
    print("KERNEL_OK")
</pallas_src>

<mosaic_0001>
module attributes {stable_mosaic.version = 11 : i64} {
  func.func @_conv_matmul_kernel(%arg0: i32, %arg1: memref<256x49xbf16, #tpu.memory_space<vmem>>, %arg2: memref<49x128xbf16, #tpu.memory_space<vmem>>, %arg3: memref<1x128xf32, #tpu.memory_space<vmem>>, %arg4: memref<1x128xf32, #tpu.memory_space<vmem>>, %arg5: memref<256x128xf32, #tpu.memory_space<vmem>>) attributes {dimension_semantics = [#tpu.dimension_semantics<parallel>], iteration_bounds = array<i64: 2>, scalar_prefetch = 0 : i64, scratch_operands = 0 : i64, tpu.core_type = #tpu.core_type<tc>, window_params = [{transform_indices = @transform_0, window_bounds = array<i64: 256, 49>}, {pipeline_mode = #tpu.pipeline_mode<synchronous>, transform_indices = @transform_1, window_bounds = array<i64: 49, 128>}, {pipeline_mode = #tpu.pipeline_mode<synchronous>, transform_indices = @transform_2, window_bounds = array<i64: 1, 128>}, {pipeline_mode = #tpu.pipeline_mode<synchronous>, transform_indices = @transform_3, window_bounds = array<i64: 1, 128>}, {transform_indices = @transform_4, window_bounds = array<i64: 256, 128>}]} {
    %c0 = arith.constant 0 : index
    %c0_0 = arith.constant 0 : index
    %0 = vector.load %arg1[%c0, %c0_0] : memref<256x49xbf16, #tpu.memory_space<vmem>>, vector<256x49xbf16>
    %c0_1 = arith.constant 0 : index
    %c0_2 = arith.constant 0 : index
    %1 = vector.load %arg2[%c0_1, %c0_2] : memref<49x128xbf16, #tpu.memory_space<vmem>>, vector<49x128xbf16>
    %cst = arith.constant dense<0.000000e+00> : vector<256x128xf32>
    %2 = tpu.matmul %0, %1, %cst {dimension_numbers = #tpu.dot_dimension_numbers<[1], [0], [0], [1], [0, 0, 1, 1], [], []>} : vector<256x49xbf16>, vector<49x128xbf16>, vector<256x128xf32> -> vector<256x128xf32>
    %c0_3 = arith.constant 0 : index
    %c0_4 = arith.constant 0 : index
    %3 = vector.load %arg3[%c0_3, %c0_4] : memref<1x128xf32, #tpu.memory_space<vmem>>, vector<1x128xf32>
    %4 = vector.broadcast %3 : vector<1x128xf32> to vector<256x128xf32>
    %5 = arith.mulf %2, %4 : vector<256x128xf32>
    %c0_5 = arith.constant 0 : index
    %c0_6 = arith.constant 0 : index
    %6 = vector.load %arg4[%c0_5, %c0_6] : memref<1x128xf32, #tpu.memory_space<vmem>>, vector<1x128xf32>
    %7 = vector.broadcast %6 : vector<1x128xf32> to vector<256x128xf32>
    %8 = arith.addf %5, %7 : vector<256x128xf32>
    %cst_7 = arith.constant 0.000000e+00 : f32
    %9 = vector.broadcast %cst_7 : f32 to vector<256x128xf32>
    %10 = arith.maximumf %8, %9 : vector<256x128xf32>
    %c0_8 = arith.constant 0 : index
    %c0_9 = arith.constant 0 : index
    %11 = vector.load %arg5[%c0_8, %c0_9] : memref<256x128xf32, #tpu.memory_space<vmem>>, vector<256x128xf32>
    tpu.vector_store %arg5[%c0_8, %c0_9], %10 {strides = array<i32>} : memref<256x128xf32, #tpu.memory_space<vmem>>, vector<256x128xf32>,
    return
  }
  func.func @transform_0(%arg0: i32) -> (i32, i32) {
    %c0_i32 = arith.constant 0 : i32
    %c0_i32_0 = arith.constant 0 : i32
    return %arg0, %c0_i32 : i32, i32
  }
  func.func @transform_1(%arg0: i32) -> (i32, i32) {
    %c0_i32 = arith.constant 0 : i32
    %c0_i32_0 = arith.constant 0 : i32
    %c0_i32_1 = arith.constant 0 : i32
    return %c0_i32, %c0_i32_0 : i32, i32
  }
  func.func @transform_2(%arg0: i32) -> (i32, i32) {
    %c0_i32 = arith.constant 0 : i32
    %c0_i32_0 = arith.constant 0 : i32
    %c0_i32_1 = arith.constant 0 : i32
    return %c0_i32, %c0_i32_0 : i32, i32
  }
  func.func @transform_3(%arg0: i32) -> (i32, i32) {
    %c0_i32 = arith.constant 0 : i32
    %c0_i32_0 = arith.constant 0 : i32
    %c0_i32_1 = arith.constant 0 : i32
    return %c0_i32, %c0_i32_0 : i32, i32
  }
  func.func @transform_4(%arg0: i32) -> (i32, i32) {
    %c0_i32 = arith.constant 0 : i32
    %c0_i32_0 = arith.constant 0 : i32
    return %arg0, %c0_i32 : i32, i32
  }
}

module attributes {stable_mosaic.version = 11 : i64} {
  func.func @_maxpool_kernel(%arg0: i32, %arg1: memref<9x128x16xf32, #tpu.memory_space<vmem>>, %arg2: memref<128x16xf32, #tpu.memory_space<vmem>>) attributes {dimension_semantics = [#tpu.dimension_semantics<parallel>], iteration_bounds = array<i64: 1>, scalar_prefetch = 0 : i64, scratch_operands = 0 : i64, tpu.core_type = #tpu.core_type<tc>, window_params = [{transform_indices = @transform_0, window_bounds = array<i64: 9, 128, 16>}, {transform_indices = @transform_1, window_bounds = array<i64: 128, 16>}]} {
    %c0 = arith.constant 0 : index
    %c0_0 = arith.constant 0 : index
    %c0_1 = arith.constant 0 : index
    %0 = vector.load %arg1[%c0, %c0_0, %c0_1] : memref<9x128x16xf32, #tpu.memory_space<vmem>>, vector<1x128x16xf32>
    %1 = vector.shape_cast %0 : vector<1x128x16xf32> to vector<128x16xf32>
    %c1 = arith.constant 1 : index
    %c0_2 = arith.constant 0 : index
    %c0_3 = arith.constant 0 : index
    %2 = vector.load %arg1[%c1, %c0_2, %c0_3] : memref<9x128x16xf32, #tpu.memory_space<vmem>>, vector<1x128x16xf32>
    %3 = vector.shape_cast %2 : vector<1x128x16xf32> to vector<128x16xf32>
    %4 = arith.maximumf %1, %3 : vector<128x16xf32>
    %c2 = arith.constant 2 : index
    %c0_4 = arith.constant 0 : index
    %c0_5 = arith.constant 0 : index
    %5 = vector.load %arg1[%c2, %c0_4, %c0_5] : memref<9x128x16xf32, #tpu.memory_space<vmem>>, vector<1x128x16xf32>
    %6 = vector.shape_cast %5 : vector<1x128x16xf32> to vector<128x16xf32>
    %7 = arith.maximumf %4, %6 : vector<128x16xf32>
    %c3 = arith.constant 3 : index
    %c0_6 = arith.constant 0 : index
    %c0_7 = arith.constant 0 : index
    %8 = vector.load %arg1[%c3, %c0_6, %c0_7] : memref<9x128x16xf32, #tpu.memory_space<vmem>>, vector<1x128x16xf32>
    %9 = vector.shape_cast %8 : vector<1x128x16xf32> to vector<128x16xf32>
    %10 = arith.maximumf %7, %9 : vector<128x16xf32>
    %c4 = arith.constant 4 : index
    %c0_8 = arith.constant 0 : index
    %c0_9 = arith.constant 0 : index
    %11 = vector.load %arg1[%c4, %c0_8, %c0_9] : memref<9x128x16xf32, #tpu.memory_space<vmem>>, vector<1x128x16xf32>
    %12 = vector.shape_cast %11 : vector<1x128x16xf32> to vector<128x16xf32>
    %13 = arith.maximumf %10, %12 : vector<128x16xf32>
    %c5 = arith.constant 5 : index
    %c0_10 = arith.constant 0 : index
    %c0_11 = arith.constant 0 : index
    %14 = vector.load %arg1[%c5, %c0_10, %c0_11] : memref<9x128x16xf32, #tpu.memory_space<vmem>>, vector<1x128x16xf32>
    %15 = vector.shape_cast %14 : vector<1x128x16xf32> to vector<128x16xf32>
    %16 = arith.maximumf %13, %15 : vector<128x16xf32>
    %c6 = arith.constant 6 : index
    %c0_12 = arith.constant 0 : index
    %c0_13 = arith.constant 0 : index
    %17 = vector.load %arg1[%c6, %c0_12, %c0_13] : memref<9x128x16xf32, #tpu.memory_space<vmem>>, vector<1x128x16xf32>
    %18 = vector.shape_cast %17 : vector<1x128x16xf32> to vector<128x16xf32>
    %19 = arith.maximumf %16, %18 : vector<128x16xf32>
    %c7 = arith.constant 7 : index
    %c0_14 = arith.constant 0 : index
    %c0_15 = arith.constant 0 : index
    %20 = vector.load %arg1[%c7, %c0_14, %c0_15] : memref<9x128x16xf32, #tpu.memory_space<vmem>>, vector<1x128x16xf32>
    %21 = vector.shape_cast %20 : vector<1x128x16xf32> to vector<128x16xf32>
    %22 = arith.maximumf %19, %21 : vector<128x16xf32>
    %c8 = arith.constant 8 : index
    %c0_16 = arith.constant 0 : index
    %c0_17 = arith.constant 0 : index
    %23 = vector.load %arg1[%c8, %c0_16, %c0_17] : memref<9x128x16xf32, #tpu.memory_space<vmem>>, vector<1x128x16xf32>
    %24 = vector.shape_cast %23 : vector<1x128x16xf32> to vector<128x16xf32>
    %25 = arith.maximumf %22, %24 : vector<128x16xf32>
    %c0_18 = arith.constant 0 : index
    %c0_19 = arith.constant 0 : index
    %26 = vector.load %arg2[%c0_18, %c0_19] : memref<128x16xf32, #tpu.memory_space<vmem>>, vector<128x16xf32>
    tpu.vector_store %arg2[%c0_18, %c0_19], %25 {strides = array<i32>} : memref<128x16xf32, #tpu.memory_space<vmem>>, vector<128x16xf32>,
    return
  }
  func.func @transform_0(%arg0: i32) -> (i32, i32, i32) {
    %c0_i32 = arith.constant 0 : i32
    %c0_i32_0 = arith.constant 0 : i32
    %c0_i32_1 = arith.constant 0 : i32
    return %c0_i32, %arg0, %c0_i32_0 : i32, i32, i32
  }
  func.func @transform_1(%arg0: i32) -> (i32, i32) {
    %c0_i32 = arith.constant 0 : i32
    %c0_i32_0 = arith.constant 0 : i32
    return %arg0, %c0_i32 : i32, i32
  }
}

module attributes {stable_mosaic.version = 11 : i64} {
  func.func @_conv_matmul_kernel(%arg0: i32, %arg1: memref<128x16xf32, #tpu.memory_space<vmem>>, %arg2: memref<16x128xbf16, #tpu.memory_space<vmem>>, %arg3: memref<1x16xf32, #tpu.memory_space<vmem>>, %arg4: memref<1x16xf32, #tpu.memory_space<vmem>>, %arg5: memref<1x128xf32, #tpu.memory_space<vmem>>, %arg6: memref<1x128xf32, #tpu.memory_space<vmem>>, %arg7: memref<128x128xf32, #tpu.memory_space<vmem>>) attributes {dimension_semantics = [#tpu.dimension_semantics<parallel>], iteration_bounds = array<i64: 1>, scalar_prefetch = 0 : i64, scratch_operands = 0 : i64, tpu.core_type = #tpu.core_type<tc>, window_params = [{transform_indices = @transform_0, window_bounds = array<i64: 128, 16>}, {pipeline_mode = #tpu.pipeline_mode<synchronous>, transform_indices = @transform_1, window_bounds = array<i64: 16, 128>}, {pipeline_mode = #tpu.pipeline_mode<synchronous>, transform_indices = @transform_2, window_bounds = array<i64: 1, 16>}, {pipeline_mode = #tpu.pipeline_mode<synchronous>, transform_indices = @transform_3, window_bounds = array<i64: 1, 16>}, {pipeline_mode = #tpu.pipeline_mode<synchronous>, transform_indices = @transform_4, window_bounds = array<i64: 1, 128>}, {pipeline_mode = #tpu.pipeline_mode<synchronous>, transform_indices = @transform_5, window_bounds = array<i64: 1, 128>}, {transform_indices = @transform_6, window_bounds = array<i64: 128, 128>}]} {
    %c0 = arith.constant 0 : index
    %c0_0 = arith.constant 0 : index
    %0 = vector.load %arg1[%c0, %c0_0] : memref<128x16xf32, #tpu.memory_space<vmem>>, vector<128x16xf32>
    %c0_1 = arith.constant 0 : index
    %c0_2 = arith.constant 0 : index
    %1 = vector.load %arg3[%c0_1, %c0_2] : memref<1x16xf32, #tpu.memory_space<vmem>>, vector<1x16xf32>
    %2 = vector.broadcast %1 : vector<1x16xf32> to vector<128x16xf32>
    %3 = arith.mulf %0, %2 : vector<128x16xf32>
    %c0_3 = arith.constant 0 : index
    %c0_4 = arith.constant 0 : index
    %4 = vector.load %arg4[%c0_3, %c0_4] : memref<1x16xf32, #tpu.memory_space<vmem>>, vector<1x16xf32>
    %5 = vector.broadcast %4 : vector<1x16xf32> to vector<128x16xf32>
    %6 = arith.addf %3, %5 : vector<128x16xf32>
    %cst = arith.constant 0.000000e+00 : f32
    %7 = vector.broadcast %cst : f32 to vector<128x16xf32>
    %8 = arith.maximumf %6, %7 : vector<128x16xf32>
    %9 = arith.truncf %8 : vector<128x16xf32> to vector<128x16xbf16>
    %c0_5 = arith.constant 0 : index
    %c0_6 = arith.constant 0 : index
    %10 = vector.load %arg2[%c0_5, %c0_6] : memref<16x128xbf16, #tpu.memory_space<vmem>>, vector<16x128xbf16>
    %cst_7 = arith.constant dense<0.000000e+00> : vector<128x128xf32>
    %11 = tpu.matmul %9, %10, %cst_7 {dimension_numbers = #tpu.dot_dimension_numbers<[1], [0], [0], [1], [0, 0, 1, 1], [], []>} : vector<128x16xbf16>, vector<16x128xbf16>, vector<128x128xf32> -> vector<128x128xf32>
    %c0_8 = arith.constant 0 : index
    %c0_9 = arith.constant 0 : index
    %12 = vector.load %arg5[%c0_8, %c0_9] : memref<1x128xf32, #tpu.memory_space<vmem>>, vector<1x128xf32>
    %13 = vector.broadcast %12 : vector<1x128xf32> to vector<128x128xf32>
    %14 = arith.mulf %11, %13 : vector<128x128xf32>
    %c0_10 = arith.constant 0 : index
    %c0_11 = arith.constant 0 : index
    %15 = vector.load %arg6[%c0_10, %c0_11] : memref<1x128xf32, #tpu.memory_space<vmem>>, vector<1x128xf32>
    %16 = vector.broadcast %15 : vector<1x128xf32> to vector<128x128xf32>
    %17 = arith.addf %14, %16 : vector<128x128xf32>
    %cst_12 = arith.constant 0.000000e+00 : f32
    %18 = vector.broadcast %cst_12 : f32 to vector<128x128xf32>
    %19 = arith.maximumf %17, %18 : vector<128x128xf32>
    %c0_13 = arith.constant 0 : index
    %c0_14 = arith.constant 0 : index
    %20 = vector.load %arg7[%c0_13, %c0_14] : memref<128x128xf32, #tpu.memory_space<vmem>>, vector<128x128xf32>
    tpu.vector_store %arg7[%c0_13, %c0_14], %19 {strides = array<i32>} : memref<128x128xf32, #tpu.memory_space<vmem>>, vector<128x128xf32>,
    return
  }
  func.func @transform_0(%arg0: i32) -> (i32, i32) {
    %c0_i32 = arith.constant 0 : i32
    %c0_i32_0 = arith.constant 0 : i32
    return %arg0, %c0_i32 : i32, i32
  }
  func.func @transform_1(%arg0: i32) -> (i32, i32) {
    %c0_i32 = arith.constant 0 : i32
    %c0_i32_0 = arith.constant 0 : i32
    %c0_i32_1 = arith.constant 0 : i32
    return %c0_i32, %c0_i32_0 : i32, i32
  }
  func.func @transform_2(%arg0: i32) -> (i32, i32) {
    %c0_i32 = arith.constant 0 : i32
    %c0_i32_0 = arith.constant 0 : i32
    %c0_i32_1 = arith.constant 0 : i32
    return %c0_i32, %c0_i32_0 : i32, i32
  }
  func.func @transform_3(%arg0: i32) -> (i32, i32) {
    %c0_i32 = arith.constant 0 : i32
    %c0_i32_0 = arith.constant 0 : i32
    %c0_i32_1 = arith.constant 0 : i32
    return %c0_i32, %c0_i32_0 : i32, i32
  }
  func.func @transform_4(%arg0: i32) -> (i32, i32) {
    %c0_i32 = arith.constant 0 : i32
    %c0_i32_0 = arith.constant 0 : i32
    %c0_i32_1 = arith.constant 0 : i32
    return %c0_i32, %c0_i32_0 : i32, i32
  }
  func.func @transform_5(%arg0: i32) -> (i32, i32) {
    %c0_i32 = arith.constant 0 : i32
    %c0_i32_0 = arith.constant 0 : i32
    %c0_i32_1 = arith.constant 0 : i32
    return %c0_i32, %c0_i32_0 : i32, i32
  }
  func.func @transform_6(%arg0: i32) -> (i32, i32) {
    %c0_i32 = arith.constant 0 : i32
    %c0_i32_0 = arith.constant 0 : i32
    return %arg0, %c0_i32 : i32, i32
  }
}

module attributes {stable_mosaic.version = 11 : i64} {
  func.func @_conv_matmul_kernel(%arg0: i32, %arg1: memref<128x288xbf16, #tpu.memory_space<vmem>>, %arg2: memref<288x128xbf16, #tpu.memory_space<vmem>>, %arg3: memref<128x128xf32, #tpu.memory_space<vmem>>) attributes {dimension_semantics = [#tpu.dimension_semantics<parallel>], iteration_bounds = array<i64: 1>, scalar_prefetch = 0 : i64, scratch_operands = 0 : i64, tpu.core_type = #tpu.core_type<tc>, window_params = [{transform_indices = @transform_0, window_bounds = array<i64: 128, 288>}, {pipeline_mode = #tpu.pipeline_mode<synchronous>, transform_indices = @transform_1, window_bounds = array<i64: 288, 128>}, {transform_indices = @transform_2, window_bounds = array<i64: 128, 128>}]} {
    %c0 = arith.constant 0 : index
    %c0_0 = arith.constant 0 : index
    %0 = vector.load %arg1[%c0, %c0_0] : memref<128x288xbf16, #tpu.memory_space<vmem>>, vector<128x288xbf16>
    %c0_1 = arith.constant 0 : index
    %c0_2 = arith.constant 0 : index
    %1 = vector.load %arg2[%c0_1, %c0_2] : memref<288x128xbf16, #tpu.memory_space<vmem>>, vector<288x128xbf16>
    %cst = arith.constant dense<0.000000e+00> : vector<128x128xf32>
    %2 = tpu.matmul %0, %1, %cst {dimension_numbers = #tpu.dot_dimension_numbers<[1], [0], [0], [1], [0, 0, 1, 1], [], []>} : vector<128x288xbf16>, vector<288x128xbf16>, vector<128x128xf32> -> vector<128x128xf32>
    %c0_3 = arith.constant 0 : index
    %c0_4 = arith.constant 0 : index
    %3 = vector.load %arg3[%c0_3, %c0_4] : memref<128x128xf32, #tpu.memory_space<vmem>>, vector<128x128xf32>
    tpu.vector_store %arg3[%c0_3, %c0_4], %2 {strides = array<i32>} : memref<128x128xf32, #tpu.memory_space<vmem>>, vector<128x128xf32>,
    return
  }
  func.func @transform_0(%arg0: i32) -> (i32, i32) {
    %c0_i32 = arith.constant 0 : i32
    %c0_i32_0 = arith.constant 0 : i32
    return %arg0, %c0_i32 : i32, i32
  }
  func.func @transform_1(%arg0: i32) -> (i32, i32) {
    %c0_i32 = arith.constant 0 : i32
    %c0_i32_0 = arith.constant 0 : i32
    %c0_i32_1 = arith.constant 0 : i32
    return %c0_i32, %c0_i32_0 : i32, i32
  }
  func.func @transform_2(%arg0: i32) -> (i32, i32) {
    %c0_i32 = arith.constant 0 : i32
    %c0_i32_0 = arith.constant 0 : i32
    return %arg0, %c0_i32 : i32, i32
  }
}

module attributes {stable_mosaic.version = 11 : i64} {
  func.func @_conv_matmul_kernel(%arg0: i32, %arg1: memref<128x24xf32, #tpu.memory_space<vmem>>, %arg2: memref<24x128xbf16, #tpu.memory_space<vmem>>, %arg3: memref<1x24xf32, #tpu.memory_space<vmem>>, %arg4: memref<1x24xf32, #tpu.memory_space<vmem>>, %arg5: memref<1x128xf32, #tpu.memory_space<vmem>>, %arg6: memref<1x128xf32, #tpu.memory_space<vmem>>, %arg7: memref<128x128xf32, #tpu.memory_space<vmem>>) attributes {dimension_semantics = [#tpu.dimension_semantics<parallel>], iteration_bounds = array<i64: 1>, scalar_prefetch = 0 : i64, scratch_operands = 0 : i64, tpu.core_type = #tpu.core_type<tc>, window_params = [{transform_indices = @transform_0, window_bounds = array<i64: 128, 24>}, {pipeline_mode = #tpu.pipeline_mode<synchronous>, transform_indices = @transform_1, window_bounds = array<i64: 24, 128>}, {pipeline_mode = #tpu.pipeline_mode<synchronous>, transform_indices = @transform_2, window_bounds = array<i64: 1, 24>}, {pipeline_mode = #tpu.pipeline_mode<synchronous>, transform_indices = @transform_3, window_bounds = array<i64: 1, 24>}, {pipeline_mode = #tpu.pipeline_mode<synchronous>, transform_indices = @transform_4, window_bounds = array<i64: 1, 128>}, {pipeline_mode = #tpu.pipeline_mode<synchronous>, transform_indices = @transform_5, window_bounds = array<i64: 1, 128>}, {transform_indices = @transform_6, window_bounds = array<i64: 128, 128>}]} {
    %c0 = arith.constant 0 : index
    %c0_0 = arith.constant 0 : index
    %0 = vector.load %arg1[%c0, %c0_0] : memref<128x24xf32, #tpu.memory_space<vmem>>, vector<128x24xf32>
    %c0_1 = arith.constant 0 : index
    %c0_2 = arith.constant 0 : index
    %1 = vector.load %arg3[%c0_1, %c0_2] : memref<1x24xf32, #tpu.memory_space<vmem>>, vector<1x24xf32>
    %2 = vector.broadcast %1 : vector<1x24xf32> to vector<128x24xf32>
    %3 = arith.mulf %0, %2 : vector<128x24xf32>
    %c0_3 = arith.constant 0 : index
    %c0_4 = arith.constant 0 : index
    %4 = vector.load %arg4[%c0_3, %c0_4] : memref<1x24xf32, #tpu.memory_space<vmem>>, vector<1x24xf32>
    %5 = vector.broadcast %4 : vector<1x24xf32> to vector<128x24xf32>
    %6 = arith.addf %3, %5 : vector<128x24xf32>
    %cst = arith.constant 0.000000e+00 : f32
    %7 = vector.broadcast %cst : f32 to vector<128x24xf32>
    %8 = arith.maximumf %6, %7 : vector<128x24xf32>
    %9 = arith.truncf %8 : vector<128x24xf32> to vector<128x24xbf16>
    %c0_5 = arith.constant 0 : index
    %c0_6 = arith.constant 0 : index
    %10 = vector.load %arg2[%c0_5, %c0_6] : memref<24x128xbf16, #tpu.memory_space<vmem>>, vector<24x128xbf16>
    %cst_7 = arith.constant dense<0.000000e+00> : vector<128x128xf32>
    %11 = tpu.matmul %9, %10, %cst_7 {dimension_numbers = #tpu.dot_dimension_numbers<[1], [0], [0], [1], [0, 0, 1, 1], [], []>} : vector<128x24xbf16>, vector<24x128xbf16>, vector<128x128xf32> -> vector<128x128xf32>
    %c0_8 = arith.constant 0 : index
    %c0_9 = arith.constant 0 : index
    %12 = vector.load %arg5[%c0_8, %c0_9] : memref<1x128xf32, #tpu.memory_space<vmem>>, vector<1x128xf32>
    %13 = vector.broadcast %12 : vector<1x128xf32> to vector<128x128xf32>
    %14 = arith.mulf %11, %13 : vector<128x128xf32>
    %c0_10 = arith.constant 0 : index
    %c0_11 = arith.constant 0 : index
    %15 = vector.load %arg6[%c0_10, %c0_11] : memref<1x128xf32, #tpu.memory_space<vmem>>, vector<1x128xf32>
    %16 = vector.broadcast %15 : vector<1x128xf32> to vector<128x128xf32>
    %17 = arith.addf %14, %16 : vector<128x128xf32>
    %cst_12 = arith.constant 0.000000e+00 : f32
    %18 = vector.broadcast %cst_12 : f32 to vector<128x128xf32>
    %19 = arith.maximumf %17, %18 : vector<128x128xf32>
    %c0_13 = arith.constant 0 : index
    %c0_14 = arith.constant 0 : index
    %20 = vector.load %arg7[%c0_13, %c0_14] : memref<128x128xf32, #tpu.memory_space<vmem>>, vector<128x128xf32>
    tpu.vector_store %arg7[%c0_13, %c0_14], %19 {strides = array<i32>} : memref<128x128xf32, #tpu.memory_space<vmem>>, vector<128x128xf32>,
    return
  }
  func.func @transform_0(%arg0: i32) -> (i32, i32) {
    %c0_i32 = arith.constant 0 : i32
    %c0_i32_0 = arith.constant 0 : i32
    return %arg0, %c0_i32 : i32, i32
  }
  func.func @transform_1(%arg0: i32) -> (i32, i32) {
    %c0_i32 = arith.constant 0 : i32
    %c0_i32_0 = arith.constant 0 : i32
    %c0_i32_1 = arith.constant 0 : i32
    return %c0_i32, %c0_i32_0 : i32, i32
  }
  func.func @transform_2(%arg0: i32) -> (i32, i32) {
    %c0_i32 = arith.constant 0 : i32
    %c0_i32_0 = arith.constant 0 : i32
    %c0_i32_1 = arith.constant 0 : i32
    return %c0_i32, %c0_i32_0 : i32, i32
  }
  func.func @transform_3(%arg0: i32) -> (i32, i32) {
    %c0_i32 = arith.constant 0 : i32
    %c0_i32_0 = arith.constant 0 : i32
    %c0_i32_1 = arith.constant 0 : i32
    return %c0_i32, %c0_i32_0 : i32, i32
  }
  func.func @transform_4(%arg0: i32) -> (i32, i32) {
    %c0_i32 = arith.constant 0 : i32
    %c0_i32_0 = arith.constant 0 : i32
    %c0_i32_1 = arith.constant 0 : i32
    return %c0_i32, %c0_i32_0 : i32, i32
  }
  func.func @transform_5(%arg0: i32) -> (i32, i32) {
    %c0_i32 = arith.constant 0 : i32
    %c0_i32_0 = arith.constant 0 : i32
    %c0_i32_1 = arith.constant 0 : i32
    return %c0_i32, %c0_i32_0 : i32, i32
  }
  func.func @transform_6(%arg0: i32) -> (i32, i32) {
    %c0_i32 = arith.constant 0 : i32
    %c0_i32_0 = arith.constant 0 : i32
    return %arg0, %c0_i32 : i32, i32
  }
}

module attributes {stable_mosaic.version = 11 : i64} {
  func.func @_transition_kernel(%arg0: i32, %arg1: memref<4x32x32xf32, #tpu.memory_space<vmem>>, %arg2: memref<1x32xf32, #tpu.memory_space<vmem>>, %arg3: memref<1x32xf32, #tpu.memory_space<vmem>>, %arg4: memref<32x128xbf16, #tpu.memory_space<vmem>>, %arg5: memref<32x128xf32, #tpu.memory_space<vmem>>) attributes {dimension_semantics = [#tpu.dimension_semantics<parallel>], iteration_bounds = array<i64: 1>, scalar_prefetch = 0 : i64, scratch_operands = 0 : i64, tpu.core_type = #tpu.core_type<tc>, window_params = [{transform_indices = @transform_0, window_bounds = array<i64: 4, 32, 32>}, {pipeline_mode = #tpu.pipeline_mode<synchronous>, transform_indices = @transform_1, window_bounds = array<i64: 1, 32>}, {pipeline_mode = #tpu.pipeline_mode<synchronous>, transform_indices = @transform_2, window_bounds = array<i64: 1, 32>}, {pipeline_mode = #tpu.pipeline_mode<synchronous>, transform_indices = @transform_3, window_bounds = array<i64: 32, 128>}, {transform_indices = @transform_4, window_bounds = array<i64: 32, 128>}]} {
    %c0 = arith.constant 0 : index
    %c0_0 = arith.constant 0 : index
    %0 = vector.load %arg2[%c0, %c0_0] : memref<1x32xf32, #tpu.memory_space<vmem>>, vector<1x32xf32>
    %c0_1 = arith.constant 0 : index
    %c0_2 = arith.constant 0 : index
    %1 = vector.load %arg3[%c0_1, %c0_2] : memref<1x32xf32, #tpu.memory_space<vmem>>, vector<1x32xf32>
    %c0_3 = arith.constant 0 : index
    %c0_4 = arith.constant 0 : index
    %c0_5 = arith.constant 0 : index
    %2 = vector.load %arg1[%c0_3, %c0_4, %c0_5] : memref<4x32x32xf32, #tpu.memory_space<vmem>>, vector<1x32x32xf32>
    %3 = vector.shape_cast %2 : vector<1x32x32xf32> to vector<32x32xf32>
    %4 = vector.broadcast %0 : vector<1x32xf32> to vector<32x32xf32>
    %5 = arith.mulf %3, %4 : vector<32x32xf32>
    %6 = vector.broadcast %1 : vector<1x32xf32> to vector<32x32xf32>
    %7 = arith.addf %5, %6 : vector<32x32xf32>
    %cst = arith.constant 0.000000e+00 : f32
    %8 = vector.broadcast %cst : f32 to vector<32x32xf32>
    %9 = arith.maximumf %7, %8 : vector<32x32xf32>
    %c1 = arith.constant 1 : index
    %c0_6 = arith.constant 0 : index
    %c0_7 = arith.constant 0 : index
    %10 = vector.load %arg1[%c1, %c0_6, %c0_7] : memref<4x32x32xf32, #tpu.memory_space<vmem>>, vector<1x32x32xf32>
    %11 = vector.shape_cast %10 : vector<1x32x32xf32> to vector<32x32xf32>
    %12 = vector.broadcast %0 : vector<1x32xf32> to vector<32x32xf32>
    %13 = arith.mulf %11, %12 : vector<32x32xf32>
    %14 = vector.broadcast %1 : vector<1x32xf32> to vector<32x32xf32>
    %15 = arith.addf %13, %14 : vector<32x32xf32>
    %cst_8 = arith.constant 0.000000e+00 : f32
    %16 = vector.broadcast %cst_8 : f32 to vector<32x32xf32>
    %17 = arith.maximumf %15, %16 : vector<32x32xf32>
    %18 = arith.addf %9, %17 : vector<32x32xf32>
    %c2 = arith.constant 2 : index
    %c0_9 = arith.constant 0 : index
    %c0_10 = arith.constant 0 : index
    %19 = vector.load %arg1[%c2, %c0_9, %c0_10] : memref<4x32x32xf32, #tpu.memory_space<vmem>>, vector<1x32x32xf32>
    %20 = vector.shape_cast %19 : vector<1x32x32xf32> to vector<32x32xf32>
    %21 = vector.broadcast %0 : vector<1x32xf32> to vector<32x32xf32>
    %22 = arith.mulf %20, %21 : vector<32x32xf32>
    %23 = vector.broadcast %1 : vector<1x32xf32> to vector<32x32xf32>
    %24 = arith.addf %22, %23 : vector<32x32xf32>
    %cst_11 = arith.constant 0.000000e+00 : f32
    %25 = vector.broadcast %cst_11 : f32 to vector<32x32xf32>
    %26 = arith.maximumf %24, %25 : vector<32x32xf32>
    %27 = arith.addf %18, %26 : vector<32x32xf32>
    %c3 = arith.constant 3 : index
    %c0_12 = arith.constant 0 : index
    %c0_13 = arith.constant 0 : index
    %28 = vector.load %arg1[%c3, %c0_12, %c0_13] : memref<4x32x32xf32, #tpu.memory_space<vmem>>, vector<1x32x32xf32>
    %29 = vector.shape_cast %28 : vector<1x32x32xf32> to vector<32x32xf32>
    %30 = vector.broadcast %0 : vector<1x32xf32> to vector<32x32xf32>
    %31 = arith.mulf %29, %30 : vector<32x32xf32>
    %32 = vector.broadcast %1 : vector<1x32xf32> to vector<32x32xf32>
    %33 = arith.addf %31, %32 : vector<32x32xf32>
    %cst_14 = arith.constant 0.000000e+00 : f32
    %34 = vector.broadcast %cst_14 : f32 to vector<32x32xf32>
    %35 = arith.maximumf %33, %34 : vector<32x32xf32>
    %36 = arith.addf %27, %35 : vector<32x32xf32>
    %cst_15 = arith.constant 2.500000e-01 : f32
    %37 = vector.broadcast %cst_15 : f32 to vector<32x32xf32>
    %38 = arith.mulf %36, %37 : vector<32x32xf32>
    %39 = arith.truncf %38 : vector<32x32xf32> to vector<32x32xbf16>
    %c0_16 = arith.constant 0 : index
    %c0_17 = arith.constant 0 : index
    %40 = vector.load %arg4[%c0_16, %c0_17] : memref<32x128xbf16, #tpu.memory_space<vmem>>, vector<32x128xbf16>
    %cst_18 = arith.constant dense<0.000000e+00> : vector<32x128xf32>
    %41 = tpu.matmul %39, %40, %cst_18 {dimension_numbers = #tpu.dot_dimension_numbers<[1], [0], [0], [1], [0, 0, 1, 1], [], []>} : vector<32x32xbf16>, vector<32x128xbf16>, vector<32x128xf32> -> vector<32x128xf32>
    %c0_19 = arith.constant 0 : index
    %c0_20 = arith.constant 0 : index
    %42 = vector.load %arg5[%c0_19, %c0_20] : memref<32x128xf32, #tpu.memory_space<vmem>>, vector<32x128xf32>
    tpu.vector_store %arg5[%c0_19, %c0_20], %41 {strides = array<i32>} : memref<32x128xf32, #tpu.memory_space<vmem>>, vector<32x128xf32>,
    return
  }
  func.func @transform_0(%arg0: i32) -> (i32, i32, i32) {
    %c0_i32 = arith.constant 0 : i32
    %c0_i32_0 = arith.constant 0 : i32
    %c0_i32_1 = arith.constant 0 : i32
    return %c0_i32, %arg0, %c0_i32_0 : i32, i32, i32
  }
  func.func @transform_1(%arg0: i32) -> (i32, i32) {
    %c0_i32 = arith.constant 0 : i32
    %c0_i32_0 = arith.constant 0 : i32
    %c0_i32_1 = arith.constant 0 : i32
    return %c0_i32, %c0_i32_0 : i32, i32
  }
  func.func @transform_2(%arg0: i32) -> (i32, i32) {
    %c0_i32 = arith.constant 0 : i32
    %c0_i32_0 = arith.constant 0 : i32
    %c0_i32_1 = arith.constant 0 : i32
    return %c0_i32, %c0_i32_0 : i32, i32
  }
  func.func @transform_3(%arg0: i32) -> (i32, i32) {
    %c0_i32 = arith.constant 0 : i32
    %c0_i32_0 = arith.constant 0 : i32
    %c0_i32_1 = arith.constant 0 : i32
    return %c0_i32, %c0_i32_0 : i32, i32
  }
  func.func @transform_4(%arg0: i32) -> (i32, i32) {
    %c0_i32 = arith.constant 0 : i32
    %c0_i32_0 = arith.constant 0 : i32
    return %arg0, %c0_i32 : i32, i32
  }
}

module attributes {stable_mosaic.version = 11 : i64} {
  func.func @_conv_matmul_kernel(%arg0: i32, %arg1: memref<32x16xf32, #tpu.memory_space<vmem>>, %arg2: memref<16x128xbf16, #tpu.memory_space<vmem>>, %arg3: memref<1x16xf32, #tpu.memory_space<vmem>>, %arg4: memref<1x16xf32, #tpu.memory_space<vmem>>, %arg5: memref<1x128xf32, #tpu.memory_space<vmem>>, %arg6: memref<1x128xf32, #tpu.memory_space<vmem>>, %arg7: memref<32x128xf32, #tpu.memory_space<vmem>>) attributes {dimension_semantics = [#tpu.dimension_semantics<parallel>], iteration_bounds = array<i64: 1>, scalar_prefetch = 0 : i64, scratch_operands = 0 : i64, tpu.core_type = #tpu.core_type<tc>, window_params = [{transform_indices = @transform_0, window_bounds = array<i64: 32, 16>}, {pipeline_mode = #tpu.pipeline_mode<synchronous>, transform_indices = @transform_1, window_bounds = array<i64: 16, 128>}, {pipeline_mode = #tpu.pipeline_mode<synchronous>, transform_indices = @transform_2, window_bounds = array<i64: 1, 16>}, {pipeline_mode = #tpu.pipeline_mode<synchronous>, transform_indices = @transform_3, window_bounds = array<i64: 1, 16>}, {pipeline_mode = #tpu.pipeline_mode<synchronous>, transform_indices = @transform_4, window_bounds = array<i64: 1, 128>}, {pipeline_mode = #tpu.pipeline_mode<synchronous>, transform_indices = @transform_5, window_bounds = array<i64: 1, 128>}, {transform_indices = @transform_6, window_bounds = array<i64: 32, 128>}]} {
    %c0 = arith.constant 0 : index
    %c0_0 = arith.constant 0 : index
    %0 = vector.load %arg1[%c0, %c0_0] : memref<32x16xf32, #tpu.memory_space<vmem>>, vector<32x16xf32>
    %c0_1 = arith.constant 0 : index
    %c0_2 = arith.constant 0 : index
    %1 = vector.load %arg3[%c0_1, %c0_2] : memref<1x16xf32, #tpu.memory_space<vmem>>, vector<1x16xf32>
    %2 = vector.broadcast %1 : vector<1x16xf32> to vector<32x16xf32>
    %3 = arith.mulf %0, %2 : vector<32x16xf32>
    %c0_3 = arith.constant 0 : index
    %c0_4 = arith.constant 0 : index
    %4 = vector.load %arg4[%c0_3, %c0_4] : memref<1x16xf32, #tpu.memory_space<vmem>>, vector<1x16xf32>
    %5 = vector.broadcast %4 : vector<1x16xf32> to vector<32x16xf32>
    %6 = arith.addf %3, %5 : vector<32x16xf32>
    %cst = arith.constant 0.000000e+00 : f32
    %7 = vector.broadcast %cst : f32 to vector<32x16xf32>
    %8 = arith.maximumf %6, %7 : vector<32x16xf32>
    %9 = arith.truncf %8 : vector<32x16xf32> to vector<32x16xbf16>
    %c0_5 = arith.constant 0 : index
    %c0_6 = arith.constant 0 : index
    %10 = vector.load %arg2[%c0_5, %c0_6] : memref<16x128xbf16, #tpu.memory_space<vmem>>, vector<16x128xbf16>
    %cst_7 = arith.constant dense<0.000000e+00> : vector<32x128xf32>
    %11 = tpu.matmul %9, %10, %cst_7 {dimension_numbers = #tpu.dot_dimension_numbers<[1], [0], [0], [1], [0, 0, 1, 1], [], []>} : vector<32x16xbf16>, vector<16x128xbf16>, vector<32x128xf32> -> vector<32x128xf32>
    %c0_8 = arith.constant 0 : index
    %c0_9 = arith.constant 0 : index
    %12 = vector.load %arg5[%c0_8, %c0_9] : memref<1x128xf32, #tpu.memory_space<vmem>>, vector<1x128xf32>
    %13 = vector.broadcast %12 : vector<1x128xf32> to vector<32x128xf32>
    %14 = arith.mulf %11, %13 : vector<32x128xf32>
    %c0_10 = arith.constant 0 : index
    %c0_11 = arith.constant 0 : index
    %15 = vector.load %arg6[%c0_10, %c0_11] : memref<1x128xf32, #tpu.memory_space<vmem>>, vector<1x128xf32>
    %16 = vector.broadcast %15 : vector<1x128xf32> to vector<32x128xf32>
    %17 = arith.addf %14, %16 : vector<32x128xf32>
    %cst_12 = arith.constant 0.000000e+00 : f32
    %18 = vector.broadcast %cst_12 : f32 to vector<32x128xf32>
    %19 = arith.maximumf %17, %18 : vector<32x128xf32>
    %c0_13 = arith.constant 0 : index
    %c0_14 = arith.constant 0 : index
    %20 = vector.load %arg7[%c0_13, %c0_14] : memref<32x128xf32, #tpu.memory_space<vmem>>, vector<32x128xf32>
    tpu.vector_store %arg7[%c0_13, %c0_14], %19 {strides = array<i32>} : memref<32x128xf32, #tpu.memory_space<vmem>>, vector<32x128xf32>,
    return
  }
  func.func @transform_0(%arg0: i32) -> (i32, i32) {
    %c0_i32 = arith.constant 0 : i32
    %c0_i32_0 = arith.constant 0 : i32
    return %arg0, %c0_i32 : i32, i32
  }
  func.func @transform_1(%arg0: i32) -> (i32, i32) {
    %c0_i32 = arith.constant 0 : i32
    %c0_i32_0 = arith.constant 0 : i32
    %c0_i32_1 = arith.constant 0 : i32
    return %c0_i32, %c0_i32_0 : i32, i32
  }
  func.func @transform_2(%arg0: i32) -> (i32, i32) {
    %c0_i32 = arith.constant 0 : i32
    %c0_i32_0 = arith.constant 0 : i32
    %c0_i32_1 = arith.constant 0 : i32
    return %c0_i32, %c0_i32_0 : i32, i32
  }
  func.func @transform_3(%arg0: i32) -> (i32, i32) {
    %c0_i32 = arith.constant 0 : i32
    %c0_i32_0 = arith.constant 0 : i32
    %c0_i32_1 = arith.constant 0 : i32
    return %c0_i32, %c0_i32_0 : i32, i32
  }
  func.func @transform_4(%arg0: i32) -> (i32, i32) {
    %c0_i32 = arith.constant 0 : i32
    %c0_i32_0 = arith.constant 0 : i32
    %c0_i32_1 = arith.constant 0 : i32
    return %c0_i32, %c0_i32_0 : i32, i32
  }
  func.func @transform_5(%arg0: i32) -> (i32, i32) {
    %c0_i32 = arith.constant 0 : i32
    %c0_i32_0 = arith.constant 0 : i32
    %c0_i32_1 = arith.constant 0 : i32
    return %c0_i32, %c0_i32_0 : i32, i32
  }
  func.func @transform_6(%arg0: i32) -> (i32, i32) {
    %c0_i32 = arith.constant 0 : i32
    %c0_i32_0 = arith.constant 0 : i32
    return %arg0, %c0_i32 : i32, i32
  }
}

module attributes {stable_mosaic.version = 11 : i64} {
  func.func @_conv_matmul_kernel(%arg0: i32, %arg1: memref<32x288xbf16, #tpu.memory_space<vmem>>, %arg2: memref<288x128xbf16, #tpu.memory_space<vmem>>, %arg3: memref<32x128xf32, #tpu.memory_space<vmem>>) attributes {dimension_semantics = [#tpu.dimension_semantics<parallel>], iteration_bounds = array<i64: 1>, scalar_prefetch = 0 : i64, scratch_operands = 0 : i64, tpu.core_type = #tpu.core_type<tc>, window_params = [{transform_indices = @transform_0, window_bounds = array<i64: 32, 288>}, {pipeline_mode = #tpu.pipeline_mode<synchronous>, transform_indices = @transform_1, window_bounds = array<i64: 288, 128>}, {transform_indices = @transform_2, window_bounds = array<i64: 32, 128>}]} {
    %c0 = arith.constant 0 : index
    %c0_0 = arith.constant 0 : index
    %0 = vector.load %arg1[%c0, %c0_0] : memref<32x288xbf16, #tpu.memory_space<vmem>>, vector<32x288xbf16>
    %c0_1 = arith.constant 0 : index
    %c0_2 = arith.constant 0 : index
    %1 = vector.load %arg2[%c0_1, %c0_2] : memref<288x128xbf16, #tpu.memory_space<vmem>>, vector<288x128xbf16>
    %cst = arith.constant dense<0.000000e+00> : vector<32x128xf32>
    %2 = tpu.matmul %0, %1, %cst {dimension_numbers = #tpu.dot_dimension_numbers<[1], [0], [0], [1], [0, 0, 1, 1], [], []>} : vector<32x288xbf16>, vector<288x128xbf16>, vector<32x128xf32> -> vector<32x128xf32>
    %c0_3 = arith.constant 0 : index
    %c0_4 = arith.constant 0 : index
    %3 = vector.load %arg3[%c0_3, %c0_4] : memref<32x128xf32, #tpu.memory_space<vmem>>, vector<32x128xf32>
    tpu.vector_store %arg3[%c0_3, %c0_4], %2 {strides = array<i32>} : memref<32x128xf32, #tpu.memory_space<vmem>>, vector<32x128xf32>,
    return
  }
  func.func @transform_0(%arg0: i32) -> (i32, i32) {
    %c0_i32 = arith.constant 0 : i32
    %c0_i32_0 = arith.constant 0 : i32
    return %arg0, %c0_i32 : i32, i32
  }
  func.func @transform_1(%arg0: i32) -> (i32, i32) {
    %c0_i32 = arith.constant 0 : i32
    %c0_i32_0 = arith.constant 0 : i32
    %c0_i32_1 = arith.constant 0 : i32
    return %c0_i32, %c0_i32_0 : i32, i32
  }
  func.func @transform_2(%arg0: i32) -> (i32, i32) {
    %c0_i32 = arith.constant 0 : i32
    %c0_i32_0 = arith.constant 0 : i32
    return %arg0, %c0_i32 : i32, i32
  }
}

module attributes {stable_mosaic.version = 11 : i64} {
  func.func @_conv_matmul_kernel(%arg0: i32, %arg1: memref<32x24xf32, #tpu.memory_space<vmem>>, %arg2: memref<24x128xbf16, #tpu.memory_space<vmem>>, %arg3: memref<1x24xf32, #tpu.memory_space<vmem>>, %arg4: memref<1x24xf32, #tpu.memory_space<vmem>>, %arg5: memref<1x128xf32, #tpu.memory_space<vmem>>, %arg6: memref<1x128xf32, #tpu.memory_space<vmem>>, %arg7: memref<32x128xf32, #tpu.memory_space<vmem>>) attributes {dimension_semantics = [#tpu.dimension_semantics<parallel>], iteration_bounds = array<i64: 1>, scalar_prefetch = 0 : i64, scratch_operands = 0 : i64, tpu.core_type = #tpu.core_type<tc>, window_params = [{transform_indices = @transform_0, window_bounds = array<i64: 32, 24>}, {pipeline_mode = #tpu.pipeline_mode<synchronous>, transform_indices = @transform_1, window_bounds = array<i64: 24, 128>}, {pipeline_mode = #tpu.pipeline_mode<synchronous>, transform_indices = @transform_2, window_bounds = array<i64: 1, 24>}, {pipeline_mode = #tpu.pipeline_mode<synchronous>, transform_indices = @transform_3, window_bounds = array<i64: 1, 24>}, {pipeline_mode = #tpu.pipeline_mode<synchronous>, transform_indices = @transform_4, window_bounds = array<i64: 1, 128>}, {pipeline_mode = #tpu.pipeline_mode<synchronous>, transform_indices = @transform_5, window_bounds = array<i64: 1, 128>}, {transform_indices = @transform_6, window_bounds = array<i64: 32, 128>}]} {
    %c0 = arith.constant 0 : index
    %c0_0 = arith.constant 0 : index
    %0 = vector.load %arg1[%c0, %c0_0] : memref<32x24xf32, #tpu.memory_space<vmem>>, vector<32x24xf32>
    %c0_1 = arith.constant 0 : index
    %c0_2 = arith.constant 0 : index
    %1 = vector.load %arg3[%c0_1, %c0_2] : memref<1x24xf32, #tpu.memory_space<vmem>>, vector<1x24xf32>
    %2 = vector.broadcast %1 : vector<1x24xf32> to vector<32x24xf32>
    %3 = arith.mulf %0, %2 : vector<32x24xf32>
    %c0_3 = arith.constant 0 : index
    %c0_4 = arith.constant 0 : index
    %4 = vector.load %arg4[%c0_3, %c0_4] : memref<1x24xf32, #tpu.memory_space<vmem>>, vector<1x24xf32>
    %5 = vector.broadcast %4 : vector<1x24xf32> to vector<32x24xf32>
    %6 = arith.addf %3, %5 : vector<32x24xf32>
    %cst = arith.constant 0.000000e+00 : f32
    %7 = vector.broadcast %cst : f32 to vector<32x24xf32>
    %8 = arith.maximumf %6, %7 : vector<32x24xf32>
    %9 = arith.truncf %8 : vector<32x24xf32> to vector<32x24xbf16>
    %c0_5 = arith.constant 0 : index
    %c0_6 = arith.constant 0 : index
    %10 = vector.load %arg2[%c0_5, %c0_6] : memref<24x128xbf16, #tpu.memory_space<vmem>>, vector<24x128xbf16>
    %cst_7 = arith.constant dense<0.000000e+00> : vector<32x128xf32>
    %11 = tpu.matmul %9, %10, %cst_7 {dimension_numbers = #tpu.dot_dimension_numbers<[1], [0], [0], [1], [0, 0, 1, 1], [], []>} : vector<32x24xbf16>, vector<24x128xbf16>, vector<32x128xf32> -> vector<32x128xf32>
    %c0_8 = arith.constant 0 : index
    %c0_9 = arith.constant 0 : index
    %12 = vector.load %arg5[%c0_8, %c0_9] : memref<1x128xf32, #tpu.memory_space<vmem>>, vector<1x128xf32>
    %13 = vector.broadcast %12 : vector<1x128xf32> to vector<32x128xf32>
    %14 = arith.mulf %11, %13 : vector<32x128xf32>
    %c0_10 = arith.constant 0 : index
    %c0_11 = arith.constant 0 : index
    %15 = vector.load %arg6[%c0_10, %c0_11] : memref<1x128xf32, #tpu.memory_space<vmem>>, vector<1x128xf32>
    %16 = vector.broadcast %15 : vector<1x128xf32> to vector<32x128xf32>
    %17 = arith.addf %14, %16 : vector<32x128xf32>
    %cst_12 = arith.constant 0.000000e+00 : f32
    %18 = vector.broadcast %cst_12 : f32 to vector<32x128xf32>
    %19 = arith.maximumf %17, %18 : vector<32x128xf32>
    %c0_13 = arith.constant 0 : index
    %c0_14 = arith.constant 0 : index
    %20 = vector.load %arg7[%c0_13, %c0_14] : memref<32x128xf32, #tpu.memory_space<vmem>>, vector<32x128xf32>
    tpu.vector_store %arg7[%c0_13, %c0_14], %19 {strides = array<i32>} : memref<32x128xf32, #tpu.memory_space<vmem>>, vector<32x128xf32>,
    return
  }
  func.func @transform_0(%arg0: i32) -> (i32, i32) {
    %c0_i32 = arith.constant 0 : i32
    %c0_i32_0 = arith.constant 0 : i32
    return %arg0, %c0_i32 : i32, i32
  }
  func.func @transform_1(%arg0: i32) -> (i32, i32) {
    %c0_i32 = arith.constant 0 : i32
    %c0_i32_0 = arith.constant 0 : i32
    %c0_i32_1 = arith.constant 0 : i32
    return %c0_i32, %c0_i32_0 : i32, i32
  }
  func.func @transform_2(%arg0: i32) -> (i32, i32) {
    %c0_i32 = arith.constant 0 : i32
    %c0_i32_0 = arith.constant 0 : i32
    %c0_i32_1 = arith.constant 0 : i32
    return %c0_i32, %c0_i32_0 : i32, i32
  }
  func.func @transform_3(%arg0: i32) -> (i32, i32) {
    %c0_i32 = arith.constant 0 : i32
    %c0_i32_0 = arith.constant 0 : i32
    %c0_i32_1 = arith.constant 0 : i32
    return %c0_i32, %c0_i32_0 : i32, i32
  }
  func.func @transform_4(%arg0: i32) -> (i32, i32) {
    %c0_i32 = arith.constant 0 : i32
    %c0_i32_0 = arith.constant 0 : i32
    %c0_i32_1 = arith.constant 0 : i32
    return %c0_i32, %c0_i32_0 : i32, i32
  }
  func.func @transform_5(%arg0: i32) -> (i32, i32) {
    %c0_i32 = arith.constant 0 : i32
    %c0_i32_0 = arith.constant 0 : i32
    %c0_i32_1 = arith.constant 0 : i32
    return %c0_i32, %c0_i32_0 : i32, i32
  }
  func.func @transform_6(%arg0: i32) -> (i32, i32) {
    %c0_i32 = arith.constant 0 : i32
    %c0_i32_0 = arith.constant 0 : i32
    return %arg0, %c0_i32 : i32, i32
  }
}

module attributes {stable_mosaic.version = 11 : i64} {
  func.func @_head_kernel(%arg0: memref<2x16x32xf32, #tpu.memory_space<vmem>>, %arg1: memref<1x1x32xf32, #tpu.memory_space<vmem>>, %arg2: memref<1x1x32xf32, #tpu.memory_space<vmem>>, %arg3: memref<32x128xbf16, #tpu.memory_space<vmem>>, %arg4: memref<1x128xf32, #tpu.memory_space<vmem>>, %arg5: memref<2x128xf32, #tpu.memory_space<vmem>>) attributes {dimension_semantics = [], scalar_prefetch = 0 : i64, scratch_operands = 0 : i64, tpu.core_type = #tpu.core_type<tc>} {
    %c0 = arith.constant 0 : index
    %c0_0 = arith.constant 0 : index
    %c0_1 = arith.constant 0 : index
    %0 = vector.load %arg0[%c0, %c0_0, %c0_1] : memref<2x16x32xf32, #tpu.memory_space<vmem>>, vector<2x16x32xf32>
    %c0_2 = arith.constant 0 : index
    %c0_3 = arith.constant 0 : index
    %c0_4 = arith.constant 0 : index
    %1 = vector.load %arg1[%c0_2, %c0_3, %c0_4] : memref<1x1x32xf32, #tpu.memory_space<vmem>>, vector<1x1x32xf32>
    %2 = vector.broadcast %1 : vector<1x1x32xf32> to vector<2x16x32xf32>
    %3 = arith.mulf %0, %2 : vector<2x16x32xf32>
    %c0_5 = arith.constant 0 : index
    %c0_6 = arith.constant 0 : index
    %c0_7 = arith.constant 0 : index
    %4 = vector.load %arg2[%c0_5, %c0_6, %c0_7] : memref<1x1x32xf32, #tpu.memory_space<vmem>>, vector<1x1x32xf32>
    %5 = vector.broadcast %4 : vector<1x1x32xf32> to vector<2x16x32xf32>
    %6 = arith.addf %3, %5 : vector<2x16x32xf32>
    %cst = arith.constant 0.000000e+00 : f32
    %7 = vector.broadcast %cst : f32 to vector<2x16x32xf32>
    %8 = arith.maximumf %6, %7 : vector<2x16x32xf32>
    %cst_8 = arith.constant dense<0.000000e+00> : vector<2x32xf32>
    %9 = vector.multi_reduction <add>, %8, %cst_8 [1] : vector<2x16x32xf32> to vector<2x32xf32>
    %cst_9 = arith.constant 1.600000e+01 : f32
    %10 = vector.broadcast %cst_9 : f32 to vector<2x32xf32>
    %11 = arith.divf %9, %10 : vector<2x32xf32>
    %12 = arith.truncf %11 : vector<2x32xf32> to vector<2x32xbf16>
    %c0_10 = arith.constant 0 : index
    %c0_11 = arith.constant 0 : index
    %13 = vector.load %arg3[%c0_10, %c0_11] : memref<32x128xbf16, #tpu.memory_space<vmem>>, vector<32x128xbf16>
    %cst_12 = arith.constant dense<0.000000e+00> : vector<2x128xf32>
    %14 = tpu.matmul %12, %13, %cst_12 {dimension_numbers = #tpu.dot_dimension_numbers<[1], [0], [0], [1], [0, 0, 1, 1], [], []>} : vector<2x32xbf16>, vector<32x128xbf16>, vector<2x128xf32> -> vector<2x128xf32>
    %c0_13 = arith.constant 0 : index
    %c0_14 = arith.constant 0 : index
    %15 = vector.load %arg4[%c0_13, %c0_14] : memref<1x128xf32, #tpu.memory_space<vmem>>, vector<1x128xf32>
    %16 = vector.broadcast %15 : vector<1x128xf32> to vector<2x128xf32>
    %17 = arith.addf %14, %16 : vector<2x128xf32>
    %c0_15 = arith.constant 0 : index
    %c0_16 = arith.constant 0 : index
    %18 = vector.load %arg5[%c0_15, %c0_16] : memref<2x128xf32, #tpu.memory_space<vmem>>, vector<2x128xf32>
    tpu.vector_store %arg5[%c0_15, %c0_16], %17 {strides = array<i32>} : memref<2x128xf32, #tpu.memory_space<vmem>>, vector<2x128xf32>,
    return
  }
}

</mosaic_0001>

<bundles_post_ra>
// kernel: forward.12
= control target key start
LH: loop header
LB: loop body
LE: loop exit
PB: predicated region body
PF: predicated region fallthrough
CT: control target
= control target key end

     0   :  { %s857_s15 = smov 0   ;;  %s1032_s0 = inlined_call_operand.vmem [shape: bf16[512,49], index: 0, kind: input, shape index: {}]   ;;  %s1033_s1 = inlined_call_operand.vmem [shape: bf16[49,128], index: 1, kind: input, shape index: {}]   ;;  %s1034_s2 = inlined_call_operand.vmem [shape: f32[1,128], index: 2, kind: input, shape index: {}]   ;;  %s1035_s3 = inlined_call_operand.vmem [shape: f32[1,128], index: 3, kind: input, shape index: {}]   ;;  %s1036_s4 = inlined_call_operand.vmem [shape: f32[512,128], index: 4, kind: output, shape index: {}]  }
   0x1 LB: > { %s678_s16 = sadd.s32 4294967295, %s829_s15   ;;  %p682_p0 = scmp.ge.s32.totalorder %s829_s15, 1  ;;  %s829_s15 = sphi %s857_s15, %s14_s15  }
   0x2   : > { %p163_p1 = scmp.lt.s32.totalorder %s829_s15, 3 }
   0x4   : > { %p164_p2 = pnand %p682_p0, %p163_p1 }
   0x5   : > { %s683_s19 = sshll.u32 (!%p164_p2), %s678_s16, 5 }
   0x6   : > { %167 = sbr.rel (%p164_p2) target bundleno = 230 (0xe6), region = 36  ;;  %p190_p3 = scmp.lt.s32.totalorder (!%p164_p2), %s683_s19, 63 }
   0xb   : > { %v240_v0 = vld [vmem:[%s1033_s1 + $0x18] sm:$0x1]  ;;  %vm391_vm0 = vcmask 1040384   ;;  %v831_v2 = vmov 0   ;;  %v799_v6 = vld [vmem:[%s1033_s1 + $0x10] sm:$0xff]  ;;  %s1038_s19 = smov (!%p190_p3, %s683_s19), 63 }
   0xc   : > { %v334_v1 = vunpack.c.l.b16 %v240_v0  ;;  %v393_v3 = vsel %vm391_vm0, 65535, %v831_v2  ;;  %v798_v7 = vld [vmem:[%s1033_s1 + $0x8] sm:$0xff]  ;;  %s684_s24 = sshll.u32 %s1038_s19, 2  ;;  %v797_v8 = vld [vmem:[%s1033_s1] sm:$0xff]  ;;  %vm342_vm1 = vcmask 400384   ;;  %s686_s8 = sshll.u32 %s1038_s19, 3 }
   0xd   : > { %s883_s29 = scalar_lea.vmem %s1032_s0, %s684_s24  ;;  %v920_v25 = vld [vmem:[%s1034_s2] ss:$0 sm:$0xff]  ;;  %s935_s11 = scalar_lea.vmem %s1036_s4, %s686_s8 }
   0xe   : > { %v338_v4 = vpack.c.b16 %v334_v1, %v334_v1  ;;  %v781_v9 = vld [vmem:[%s883_s29] sm:$0xff]  ;;  %v782_v13 = vld [vmem:[%s883_s29 + $0x8] sm:$0xff]  ;;  %v783_v17 = vld [vmem:[%s883_s29 + $0x10] sm:$0xff] }
   0xf   : > { %v785_v10 = vld [vmem:[%s883_s29 + $0x20] sm:$0xff]  ;;  %v786_v14 = vld [vmem:[%s883_s29 + $0x28] sm:$0xff]  ;;  %v787_v18 = vld [vmem:[%s883_s29 + $0x30] sm:$0xff] }
  0x10   : > { %v395_v5 = vand.u32 %v393_v3, %v338_v4  ;;  %v789_v11 = vld [vmem:[%s883_s29 + $0x40] sm:$0xff]  ;;  %v790_v15 = vld [vmem:[%s883_s29 + $0x48] sm:$0xff]  ;;  %v791_v19 = vld [vmem:[%s883_s29 + $0x50] sm:$0xff] }
  0x11   : > { %v793_v12 = vld [vmem:[%s883_s29 + $0x60] sm:$0xff]  ;;  %v794_v16 = vld [vmem:[%s883_s29 + $0x68] sm:$0xff]  ;;  %v795_v20 = vld [vmem:[%s883_s29 + $0x70] sm:$0xff] }
  0x12   : > { %401 = vmatpush.bf16.msra.mxu0 %v395_v5  ;;  %800 = vmatpush.bf16.msra.mxu1 %v395_v5  ;;  %v784_v21 = vld [vmem:[%s883_s29 + $0x18] sm:$0xff]  ;;  %v925_v26 = vld [vmem:[%s1035_s3] ss:$0 sm:$0xff] }
  0x13   : > { %801 = vmatpush.bf16.msra.mxu2 %v395_v5  ;;  %802 = vmatpush.bf16.msra.mxu3 %v395_v5  ;;  %v788_v22 = vld [vmem:[%s883_s29 + $0x38] sm:$0xff] }
  0x14   : > { %v792_v23 = vld [vmem:[%s883_s29 + $0x58] sm:$0xff] }
  0x15   : > { %v796_v24 = vld [vmem:[%s883_s29 + $0x78] sm:$0xff] }
  0x16   : > { %402 = vmatpush.bf16.msra.mxu0 %v799_v6  ;;  %803 = vmatpush.bf16.msra.mxu1 %v799_v6 }
  0x17   : > { %804 = vmatpush.bf16.msra.mxu2 %v799_v6  ;;  %805 = vmatpush.bf16.msra.mxu3 %v799_v6 }
  0x1a   : > { %403 = vmatpush.bf16.msra.mxu0 %v798_v7  ;;  %806 = vmatpush.bf16.msra.mxu1 %v798_v7 }
  0x1b   : > { %807 = vmatpush.bf16.msra.mxu2 %v798_v7  ;;  %808 = vmatpush.bf16.msra.mxu3 %v798_v7 }
  0x1e   : > { %404 = vmatpush.bf16.msra.mxu0 %v797_v8  ;;  %809 = vmatpush.bf16.msra.mxu1 %v797_v8 }
  0x1f   : > { %810 = vmatpush.bf16.msra.mxu2 %v797_v8  ;;  %811 = vmatpush.bf16.msra.mxu3 %v797_v8 }
  0x21   : > { %763 = vmatmul.msk.bf16.vlgmr.msra.gmra.mxu0 %vm342_vm1, %v781_v9  ;;  %767 = vmatmul.msk.bf16.vlgmr.msra.gmra.mxu1 %vm342_vm1, %v785_v10 }
  0x22   : > { %771 = vmatmul.msk.bf16.vlgmr.msra.gmra.mxu2 %vm342_vm1, %v789_v11  ;;  %775 = vmatmul.msk.bf16.vlgmr.msra.gmra.mxu3 %vm342_vm1, %v793_v12 }
  0x31   : > { %764 = vmatmul.msk.bf16.gmra.mxu0 %vm342_vm1, %v782_v13  ;;  %768 = vmatmul.msk.bf16.gmra.mxu1 %vm342_vm1, %v786_v14 }
  0x32   : > { %772 = vmatmul.msk.bf16.gmra.mxu2 %vm342_vm1, %v790_v15  ;;  %776 = vmatmul.msk.bf16.gmra.mxu3 %vm342_vm1, %v794_v16 }
  0x41   : > { %765 = vmatmul.msk.bf16.gmra.mxu0 %vm342_vm1, %v783_v17  ;;  %769 = vmatmul.msk.bf16.gmra.mxu1 %vm342_vm1, %v787_v18 }
  0x42   : > { %773 = vmatmul.msk.bf16.gmra.mxu2 %vm342_vm1, %v791_v19  ;;  %777 = vmatmul.msk.bf16.gmra.mxu3 %vm342_vm1, %v795_v20 }
  0x51   : > { %766 = vmatmul.msk.bf16.gmra.mxu0 %vm342_vm1, %v784_v21  ;;  %770 = vmatmul.msk.bf16.gmra.mxu1 %vm342_vm1, %v788_v22 }
  0x52   : > { %774 = vmatmul.msk.bf16.gmra.mxu2 %vm342_vm1, %v792_v23  ;;  %778 = vmatmul.msk.bf16.gmra.mxu3 %vm342_vm1, %v796_v24 }
  0x9e   : > { %v406_v27 = vpop.f32.mrf.mxu0  ;;  %v426_v28 = vpop.f32.mrf.mxu1 }
  0x9f   : > { %v490_v29 = vmul.f32 %v920_v25, %v406_v27  ;;  %v498_v30 = vmul.f32 %v920_v25, %v426_v28 }
  0xa1   : > { %v526_v31 = vadd.f32 %v925_v26, %v490_v29  ;;  %v534_v32 = vadd.f32 %v925_v26, %v498_v30 }
  0xa3   : > { %v558_v33 = vmax.f32 %v526_v31, 0.0  ;;  %v566_v34 = vmax.f32 %v534_v32, 0.0 }
  0xa5   : > { %590 = vst [vmem:[%s935_s11] sm:$0xff] %v558_v33  ;;  %v446_v35 = vpop.f32.mrf.mxu2  ;;  %v466_v36 = vpop.f32.mrf.mxu3 }
  0xa6   : > { %598 = vst [vmem:[%s935_s11 + $0x40] sm:$0xff] %v566_v34  ;;  %v506_v37 = vmul.f32 %v920_v25, %v446_v35  ;;  %v514_v38 = vmul.f32 %v920_v25, %v466_v36  ;;  %v408_v39 = vpop.f32.mrf.mxu0  ;;  %v428_v40 = vpop.f32.mrf.mxu1 }
  0xa7   : > { %v491_v41 = vmul.f32 %v920_v25, %v408_v39  ;;  %v499_v42 = vmul.f32 %v920_v25, %v428_v40 }
  0xa8   : > { %v542_v43 = vadd.f32 %v925_v26, %v506_v37  ;;  %v550_v44 = vadd.f32 %v925_v26, %v514_v38 }
  0xa9   : > { %v527_v45 = vadd.f32 %v925_v26, %v491_v41  ;;  %v535_v46 = vadd.f32 %v925_v26, %v499_v42 }
  0xaa   : > { %v574_v47 = vmax.f32 %v542_v43, 0.0  ;;  %v582_v48 = vmax.f32 %v550_v44, 0.0 }
  0xab   : > { %v559_v49 = vmax.f32 %v527_v45, 0.0  ;;  %v567_v50 = vmax.f32 %v535_v46, 0.0 }
  0xac   : > { %606 = vst [vmem:[%s935_s11 + $0x80] sm:$0xff] %v574_v47 }
  0xad   : > { %614 = vst [vmem:[%s935_s11 + $0xc0] sm:$0xff] %v582_v48  ;;  %v448_v51 = vpop.f32.mrf.mxu2  ;;  %v468_v52 = vpop.f32.mrf.mxu3 }
  0xae   : > { %591 = vst [vmem:[%s935_s11 + $0x8] sm:$0xff] %v559_v49  ;;  %v507_v53 = vmul.f32 %v920_v25, %v448_v51  ;;  %v515_v54 = vmul.f32 %v920_v25, %v468_v52  ;;  %v411_v55 = vpop.f32.mrf.mxu0  ;;  %v431_v56 = vpop.f32.mrf.mxu1 }
  0xaf   : > { %599 = vst [vmem:[%s935_s11 + $0x48] sm:$0xff] %v567_v50  ;;  %v492_v57 = vmul.f32 %v920_v25, %v411_v55  ;;  %v500_v58 = vmul.f32 %v920_v25, %v431_v56 }
  0xb0   : > { %v543_v59 = vadd.f32 %v925_v26, %v507_v53  ;;  %v551_v60 = vadd.f32 %v925_v26, %v515_v54 }
  0xb1   : > { %v528_v61 = vadd.f32 %v925_v26, %v492_v57  ;;  %v536_v62 = vadd.f32 %v925_v26, %v500_v58 }
  0xb2   : > { %v575_v63 = vmax.f32 %v543_v59, 0.0  ;;  %v583_v0 = vmax.f32 %v551_v60, 0.0 }
  0xb3   : > { %v560_v1 = vmax.f32 %v528_v61, 0.0  ;;  %v568_v2 = vmax.f32 %v536_v62, 0.0 }
  0xb4   : > { %607 = vst [vmem:[%s935_s11 + $0x88] sm:$0xff] %v575_v63 }
  0xb5   : > { %615 = vst [vmem:[%s935_s11 + $0xc8] sm:$0xff] %v583_v0  ;;  %v451_v3 = vpop.f32.mrf.mxu2  ;;  %v471_v4 = vpop.f32.mrf.mxu3 }
  0xb6   : > { %592 = vst [vmem:[%s935_s11 + $0x10] sm:$0xff] %v560_v1  ;;  %v508_v5 = vmul.f32 %v920_v25, %v451_v3  ;;  %v516_v6 = vmul.f32 %v920_v25, %v471_v4  ;;  %v413_v7 = vpop.f32.mrf.mxu0  ;;  %v433_v8 = vpop.f32.mrf.mxu1 }
  0xb7   : > { %600 = vst [vmem:[%s935_s11 + $0x50] sm:$0xff] %v568_v2  ;;  %v493_v9 = vmul.f32 %v920_v25, %v413_v7  ;;  %v501_v10 = vmul.f32 %v920_v25, %v433_v8 }
  0xb8   : > { %v544_v11 = vadd.f32 %v925_v26, %v508_v5  ;;  %v552_v12 = vadd.f32 %v925_v26, %v516_v6 }
  0xb9   : > { %v529_v13 = vadd.f32 %v925_v26, %v493_v9  ;;  %v537_v14 = vadd.f32 %v925_v26, %v501_v10 }
  0xba   : > { %v576_v15 = vmax.f32 %v544_v11, 0.0  ;;  %v584_v16 = vmax.f32 %v552_v12, 0.0 }
  0xbb   : > { %v561_v17 = vmax.f32 %v529_v13, 0.0  ;;  %v569_v18 = vmax.f32 %v537_v14, 0.0 }
  0xbc   : > { %608 = vst [vmem:[%s935_s11 + $0x90] sm:$0xff] %v576_v15 }
  0xbd   : > { %616 = vst [vmem:[%s935_s11 + $0xd0] sm:$0xff] %v584_v16  ;;  %v453_v19 = vpop.f32.mrf.mxu2  ;;  %v473_v20 = vpop.f32.mrf.mxu3 }
  0xbe   : > { %593 = vst [vmem:[%s935_s11 + $0x18] sm:$0xff] %v561_v17  ;;  %v509_v21 = vmul.f32 %v920_v25, %v453_v19  ;;  %v517_v22 = vmul.f32 %v920_v25, %v473_v20  ;;  %v416_v23 = vpop.f32.mrf.mxu0  ;;  %v436_v24 = vpop.f32.mrf.mxu1 }
  0xbf   : > { %601 = vst [vmem:[%s935_s11 + $0x58] sm:$0xff] %v569_v18  ;;  %v494_v27 = vmul.f32 %v920_v25, %v416_v23  ;;  %v502_v28 = vmul.f32 %v920_v25, %v436_v24 }
  0xc0   : > { %v545_v29 = vadd.f32 %v925_v26, %v509_v21  ;;  %v553_v30 = vadd.f32 %v925_v26, %v517_v22 }
  0xc1   : > { %v530_v31 = vadd.f32 %v925_v26, %v494_v27  ;;  %v538_v32 = vadd.f32 %v925_v26, %v502_v28 }
  0xc2   : > { %v577_v33 = vmax.f32 %v545_v29, 0.0  ;;  %v585_v34 = vmax.f32 %v553_v30, 0.0 }
  0xc3   : > { %v562_v35 = vmax.f32 %v530_v31, 0.0  ;;  %v570_v36 = vmax.f32 %v538_v32, 0.0 }
  0xc4   : > { %609 = vst [vmem:[%s935_s11 + $0x98] sm:$0xff] %v577_v33 }
  0xc5   : > { %617 = vst [vmem:[%s935_s11 + $0xd8] sm:$0xff] %v585_v34  ;;  %v456_v37 = vpop.f32.mrf.mxu2  ;;  %v476_v38 = vpop.f32.mrf.mxu3 }
  0xc6   : > { %594 = vst [vmem:[%s935_s11 + $0x20] sm:$0xff] %v562_v35  ;;  %v510_v39 = vmul.f32 %v920_v25, %v456_v37  ;;  %v518_v40 = vmul.f32 %v920_v25, %v476_v38  ;;  %v418_v41 = vpop.f32.mrf.mxu0  ;;  %v438_v42 = vpop.f32.mrf.mxu1 }
  0xc7   : > { %602 = vst [vmem:[%s935_s11 + $0x60] sm:$0xff] %v570_v36  ;;  %v495_v43 = vmul.f32 %v920_v25, %v418_v41  ;;  %v503_v44 = vmul.f32 %v920_v25, %v438_v42 }
  0xc8   : > { %v546_v45 = vadd.f32 %v925_v26, %v510_v39  ;;  %v554_v46 = vadd.f32 %v925_v26, %v518_v40 }
  0xc9   : > { %v531_v47 = vadd.f32 %v925_v26, %v495_v43  ;;  %v539_v48 = vadd.f32 %v925_v26, %v503_v44 }
  0xca   : > { %v578_v49 = vmax.f32 %v546_v45, 0.0  ;;  %v586_v50 = vmax.f32 %v554_v46, 0.0 }
  0xcb   : > { %v563_v51 = vmax.f32 %v531_v47, 0.0  ;;  %v571_v52 = vmax.f32 %v539_v48, 0.0 }
  0xcc   : > { %610 = vst [vmem:[%s935_s11 + $0xa0] sm:$0xff] %v578_v49 }
  0xcd   : > { %618 = vst [vmem:[%s935_s11 + $0xe0] sm:$0xff] %v586_v50  ;;  %v458_v53 = vpop.f32.mrf.mxu2  ;;  %v478_v54 = vpop.f32.mrf.mxu3 }
  0xce   : > { %595 = vst [vmem:[%s935_s11 + $0x28] sm:$0xff] %v563_v51  ;;  %v511_v55 = vmul.f32 %v920_v25, %v458_v53  ;;  %v519_v56 = vmul.f32 %v920_v25, %v478_v54  ;;  %v421_v57 = vpop.f32.mrf.mxu0  ;;  %v441_v58 = vpop.f32.mrf.mxu1 }
  0xcf   : > { %603 = vst [vmem:[%s935_s11 + $0x68] sm:$0xff] %v571_v52  ;;  %v496_v59 = vmul.f32 %v920_v25, %v421_v57  ;;  %v504_v60 = vmul.f32 %v920_v25, %v441_v58 }
  0xd0   : > { %v547_v61 = vadd.f32 %v925_v26, %v511_v55  ;;  %v555_v62 = vadd.f32 %v925_v26, %v519_v56 }
  0xd1   : > { %v532_v63 = vadd.f32 %v925_v26, %v496_v59  ;;  %v540_v0 = vadd.f32 %v925_v26, %v504_v60 }
  0xd2   : > { %v579_v1 = vmax.f32 %v547_v61, 0.0  ;;  %v587_v2 = vmax.f32 %v555_v62, 0.0 }
  0xd3   : > { %v564_v3 = vmax.f32 %v532_v63, 0.0  ;;  %v572_v4 = vmax.f32 %v540_v0, 0.0 }
  0xd4   : > { %611 = vst [vmem:[%s935_s11 + $0xa8] sm:$0xff] %v579_v1 }
  0xd5   : > { %619 = vst [vmem:[%s935_s11 + $0xe8] sm:$0xff] %v587_v2  ;;  %v461_v5 = vpop.f32.mrf.mxu2  ;;  %v481_v6 = vpop.f32.mrf.mxu3 }
  0xd6   : > { %596 = vst [vmem:[%s935_s11 + $0x30] sm:$0xff] %v564_v3  ;;  %v512_v7 = vmul.f32 %v920_v25, %v461_v5  ;;  %v520_v8 = vmul.f32 %v920_v25, %v481_v6  ;;  %v423_v9 = vpop.f32.mrf.mxu0  ;;  %v443_v10 = vpop.f32.mrf.mxu1 }
  0xd7   : > { %604 = vst [vmem:[%s935_s11 + $0x70] sm:$0xff] %v572_v4  ;;  %v497_v11 = vmul.f32 %v920_v25, %v423_v9  ;;  %v505_v12 = vmul.f32 %v920_v25, %v443_v10 }
  0xd8   : > { %v548_v13 = vadd.f32 %v925_v26, %v512_v7  ;;  %v556_v14 = vadd.f32 %v925_v26, %v520_v8 }
  0xd9   : > { %v533_v15 = vadd.f32 %v925_v26, %v497_v11  ;;  %v541_v16 = vadd.f32 %v925_v26, %v505_v12 }
  0xda   : > { %v580_v17 = vmax.f32 %v548_v13, 0.0  ;;  %v588_v18 = vmax.f32 %v556_v14, 0.0 }
  0xdb   : > { %v565_v19 = vmax.f32 %v533_v15, 0.0  ;;  %v573_v20 = vmax.f32 %v541_v16, 0.0 }
  0xdc   : > { %612 = vst [vmem:[%s935_s11 + $0xb0] sm:$0xff] %v580_v17 }
  0xdd   : > { %620 = vst [vmem:[%s935_s11 + $0xf0] sm:$0xff] %v588_v18  ;;  %v463_v21 = vpop.f32.mrf.mxu2  ;;  %v483_v22 = vpop.f32.mrf.mxu3 }
  0xde   : > { %597 = vst [vmem:[%s935_s11 + $0x38] sm:$0xff] %v565_v19  ;;  %v513_v23 = vmul.f32 %v920_v25, %v463_v21  ;;  %v521_v24 = vmul.f32 %v920_v25, %v483_v22 }
  0xdf   : > { %605 = vst [vmem:[%s935_s11 + $0x78] sm:$0xff] %v573_v20 }
  0xe0   : > { %v549_v27 = vadd.f32 %v925_v26, %v513_v23  ;;  %v557_v28 = vadd.f32 %v925_v26, %v521_v24 }
  0xe2   : > { %v581_v29 = vmax.f32 %v549_v27, 0.0  ;;  %v589_v30 = vmax.f32 %v557_v28, 0.0 }
  0xe4   : > { %613 = vst [vmem:[%s935_s11 + $0xb8] sm:$0xff] %v581_v29 }
  0xe5   : > { %621 = vst [vmem:[%s935_s11 + $0xf8] sm:$0xff] %v589_v30 }
  0xe6 PF: > { %s14_s15 = sadd.s32 1, %s829_s15  }
  0xe7   : > { %p11_p4 = scmp.ge.s32.totalorder %s14_s15, 4  }
  0xe9   :  { %13 = sbr.rel (!%p11_p4) target bundleno = 1 (0x1), region = 66 }

// kernel: forward.13
= control target key start
LH: loop header
LB: loop body
LE: loop exit
PB: predicated region body
PF: predicated region fallthrough
CT: control target
= control target key end

     0   :  { %vm288_vm0 = vcmask 130048   ;;  %s943_s0 = inlined_call_operand.vmem [shape: f32[9,128,16], index: 0, kind: input, shape index: {}]   ;;  %s944_s1 = inlined_call_operand.vmem [shape: f32[128,16], index: 1, kind: output, shape index: {}]  }
   0x1   :  { %v8_v0 = vld [vmem:[%s943_s0] sm:$0xff]  ;;  %v9_v6 = vld [vmem:[%s943_s0 + $0x8] sm:$0xff]  ;;  %v10_v15 = vld [vmem:[%s943_s0 + $0x10] sm:$0xff] }
   0x2   :  { %v309_v1 = vld [vmem:[%s943_s0 + $0x80] sm:$0xff]  ;;  %v310_v7 = vld [vmem:[%s943_s0 + $0x88] sm:$0xff]  ;;  %v311_v16 = vld [vmem:[%s943_s0 + $0x90] sm:$0xff] }
   0x3   :  { %v325_v2 = vld [vmem:[%s943_s0 + $0x100] sm:$0xff]  ;;  %v41_v3 = vmax.f32 %v8_v0, %v309_v1  ;;  %v326_v8 = vld [vmem:[%s943_s0 + $0x108] sm:$0xff]  ;;  %v42_v10 = vmax.f32 %v9_v6, %v310_v7  ;;  %v327_v17 = vld [vmem:[%s943_s0 + $0x110] sm:$0xff]  ;;  %v43_v20 = vmax.f32 %v10_v15, %v311_v16 }
   0x4   :  { %v341_v4 = vld [vmem:[%s943_s0 + $0x180] sm:$0xff]  ;;  %v342_v13 = vld [vmem:[%s943_s0 + $0x188] sm:$0xff]  ;;  %v343_v24 = vld [vmem:[%s943_s0 + $0x190] sm:$0xff] }
   0x5   :  { %v74_v5 = vmax.f32 %v41_v3, %v325_v2  ;;  %v357_v9 = vld [vmem:[%s943_s0 + $0x200] sm:$0xff]  ;;  %v75_v14 = vmax.f32 %v42_v10, %v326_v8  ;;  %v358_v19 = vld [vmem:[%s943_s0 + $0x208] sm:$0xff]  ;;  %v76_v26 = vmax.f32 %v43_v20, %v327_v17  ;;  %v11_v27 = vld [vmem:[%s943_s0 + $0x18] sm:$0xff] }
   0x6   :  { %v373_v12 = vld [vmem:[%s943_s0 + $0x280] sm:$0xff]  ;;  %v374_v23 = vld [vmem:[%s943_s0 + $0x288] sm:$0xff]  ;;  %v312_v28 = vld [vmem:[%s943_s0 + $0x98] sm:$0xff] }
   0x7   :  { %v107_v11 = vmax.f32 %v74_v5, %v341_v4  ;;  %v389_v21 = vld [vmem:[%s943_s0 + $0x300] sm:$0xff]  ;;  %v108_v22 = vmax.f32 %v75_v14, %v342_v13  ;;  %v328_v29 = vld [vmem:[%s943_s0 + $0x118] sm:$0xff]  ;;  %v359_v33 = vld [vmem:[%s943_s0 + $0x210] sm:$0xff]  ;;  %v44_v34 = vmax.f32 %v11_v27, %v312_v28  ;;  %v109_v37 = vmax.f32 %v76_v26, %v343_v24 }
   0x8   :  { %v405_v30 = vld [vmem:[%s943_s0 + $0x380] sm:$0xff]  ;;  %v390_v36 = vld [vmem:[%s943_s0 + $0x308] sm:$0xff]  ;;  %v375_v38 = vld [vmem:[%s943_s0 + $0x290] sm:$0xff] }
   0x9   :  { %v140_v18 = vmax.f32 %v107_v11, %v357_v9  ;;  %v421_v31 = vld [vmem:[%s943_s0 + $0x400] sm:$0xff]  ;;  %v141_v32 = vmax.f32 %v108_v22, %v358_v19  ;;  %v344_v39 = vld [vmem:[%s943_s0 + $0x198] sm:$0xff]  ;;  %v77_v41 = vmax.f32 %v44_v34, %v328_v29  ;;  %v406_v46 = vld [vmem:[%s943_s0 + $0x388] sm:$0xff]  ;;  %v142_v48 = vmax.f32 %v109_v37, %v359_v33 }
   0xa   :  { %v12_v42 = vld [vmem:[%s943_s0 + $0x20] sm:$0xff]  ;;  %v422_v47 = vld [vmem:[%s943_s0 + $0x408] sm:$0xff]  ;;  %v360_v49 = vld [vmem:[%s943_s0 + $0x218] sm:$0xff] }
   0xb   :  { %v173_v25 = vmax.f32 %v140_v18, %v373_v12  ;;  %v174_v40 = vmax.f32 %v141_v32, %v374_v23  ;;  %v313_v43 = vld [vmem:[%s943_s0 + $0xa0] sm:$0xff]  ;;  %v391_v52 = vld [vmem:[%s943_s0 + $0x310] sm:$0xff]  ;;  %v110_v53 = vmax.f32 %v77_v41, %v344_v39  ;;  %v376_v54 = vld [vmem:[%s943_s0 + $0x298] sm:$0xff]  ;;  %v175_v57 = vmax.f32 %v142_v48, %v375_v38 }
   0xc   :  { %v329_v44 = vld [vmem:[%s943_s0 + $0x120] sm:$0xff]  ;;  %v45_v50 = vmax.f32 %v12_v42, %v313_v43  ;;  %v13_v59 = vld [vmem:[%s943_s0 + $0x28] sm:$0xff]  ;;  %v407_v63 = vld [vmem:[%s943_s0 + $0x390] sm:$0xff] }
   0xd   :  { %v206_v35 = vmax.f32 %v173_v25, %v389_v21  ;;  %v207_v51 = vmax.f32 %v174_v40, %v390_v36  ;;  %v345_v55 = vld [vmem:[%s943_s0 + $0x1a0] sm:$0xff]  ;;  %v314_v60 = vld [vmem:[%s943_s0 + $0xa8] sm:$0xff]  ;;  %v423_v0 = vld [vmem:[%s943_s0 + $0x410] sm:$0xff]  ;;  %v143_v1 = vmax.f32 %v110_v53, %v360_v49  ;;  %v208_v4 = vmax.f32 %v175_v57, %v391_v52 }
   0xe   :  { %v78_v58 = vmax.f32 %v45_v50, %v329_v44  ;;  %v330_v61 = vld [vmem:[%s943_s0 + $0x128] sm:$0xff]  ;;  %v361_v2 = vld [vmem:[%s943_s0 + $0x220] sm:$0xff]  ;;  %v46_v3 = vmax.f32 %v13_v59, %v314_v60  ;;  %v392_v5 = vld [vmem:[%s943_s0 + $0x318] sm:$0xff] }
   0xf   :  { %v239_v45 = vmax.f32 %v206_v35, %v405_v30  ;;  %v240_v62 = vmax.f32 %v207_v51, %v406_v46  ;;  %v377_v7 = vld [vmem:[%s943_s0 + $0x2a0] sm:$0xff]  ;;  %v346_v8 = vld [vmem:[%s943_s0 + $0x1a8] sm:$0xff]  ;;  %v176_v10 = vmax.f32 %v143_v1, %v376_v54  ;;  %v14_v12 = vld [vmem:[%s943_s0 + $0x30] sm:$0xff]  ;;  %v241_v15 = vmax.f32 %v208_v4, %v407_v63 }
  0x10   :  { %v111_v6 = vmax.f32 %v78_v58, %v345_v55  ;;  %v79_v11 = vmax.f32 %v46_v3, %v330_v61  ;;  %v315_v13 = vld [vmem:[%s943_s0 + $0xb0] sm:$0xff]  ;;  %v408_v16 = vld [vmem:[%s943_s0 + $0x398] sm:$0xff]  ;;  %v362_v19 = vld [vmem:[%s943_s0 + $0x228] sm:$0xff] }
  0x11   :  { %v272_v56 = vmax.f32 %v239_v45, %v421_v31  ;;  %v273_v9 = vmax.f32 %v240_v62, %v422_v47  ;;  %v331_v14 = vld [vmem:[%s943_s0 + $0x130] sm:$0xff]  ;;  %v424_v17 = vld [vmem:[%s943_s0 + $0x418] sm:$0xff]  ;;  %v47_v20 = vmax.f32 %v14_v12, %v315_v13  ;;  %v209_v21 = vmax.f32 %v176_v10, %v392_v5  ;;  %v393_v22 = vld [vmem:[%s943_s0 + $0x320] sm:$0xff] }
  0x12   :  { %v144_v18 = vmax.f32 %v111_v6, %v361_v2  ;;  %v112_v23 = vmax.f32 %v79_v11, %v346_v8  ;;  %v378_v24 = vld [vmem:[%s943_s0 + $0x2a8] sm:$0xff]  ;;  %v347_v25 = vld [vmem:[%s943_s0 + $0x1b0] sm:$0xff]  ;;  %v274_v26 = vmax.f32 %v241_v15, %v423_v0  ;;  %v15_v29 = vld [vmem:[%s943_s0 + $0x38] sm:$0xff] }
  0x13   :  { %289 = vst.msk [vmem:[%s944_s1] sm:$0xff] %vm288_vm0, %v272_v56  ;;  %v80_v28 = vmax.f32 %v47_v20, %v331_v14  ;;  %v316_v30 = vld [vmem:[%s943_s0 + $0xb8] sm:$0xff]  ;;  %v242_v32 = vmax.f32 %v209_v21, %v408_v16  ;;  %v409_v33 = vld [vmem:[%s943_s0 + $0x3a0] sm:$0xff]  ;;  %v363_v36 = vld [vmem:[%s943_s0 + $0x230] sm:$0xff] }
  0x14   :  { %290 = vst.msk [vmem:[%s944_s1 + $0x8] sm:$0xff] %vm288_vm0, %v273_v9  ;;  %v177_v27 = vmax.f32 %v144_v18, %v377_v7  ;;  %v332_v31 = vld [vmem:[%s943_s0 + $0x138] sm:$0xff]  ;;  %v425_v34 = vld [vmem:[%s943_s0 + $0x420] sm:$0xff]  ;;  %v145_v35 = vmax.f32 %v112_v23, %v362_v19  ;;  %v48_v37 = vmax.f32 %v15_v29, %v316_v30  ;;  %v394_v39 = vld [vmem:[%s943_s0 + $0x328] sm:$0xff] }
  0x15   :  { %291 = vst.msk [vmem:[%s944_s1 + $0x10] sm:$0xff] %vm288_vm0, %v274_v26  ;;  %v113_v40 = vmax.f32 %v80_v28, %v347_v25  ;;  %v379_v41 = vld [vmem:[%s943_s0 + $0x2b0] sm:$0xff]  ;;  %v348_v42 = vld [vmem:[%s943_s0 + $0x1b8] sm:$0xff]  ;;  %v275_v43 = vmax.f32 %v242_v32, %v424_v17  ;;  %v16_v46 = vld [vmem:[%s943_s0 + $0x40] sm:$0xff] }
  0x16   :  { %v210_v38 = vmax.f32 %v177_v27, %v393_v22  ;;  %v178_v44 = vmax.f32 %v145_v35, %v378_v24  ;;  %v81_v45 = vmax.f32 %v48_v37, %v332_v31  ;;  %v317_v47 = vld [vmem:[%s943_s0 + $0xc0] sm:$0xff]  ;;  %v410_v50 = vld [vmem:[%s943_s0 + $0x3a8] sm:$0xff]  ;;  %v364_v53 = vld [vmem:[%s943_s0 + $0x238] sm:$0xff] }
  0x17   :  { %v333_v48 = vld [vmem:[%s943_s0 + $0x140] sm:$0xff]  ;;  %v426_v51 = vld [vmem:[%s943_s0 + $0x428] sm:$0xff]  ;;  %v146_v52 = vmax.f32 %v113_v40, %v363_v36  ;;  %v49_v54 = vmax.f32 %v16_v46, %v317_v47  ;;  %292 = vst.msk [vmem:[%s944_s1 + $0x18] sm:$0xff] %vm288_vm0, %v275_v43  ;;  %v395_v56 = vld [vmem:[%s943_s0 + $0x330] sm:$0xff] }
  0x18   :  { %v243_v49 = vmax.f32 %v210_v38, %v409_v33  ;;  %v211_v55 = vmax.f32 %v178_v44, %v394_v39  ;;  %v114_v57 = vmax.f32 %v81_v45, %v348_v42  ;;  %v380_v58 = vld [vmem:[%s943_s0 + $0x2b8] sm:$0xff]  ;;  %v349_v59 = vld [vmem:[%s943_s0 + $0x1c0] sm:$0xff]  ;;  %v17_v63 = vld [vmem:[%s943_s0 + $0x48] sm:$0xff] }
  0x19   :  { %v179_v61 = vmax.f32 %v146_v52, %v379_v41  ;;  %v82_v62 = vmax.f32 %v49_v54, %v333_v48  ;;  %v318_v0 = vld [vmem:[%s943_s0 + $0xc8] sm:$0xff]  ;;  %v411_v3 = vld [vmem:[%s943_s0 + $0x3b0] sm:$0xff]  ;;  %v365_v6 = vld [vmem:[%s943_s0 + $0x240] sm:$0xff] }
  0x1a   :  { %v276_v60 = vmax.f32 %v243_v49, %v425_v34  ;;  %v334_v1 = vld [vmem:[%s943_s0 + $0x148] sm:$0xff]  ;;  %v244_v2 = vmax.f32 %v211_v55, %v410_v50  ;;  %v427_v4 = vld [vmem:[%s943_s0 + $0x430] sm:$0xff]  ;;  %v147_v5 = vmax.f32 %v114_v57, %v364_v53  ;;  %v50_v7 = vmax.f32 %v17_v63, %v318_v0  ;;  %v396_v9 = vld [vmem:[%s943_s0 + $0x338] sm:$0xff] }
  0x1b   :  { %v212_v8 = vmax.f32 %v179_v61, %v395_v56  ;;  %v115_v10 = vmax.f32 %v82_v62, %v349_v59  ;;  %v381_v11 = vld [vmem:[%s943_s0 + $0x2c0] sm:$0xff]  ;;  %v350_v12 = vld [vmem:[%s943_s0 + $0x1c8] sm:$0xff]  ;;  %v18_v16 = vld [vmem:[%s943_s0 + $0x50] sm:$0xff] }
  0x1c   :  { %293 = vst.msk [vmem:[%s944_s1 + $0x20] sm:$0xff] %vm288_vm0, %v276_v60  ;;  %v277_v13 = vmax.f32 %v244_v2, %v426_v51  ;;  %v180_v14 = vmax.f32 %v147_v5, %v380_v58  ;;  %v83_v15 = vmax.f32 %v50_v7, %v334_v1  ;;  %v319_v17 = vld [vmem:[%s943_s0 + $0xd0] sm:$0xff]  ;;  %v412_v20 = vld [vmem:[%s943_s0 + $0x3b8] sm:$0xff]  ;;  %v366_v23 = vld [vmem:[%s943_s0 + $0x248] sm:$0xff] }
  0x1d   :  { %v335_v18 = vld [vmem:[%s943_s0 + $0x150] sm:$0xff]  ;;  %v245_v19 = vmax.f32 %v212_v8, %v411_v3  ;;  %v428_v21 = vld [vmem:[%s943_s0 + $0x438] sm:$0xff]  ;;  %v148_v22 = vmax.f32 %v115_v10, %v365_v6  ;;  %v51_v24 = vmax.f32 %v18_v16, %v319_v17  ;;  %v397_v26 = vld [vmem:[%s943_s0 + $0x340] sm:$0xff] }
  0x1e   :  { %294 = vst.msk [vmem:[%s944_s1 + $0x28] sm:$0xff] %vm288_vm0, %v277_v13  ;;  %v213_v25 = vmax.f32 %v180_v14, %v396_v9  ;;  %v116_v27 = vmax.f32 %v83_v15, %v350_v12  ;;  %v382_v28 = vld [vmem:[%s943_s0 + $0x2c8] sm:$0xff]  ;;  %v351_v29 = vld [vmem:[%s943_s0 + $0x1d0] sm:$0xff]  ;;  %v19_v33 = vld [vmem:[%s943_s0 + $0x58] sm:$0xff] }
  0x1f   :  { %v278_v30 = vmax.f32 %v245_v19, %v427_v4  ;;  %v181_v31 = vmax.f32 %v148_v22, %v381_v11  ;;  %v84_v32 = vmax.f32 %v51_v24, %v335_v18  ;;  %v320_v34 = vld [vmem:[%s943_s0 + $0xd8] sm:$0xff]  ;;  %v413_v37 = vld [vmem:[%s943_s0 + $0x3c0] sm:$0xff]  ;;  %v367_v40 = vld [vmem:[%s943_s0 + $0x250] sm:$0xff] }
  0x20   :  { %v336_v35 = vld [vmem:[%s943_s0 + $0x158] sm:$0xff]  ;;  %v246_v36 = vmax.f32 %v213_v25, %v412_v20  ;;  %v429_v38 = vld [vmem:[%s943_s0 + $0x440] sm:$0xff]  ;;  %v149_v39 = vmax.f32 %v116_v27, %v366_v23  ;;  %v52_v41 = vmax.f32 %v19_v33, %v320_v34  ;;  %v398_v43 = vld [vmem:[%s943_s0 + $0x348] sm:$0xff] }
  0x21   :  { %295 = vst.msk [vmem:[%s944_s1 + $0x30] sm:$0xff] %vm288_vm0, %v278_v30  ;;  %v214_v42 = vmax.f32 %v181_v31, %v397_v26  ;;  %v117_v44 = vmax.f32 %v84_v32, %v351_v29  ;;  %v383_v45 = vld [vmem:[%s943_s0 + $0x2d0] sm:$0xff]  ;;  %v352_v46 = vld [vmem:[%s943_s0 + $0x1d8] sm:$0xff]  ;;  %v20_v50 = vld [vmem:[%s943_s0 + $0x60] sm:$0xff] }
  0x22   :  { %v279_v47 = vmax.f32 %v246_v36, %v428_v21  ;;  %v182_v48 = vmax.f32 %v149_v39, %v382_v28  ;;  %v85_v49 = vmax.f32 %v52_v41, %v336_v35  ;;  %v321_v51 = vld [vmem:[%s943_s0 + $0xe0] sm:$0xff]  ;;  %v414_v54 = vld [vmem:[%s943_s0 + $0x3c8] sm:$0xff]  ;;  %v368_v57 = vld [vmem:[%s943_s0 + $0x258] sm:$0xff] }
  0x23   :  { %v337_v52 = vld [vmem:[%s943_s0 + $0x160] sm:$0xff]  ;;  %v247_v53 = vmax.f32 %v214_v42, %v413_v37  ;;  %v430_v55 = vld [vmem:[%s943_s0 + $0x448] sm:$0xff]  ;;  %v150_v56 = vmax.f32 %v117_v44, %v367_v40  ;;  %v53_v58 = vmax.f32 %v20_v50, %v321_v51  ;;  %v399_v60 = vld [vmem:[%s943_s0 + $0x350] sm:$0xff] }
  0x24   :  { %296 = vst.msk [vmem:[%s944_s1 + $0x38] sm:$0xff] %vm288_vm0, %v279_v47  ;;  %v215_v59 = vmax.f32 %v182_v48, %v398_v43  ;;  %v118_v61 = vmax.f32 %v85_v49, %v352_v46  ;;  %v384_v62 = vld [vmem:[%s943_s0 + $0x2d8] sm:$0xff]  ;;  %v353_v63 = vld [vmem:[%s943_s0 + $0x1e0] sm:$0xff]  ;;  %v21_v3 = vld [vmem:[%s943_s0 + $0x68] sm:$0xff] }
  0x25   :  { %v280_v0 = vmax.f32 %v247_v53, %v429_v38  ;;  %v183_v1 = vmax.f32 %v150_v56, %v383_v45  ;;  %v86_v2 = vmax.f32 %v53_v58, %v337_v52  ;;  %v322_v4 = vld [vmem:[%s943_s0 + $0xe8] sm:$0xff]  ;;  %v415_v7 = vld [vmem:[%s943_s0 + $0x3d0] sm:$0xff]  ;;  %v369_v10 = vld [vmem:[%s943_s0 + $0x260] sm:$0xff] }
  0x26   :  { %v338_v5 = vld [vmem:[%s943_s0 + $0x168] sm:$0xff]  ;;  %v248_v6 = vmax.f32 %v215_v59, %v414_v54  ;;  %v431_v8 = vld [vmem:[%s943_s0 + $0x450] sm:$0xff]  ;;  %v151_v9 = vmax.f32 %v118_v61, %v368_v57  ;;  %v54_v11 = vmax.f32 %v21_v3, %v322_v4  ;;  %v400_v13 = vld [vmem:[%s943_s0 + $0x358] sm:$0xff] }
  0x27   :  { %297 = vst.msk [vmem:[%s944_s1 + $0x40] sm:$0xff] %vm288_vm0, %v280_v0  ;;  %v216_v12 = vmax.f32 %v183_v1, %v399_v60  ;;  %v119_v14 = vmax.f32 %v86_v2, %v353_v63  ;;  %v385_v15 = vld [vmem:[%s943_s0 + $0x2e0] sm:$0xff]  ;;  %v354_v16 = vld [vmem:[%s943_s0 + $0x1e8] sm:$0xff]  ;;  %v22_v20 = vld [vmem:[%s943_s0 + $0x70] sm:$0xff] }
  0x28   :  { %v281_v17 = vmax.f32 %v248_v6, %v430_v55  ;;  %v184_v18 = vmax.f32 %v151_v9, %v384_v62  ;;  %v87_v19 = vmax.f32 %v54_v11, %v338_v5  ;;  %v323_v21 = vld [vmem:[%s943_s0 + $0xf0] sm:$0xff]  ;;  %v416_v24 = vld [vmem:[%s943_s0 + $0x3d8] sm:$0xff]  ;;  %v370_v27 = vld [vmem:[%s943_s0 + $0x268] sm:$0xff] }
  0x29   :  { %v339_v22 = vld [vmem:[%s943_s0 + $0x170] sm:$0xff]  ;;  %v249_v23 = vmax.f32 %v216_v12, %v415_v7  ;;  %v432_v25 = vld [vmem:[%s943_s0 + $0x458] sm:$0xff]  ;;  %v152_v26 = vmax.f32 %v119_v14, %v369_v10  ;;  %v55_v28 = vmax.f32 %v22_v20, %v323_v21  ;;  %v401_v30 = vld [vmem:[%s943_s0 + $0x360] sm:$0xff] }
  0x2a   :  { %298 = vst.msk [vmem:[%s944_s1 + $0x48] sm:$0xff] %vm288_vm0, %v281_v17  ;;  %v217_v29 = vmax.f32 %v184_v18, %v400_v13  ;;  %v120_v31 = vmax.f32 %v87_v19, %v354_v16  ;;  %v386_v32 = vld [vmem:[%s943_s0 + $0x2e8] sm:$0xff]  ;;  %v355_v33 = vld [vmem:[%s943_s0 + $0x1f0] sm:$0xff]  ;;  %v23_v37 = vld [vmem:[%s943_s0 + $0x78] sm:$0xff] }
  0x2b   :  { %v282_v34 = vmax.f32 %v249_v23, %v431_v8  ;;  %v185_v35 = vmax.f32 %v152_v26, %v385_v15  ;;  %v88_v36 = vmax.f32 %v55_v28, %v339_v22  ;;  %v324_v38 = vld [vmem:[%s943_s0 + $0xf8] sm:$0xff]  ;;  %v417_v41 = vld [vmem:[%s943_s0 + $0x3e0] sm:$0xff]  ;;  %v371_v43 = vld [vmem:[%s943_s0 + $0x270] sm:$0xff] }
  0x2c   :  { %v340_v39 = vld [vmem:[%s943_s0 + $0x178] sm:$0xff]  ;;  %v250_v40 = vmax.f32 %v217_v29, %v416_v24  ;;  %v153_v42 = vmax.f32 %v120_v31, %v370_v27  ;;  %v56_v44 = vmax.f32 %v23_v37, %v324_v38  ;;  %v402_v46 = vld [vmem:[%s943_s0 + $0x368] sm:$0xff]  ;;  %v433_v50 = vld [vmem:[%s943_s0 + $0x460] sm:$0xff] }
  0x2d   :  { %299 = vst.msk [vmem:[%s944_s1 + $0x50] sm:$0xff] %vm288_vm0, %v282_v34  ;;  %v218_v45 = vmax.f32 %v185_v35, %v401_v30  ;;  %v121_v47 = vmax.f32 %v88_v36, %v355_v33  ;;  %v356_v48 = vld [vmem:[%s943_s0 + $0x1f8] sm:$0xff]  ;;  %v387_v52 = vld [vmem:[%s943_s0 + $0x2f0] sm:$0xff]  ;;  %v418_v55 = vld [vmem:[%s943_s0 + $0x3e8] sm:$0xff] }
  0x2e   :  { %v283_v49 = vmax.f32 %v250_v40, %v432_v25  ;;  %v186_v51 = vmax.f32 %v153_v42, %v386_v32  ;;  %v89_v53 = vmax.f32 %v56_v44, %v340_v39  ;;  %v372_v57 = vld [vmem:[%s943_s0 + $0x278] sm:$0xff]  ;;  %v403_v59 = vld [vmem:[%s943_s0 + $0x370] sm:$0xff]  ;;  %v434_v62 = vld [vmem:[%s943_s0 + $0x468] sm:$0xff] }
  0x2f   :  { %v251_v54 = vmax.f32 %v218_v45, %v417_v41  ;;  %v154_v56 = vmax.f32 %v121_v47, %v371_v43  ;;  %v388_v0 = vld [vmem:[%s943_s0 + $0x2f8] sm:$0xff]  ;;  %v419_v2 = vld [vmem:[%s943_s0 + $0x3f0] sm:$0xff] }
  0x30   :  { %300 = vst.msk [vmem:[%s944_s1 + $0x58] sm:$0xff] %vm288_vm0, %v283_v49  ;;  %v219_v58 = vmax.f32 %v186_v51, %v402_v46  ;;  %v122_v60 = vmax.f32 %v89_v53, %v356_v48  ;;  %v404_v5 = vld [vmem:[%s943_s0 + $0x378] sm:$0xff]  ;;  %v435_v7 = vld [vmem:[%s943_s0 + $0x470] sm:$0xff] }
  0x31   :  { %v284_v61 = vmax.f32 %v251_v54, %v433_v50  ;;  %v187_v63 = vmax.f32 %v154_v56, %v387_v52  ;;  %v420_v10 = vld [vmem:[%s943_s0 + $0x3f8] sm:$0xff] }
  0x32   :  { %v252_v1 = vmax.f32 %v219_v58, %v418_v55  ;;  %v155_v3 = vmax.f32 %v122_v60, %v372_v57  ;;  %v436_v13 = vld [vmem:[%s943_s0 + $0x478] sm:$0xff] }
  0x33   :  { %301 = vst.msk [vmem:[%s944_s1 + $0x60] sm:$0xff] %vm288_vm0, %v284_v61  ;;  %v220_v4 = vmax.f32 %v187_v63, %v403_v59 }
  0x34   :  { %v285_v6 = vmax.f32 %v252_v1, %v434_v62  ;;  %v188_v8 = vmax.f32 %v155_v3, %v388_v0 }
  0x35   :  { %v253_v9 = vmax.f32 %v220_v4, %v419_v2 }
  0x36   :  { %302 = vst.msk [vmem:[%s944_s1 + $0x68] sm:$0xff] %vm288_vm0, %v285_v6  ;;  %v221_v11 = vmax.f32 %v188_v8, %v404_v5 }
  0x37   :  { %v286_v12 = vmax.f32 %v253_v9, %v435_v7 }
  0x38   :  { %v254_v14 = vmax.f32 %v221_v11, %v420_v10 }
  0x39   :  { %303 = vst.msk [vmem:[%s944_s1 + $0x70] sm:$0xff] %vm288_vm0, %v286_v12 }
  0x3a   :  { %v287_v15 = vmax.f32 %v254_v14, %v436_v13 }
  0x3c   :  { %304 = vst.msk [vmem:[%s944_s1 + $0x78] sm:$0xff] %vm288_vm0, %v287_v15 }

// kernel: forward.14
= control target key start
LH: loop header
LB: loop body
LE: loop exit
PB: predicated region body
PF: predicated region fallthrough
CT: control target
= control target key end

     0   :  { %vm112_vm0 = vcmask 130048   ;;  %s490_s1 = inlined_call_operand.vmem [shape: bf16[16,128], index: 1, kind: input, shape index: {}]   ;;  %s491_s0 = inlined_call_operand.vmem [shape: f32[128,16], index: 0, kind: input, shape index: {}]   ;;  %s492_s2 = inlined_call_operand.vmem [shape: f32[1,16], index: 2, kind: input, shape index: {}]   ;;  %s493_s3 = inlined_call_operand.vmem [shape: f32[1,16], index: 3, kind: input, shape index: {}]   ;;  %s494_s4 = inlined_call_operand.vmem [shape: f32[1,128], index: 4, kind: input, shape index: {}]   ;;  %s495_s5 = inlined_call_operand.vmem [shape: f32[1,128], index: 5, kind: input, shape index: {}]   ;;  %s496_s6 = inlined_call_operand.vmem [shape: f32[128,128], index: 6, kind: output, shape index: {}]  }
   0x1   :  { %v274_v0 = vld [vmem:[%s490_s1] sm:$0xff]  ;;  %v25_v2 = vld [vmem:[%s491_s0 + $0x8] sm:$0xff]  ;;  %v26_v26 = vld [vmem:[%s491_s0 + $0x10] sm:$0xff] }
   0x2   :  { %v24_v1 = vld [vmem:[%s491_s0] sm:$0xff]  ;;  %144 = vmatpush.bf16.msra.mxu0 %v274_v0  ;;  %275 = vmatpush.bf16.msra.mxu1 %v274_v0  ;;  %v29_v6 = vld [vmem:[%s491_s0 + $0x28] sm:$0xff]  ;;  %v27_v27 = vld [vmem:[%s491_s0 + $0x18] sm:$0xff] }
   0x3   :  { %v278_v3 = vld [vmem:[%s492_s2] ss:$0 sm:$0xff]  ;;  %276 = vmatpush.bf16.msra.mxu2 %v274_v0  ;;  %277 = vmatpush.bf16.msra.mxu3 %v274_v0  ;;  %v33_v11 = vld [vmem:[%s491_s0 + $0x48] sm:$0xff]  ;;  %v30_v32 = vld [vmem:[%s491_s0 + $0x30] sm:$0xff] }
   0x4   :  { %v332_v4 = vld [vmem:[%s493_s3] ss:$0 sm:$0xff]  ;;  %v44_v7 = vmul.f32 %v278_v3, %v24_v1  ;;  %v45_v8 = vmul.f32 %v278_v3, %v25_v2  ;;  %v49_v13 = vmul.f32 %v278_v3, %v29_v6  ;;  %v53_v15 = vmul.f32 %v278_v3, %v33_v11  ;;  %v37_v16 = vld [vmem:[%s491_s0 + $0x68] sm:$0xff]  ;;  %v31_v39 = vld [vmem:[%s491_s0 + $0x38] sm:$0xff] }
   0x5   :  { %v28_v5 = vld [vmem:[%s491_s0 + $0x20] sm:$0xff]  ;;  %v57_v21 = vmul.f32 %v278_v3, %v37_v16  ;;  %v34_v40 = vld [vmem:[%s491_s0 + $0x50] sm:$0xff]  ;;  %v35_v41 = vld [vmem:[%s491_s0 + $0x58] sm:$0xff]  ;;  %v46_v46 = vmul.f32 %v278_v3, %v26_v26  ;;  %v47_v47 = vmul.f32 %v278_v3, %v27_v27  ;;  %v50_v48 = vmul.f32 %v278_v3, %v30_v32 }
   0x6   :  { %v48_v9 = vmul.f32 %v278_v3, %v28_v5  ;;  %v32_v10 = vld [vmem:[%s491_s0 + $0x40] sm:$0xff]  ;;  %v64_v18 = vadd.f32 %v332_v4, %v44_v7  ;;  %v65_v19 = vadd.f32 %v332_v4, %v45_v8  ;;  %v69_v22 = vadd.f32 %v332_v4, %v49_v13  ;;  %v38_v44 = vld [vmem:[%s491_s0 + $0x70] sm:$0xff]  ;;  %v39_v49 = vld [vmem:[%s491_s0 + $0x78] sm:$0xff] }
   0x7   :  { %v36_v12 = vld [vmem:[%s491_s0 + $0x60] sm:$0xff]  ;;  %v52_v14 = vmul.f32 %v278_v3, %v32_v10  ;;  %v73_v24 = vadd.f32 %v332_v4, %v53_v15  ;;  %v77_v31 = vadd.f32 %v332_v4, %v57_v21  ;;  %v51_v50 = vmul.f32 %v278_v3, %v31_v39 }
   0x8   :  { %v56_v17 = vmul.f32 %v278_v3, %v36_v12  ;;  %v68_v20 = vadd.f32 %v332_v4, %v48_v9  ;;  %v80_v28 = vmax.f32 %v64_v18, 0.0  ;;  %v81_v29 = vmax.f32 %v65_v19, 0.0  ;;  %v408_v12 = vld [vmem:[%s495_s5] ss:$0 sm:$0xff] }
   0x9   :  { %v72_v23 = vadd.f32 %v332_v4, %v52_v14  ;;  %v85_v33 = vmax.f32 %v69_v22, 0.0  ;;  %v89_v35 = vmax.f32 %v73_v24, 0.0  ;;  %v93_v38 = vmax.f32 %v77_v31, 0.0 }
   0xa   :  { %v76_v25 = vadd.f32 %v332_v4, %v56_v17  ;;  %v84_v30 = vmax.f32 %v68_v20, 0.0  ;;  %v96_v37 = vpack.c.bf16 %v81_v29, %v80_v28  ;;  %v54_v51 = vmul.f32 %v278_v3, %v34_v40 }
   0xb   :  { %v88_v34 = vmax.f32 %v72_v23, 0.0  ;;  %v55_v52 = vmul.f32 %v278_v3, %v35_v41  ;;  %v58_v53 = vmul.f32 %v278_v3, %v38_v44  ;;  %v59_v54 = vmul.f32 %v278_v3, %v39_v49 }
   0xc   :  { %v92_v36 = vmax.f32 %v76_v25, 0.0  ;;  %v98_v42 = vpack.c.bf16 %v85_v33, %v84_v30  ;;  %266 = vmatmul.msk.bf16.vlgmr.msra.gmra.mxu0 %vm112_vm0, %v96_v37  ;;  %v66_v55 = vadd.f32 %v332_v4, %v46_v46  ;;  %v67_v56 = vadd.f32 %v332_v4, %v47_v47 }
   0xd   :  { %v100_v43 = vpack.c.bf16 %v89_v35, %v88_v34  ;;  %v70_v57 = vadd.f32 %v332_v4, %v50_v48  ;;  %v71_v58 = vadd.f32 %v332_v4, %v51_v50  ;;  %v74_v59 = vadd.f32 %v332_v4, %v54_v51 }
   0xe   :  { %v102_v45 = vpack.c.bf16 %v93_v38, %v92_v36  ;;  %268 = vmatmul.msk.bf16.vlgmr.msra.gmra.mxu1 %vm112_vm0, %v98_v42  ;;  %v75_v60 = vadd.f32 %v332_v4, %v55_v52  ;;  %v78_v61 = vadd.f32 %v332_v4, %v58_v53  ;;  %v79_v62 = vadd.f32 %v332_v4, %v59_v54  ;;  %v403_v4 = vld [vmem:[%s494_s4] ss:$0 sm:$0xff] }
   0xf   :  { %270 = vmatmul.msk.bf16.vlgmr.msra.gmra.mxu2 %vm112_vm0, %v100_v43  ;;  %v82_v63 = vmax.f32 %v66_v55, 0.0  ;;  %v83_v0 = vmax.f32 %v67_v56, 0.0  ;;  %v86_v1 = vmax.f32 %v70_v57, 0.0  ;;  %v87_v2 = vmax.f32 %v71_v58, 0.0 }
  0x10   :  { %272 = vmatmul.msk.bf16.vlgmr.msra.gmra.mxu3 %vm112_vm0, %v102_v45  ;;  %v90_v3 = vmax.f32 %v74_v59, 0.0  ;;  %v91_v5 = vmax.f32 %v75_v60, 0.0  ;;  %v94_v6 = vmax.f32 %v78_v61, 0.0  ;;  %v95_v7 = vmax.f32 %v79_v62, 0.0 }
  0x11   :  { %v97_v8 = vpack.c.bf16 %v83_v0, %v82_v63  ;;  %v99_v9 = vpack.c.bf16 %v87_v2, %v86_v1 }
  0x12   :  { %v101_v10 = vpack.c.bf16 %v91_v5, %v90_v3  ;;  %v103_v11 = vpack.c.bf16 %v95_v7, %v94_v6 }
  0x1c   :  { %267 = vmatmul.msk.bf16.gmra.mxu0 %vm112_vm0, %v97_v8 }
  0x1e   :  { %269 = vmatmul.msk.bf16.gmra.mxu1 %vm112_vm0, %v99_v9 }
  0x1f   :  { %271 = vmatmul.msk.bf16.gmra.mxu2 %vm112_vm0, %v101_v10 }
  0x20   :  { %273 = vmatmul.msk.bf16.gmra.mxu3 %vm112_vm0, %v103_v11 }
  0x89   :  { %v146_v13 = vpop.f32.mrf.mxu0 }
  0x8a   :  { %v190_v14 = vmul.f32 %v403_v4, %v146_v13 }
  0x8b   :  { %v156_v15 = vpop.f32.mrf.mxu1 }
  0x8c   :  { %v194_v16 = vmul.f32 %v403_v4, %v156_v15  ;;  %v210_v17 = vadd.f32 %v408_v12, %v190_v14 }
  0x8e   :  { %v214_v18 = vadd.f32 %v408_v12, %v194_v16  ;;  %v226_v19 = vmax.f32 %v210_v17, 0.0 }
  0x90   :  { %v230_v20 = vmax.f32 %v214_v18, 0.0  ;;  %242 = vst [vmem:[%s496_s6] sm:$0xff] %v226_v19 }
  0x91   :  { %v148_v24 = vpop.f32.mrf.mxu0 }
  0x92   :  { %v166_v21 = vpop.f32.mrf.mxu2  ;;  %246 = vst [vmem:[%s496_s6 + $0x20] sm:$0xff] %v230_v20  ;;  %v191_v26 = vmul.f32 %v403_v4, %v148_v24 }
  0x93   :  { %v198_v22 = vmul.f32 %v403_v4, %v166_v21  ;;  %v176_v23 = vpop.f32.mrf.mxu3  ;;  %v158_v27 = vpop.f32.mrf.mxu1 }
  0x94   :  { %v202_v25 = vmul.f32 %v403_v4, %v176_v23  ;;  %v195_v29 = vmul.f32 %v403_v4, %v158_v27  ;;  %v211_v31 = vadd.f32 %v408_v12, %v191_v26 }
  0x95   :  { %v218_v28 = vadd.f32 %v408_v12, %v198_v22 }
  0x96   :  { %v222_v30 = vadd.f32 %v408_v12, %v202_v25  ;;  %v215_v33 = vadd.f32 %v408_v12, %v195_v29  ;;  %v227_v35 = vmax.f32 %v211_v31, 0.0 }
  0x97   :  { %v234_v32 = vmax.f32 %v218_v28, 0.0 }
  0x98   :  { %v238_v34 = vmax.f32 %v222_v30, 0.0  ;;  %v231_v36 = vmax.f32 %v215_v33, 0.0  ;;  %243 = vst [vmem:[%s496_s6 + $0x8] sm:$0xff] %v227_v35 }
  0x99   :  { %250 = vst [vmem:[%s496_s6 + $0x40] sm:$0xff] %v234_v32  ;;  %v151_v40 = vpop.f32.mrf.mxu0 }
  0x9a   :  { %254 = vst [vmem:[%s496_s6 + $0x60] sm:$0xff] %v238_v34  ;;  %v168_v37 = vpop.f32.mrf.mxu2  ;;  %v192_v42 = vmul.f32 %v403_v4, %v151_v40 }
  0x9b   :  { %v199_v38 = vmul.f32 %v403_v4, %v168_v37  ;;  %v178_v39 = vpop.f32.mrf.mxu3  ;;  %247 = vst [vmem:[%s496_s6 + $0x28] sm:$0xff] %v231_v36  ;;  %v161_v43 = vpop.f32.mrf.mxu1 }
  0x9c   :  { %v203_v41 = vmul.f32 %v403_v4, %v178_v39  ;;  %v196_v45 = vmul.f32 %v403_v4, %v161_v43  ;;  %v212_v47 = vadd.f32 %v408_v12, %v192_v42 }
  0x9d   :  { %v219_v44 = vadd.f32 %v408_v12, %v199_v38 }
  0x9e   :  { %v223_v46 = vadd.f32 %v408_v12, %v203_v41  ;;  %v216_v49 = vadd.f32 %v408_v12, %v196_v45  ;;  %v228_v51 = vmax.f32 %v212_v47, 0.0 }
  0x9f   :  { %v235_v48 = vmax.f32 %v219_v44, 0.0 }
  0xa0   :  { %v239_v50 = vmax.f32 %v223_v46, 0.0  ;;  %v232_v52 = vmax.f32 %v216_v49, 0.0  ;;  %244 = vst [vmem:[%s496_s6 + $0x10] sm:$0xff] %v228_v51 }
  0xa1   :  { %251 = vst [vmem:[%s496_s6 + $0x48] sm:$0xff] %v235_v48  ;;  %v153_v56 = vpop.f32.mrf.mxu0 }
  0xa2   :  { %255 = vst [vmem:[%s496_s6 + $0x68] sm:$0xff] %v239_v50  ;;  %v171_v53 = vpop.f32.mrf.mxu2  ;;  %v193_v58 = vmul.f32 %v403_v4, %v153_v56 }
  0xa3   :  { %v200_v54 = vmul.f32 %v403_v4, %v171_v53  ;;  %v181_v55 = vpop.f32.mrf.mxu3  ;;  %248 = vst [vmem:[%s496_s6 + $0x30] sm:$0xff] %v232_v52  ;;  %v163_v59 = vpop.f32.mrf.mxu1 }
  0xa4   :  { %v204_v57 = vmul.f32 %v403_v4, %v181_v55  ;;  %v197_v61 = vmul.f32 %v403_v4, %v163_v59  ;;  %v213_v63 = vadd.f32 %v408_v12, %v193_v58 }
  0xa5   :  { %v220_v60 = vadd.f32 %v408_v12, %v200_v54 }
  0xa6   :  { %v224_v62 = vadd.f32 %v408_v12, %v204_v57  ;;  %v217_v1 = vadd.f32 %v408_v12, %v197_v61  ;;  %v229_v3 = vmax.f32 %v213_v63, 0.0 }
  0xa7   :  { %v236_v0 = vmax.f32 %v220_v60, 0.0 }
  0xa8   :  { %v240_v2 = vmax.f32 %v224_v62, 0.0  ;;  %v233_v5 = vmax.f32 %v217_v1, 0.0  ;;  %245 = vst [vmem:[%s496_s6 + $0x18] sm:$0xff] %v229_v3 }
  0xa9   :  { %252 = vst [vmem:[%s496_s6 + $0x50] sm:$0xff] %v236_v0 }
  0xaa   :  { %256 = vst [vmem:[%s496_s6 + $0x70] sm:$0xff] %v240_v2  ;;  %v173_v6 = vpop.f32.mrf.mxu2 }
  0xab   :  { %v201_v7 = vmul.f32 %v403_v4, %v173_v6  ;;  %v183_v8 = vpop.f32.mrf.mxu3  ;;  %249 = vst [vmem:[%s496_s6 + $0x38] sm:$0xff] %v233_v5 }
  0xac   :  { %v205_v9 = vmul.f32 %v403_v4, %v183_v8 }
  0xad   :  { %v221_v10 = vadd.f32 %v408_v12, %v201_v7 }
  0xae   :  { %v225_v11 = vadd.f32 %v408_v12, %v205_v9 }
  0xaf   :  { %v237_v13 = vmax.f32 %v221_v10, 0.0 }
  0xb0   :  { %v241_v14 = vmax.f32 %v225_v11, 0.0 }
  0xb1   :  { %253 = vst [vmem:[%s496_s6 + $0x58] sm:$0xff] %v237_v13 }
  0xb2   :  { %257 = vst [vmem:[%s496_s6 + $0x78] sm:$0xff] %v241_v14 }

// kernel: forward.16
= control target key start
LH: loop header
LB: loop body
LE: loop exit
PB: predicated region body
PF: predicated region fallthrough
CT: control target
= control target key end

     0   :  { %vm141_vm0 = vcmask 1043456   ;;  %vm116_vm1 = vcmask 195584   ;;  %s522_s1 = inlined_call_operand.vmem [shape: bf16[24,128], index: 1, kind: input, shape index: {}]   ;;  %s523_s0 = inlined_call_operand.vmem [shape: f32[128,24], index: 0, kind: input, shape index: {}]   ;;  %s524_s2 = inlined_call_operand.vmem [shape: f32[1,24], index: 2, kind: input, shape index: {}]   ;;  %s525_s3 = inlined_call_operand.vmem [shape: f32[1,24], index: 3, kind: input, shape index: {}]   ;;  %s526_s4 = inlined_call_operand.vmem [shape: f32[1,128], index: 4, kind: input, shape index: {}]   ;;  %s527_s5 = inlined_call_operand.vmem [shape: f32[1,128], index: 5, kind: input, shape index: {}]   ;;  %s528_s6 = inlined_call_operand.vmem [shape: f32[128,128], index: 6, kind: output, shape index: {}]  }
   0x1   :  { %v106_v0 = vld [vmem:[%s522_s1 + $0x8] sm:$0xf]  ;;  %v24_v1 = vld [vmem:[%s523_s0] sm:$0xff]  ;;  %v26_v37 = vld [vmem:[%s523_s0 + $0x10] sm:$0xff] }
   0x2   :  { %v112_v2 = vunpack.c.l.b16 %v106_v0  ;;  %v25_v3 = vld [vmem:[%s523_s0 + $0x8] sm:$0xff]  ;;  %v340_v4 = vld [vmem:[%s524_s2] ss:$0 sm:$0xff]  ;;  %v27_v41 = vld [vmem:[%s523_s0 + $0x18] sm:$0xff] }
   0x3   :  { %v345_v5 = vld [vmem:[%s525_s3] ss:$0 sm:$0xff]  ;;  %v44_v8 = vmul.f32 %v340_v4, %v24_v1  ;;  %v45_v9 = vmul.f32 %v340_v4, %v25_v3  ;;  %v29_v10 = vld [vmem:[%s523_s0 + $0x28] sm:$0xff]  ;;  %v30_v42 = vld [vmem:[%s523_s0 + $0x30] sm:$0xff]  ;;  %v46_v48 = vmul.f32 %v340_v4, %v26_v37  ;;  %v47_v49 = vmul.f32 %v340_v4, %v27_v41 }
   0x4   :  { %v28_v6 = vld [vmem:[%s523_s0 + $0x20] sm:$0xff]  ;;  %v114_v7 = vpack.c.b16 %v112_v2, %v112_v2  ;;  %v33_v13 = vld [vmem:[%s523_s0 + $0x48] sm:$0xff]  ;;  %v49_v14 = vmul.f32 %v340_v4, %v29_v10  ;;  %v31_v43 = vld [vmem:[%s523_s0 + $0x38] sm:$0xff]  ;;  %v50_v50 = vmul.f32 %v340_v4, %v30_v42 }
   0x5   :  { %v48_v11 = vmul.f32 %v340_v4, %v28_v6  ;;  %v32_v12 = vld [vmem:[%s523_s0 + $0x40] sm:$0xff]  ;;  %v53_v16 = vmul.f32 %v340_v4, %v33_v13  ;;  %v64_v19 = vadd.f32 %v345_v5, %v44_v8  ;;  %v65_v20 = vadd.f32 %v345_v5, %v45_v9  ;;  %v37_v22 = vld [vmem:[%s523_s0 + $0x68] sm:$0xff]  ;;  %v34_v45 = vld [vmem:[%s523_s0 + $0x50] sm:$0xff] }
   0x6   :  { %v52_v15 = vmul.f32 %v340_v4, %v32_v12  ;;  %v36_v17 = vld [vmem:[%s523_s0 + $0x60] sm:$0xff]  ;;  %v143_v18 = vsel %vm141_vm0, %v114_v7, 0  ;;  %v69_v24 = vadd.f32 %v345_v5, %v49_v14  ;;  %v57_v34 = vmul.f32 %v340_v4, %v37_v22  ;;  %v35_v46 = vld [vmem:[%s523_s0 + $0x58] sm:$0xff]  ;;  %v38_v52 = vld [vmem:[%s523_s0 + $0x70] sm:$0xff] }
   0x7   :  { %v68_v21 = vadd.f32 %v345_v5, %v48_v11  ;;  %151 = vmatpush.bf16.msra.mxu0 %v143_v18  ;;  %283 = vmatpush.bf16.msra.mxu1 %v143_v18  ;;  %v282_v23 = vld [vmem:[%s522_s1] sm:$0xff]  ;;  %v73_v26 = vadd.f32 %v345_v5, %v53_v16  ;;  %v80_v27 = vmax.f32 %v64_v19, 0.0  ;;  %v81_v28 = vmax.f32 %v65_v20, 0.0  ;;  %v39_v53 = vld [vmem:[%s523_s0 + $0x78] sm:$0xff] }
   0x8   :  { %v72_v25 = vadd.f32 %v345_v5, %v52_v15  ;;  %284 = vmatpush.bf16.msra.mxu2 %v143_v18  ;;  %285 = vmatpush.bf16.msra.mxu3 %v143_v18  ;;  %v56_v30 = vmul.f32 %v340_v4, %v36_v17  ;;  %v85_v31 = vmax.f32 %v69_v24, 0.0  ;;  %v77_v40 = vadd.f32 %v345_v5, %v57_v34  ;;  %v440_v16 = vld [vmem:[%s527_s5] ss:$0 sm:$0xff] }
   0x9   :  { %v84_v29 = vmax.f32 %v68_v21, 0.0  ;;  %v89_v33 = vmax.f32 %v73_v26, 0.0  ;;  %v96_v35 = vpack.c.bf16 %v81_v28, %v80_v27  ;;  %v51_v51 = vmul.f32 %v340_v4, %v31_v43 }
   0xa   :  { %v88_v32 = vmax.f32 %v72_v25, 0.0  ;;  %v76_v36 = vadd.f32 %v345_v5, %v56_v30  ;;  %v93_v47 = vmax.f32 %v77_v40, 0.0  ;;  %v54_v55 = vmul.f32 %v340_v4, %v34_v45 }
   0xb   :  { %152 = vmatpush.bf16.msra.mxu0 %v282_v23  ;;  %286 = vmatpush.bf16.msra.mxu1 %v282_v23  ;;  %v98_v38 = vpack.c.bf16 %v85_v31, %v84_v29  ;;  %v55_v56 = vmul.f32 %v340_v4, %v35_v46  ;;  %v58_v57 = vmul.f32 %v340_v4, %v38_v52 }
   0xc   :  { %v100_v39 = vpack.c.bf16 %v89_v33, %v88_v32  ;;  %287 = vmatpush.bf16.msra.mxu2 %v282_v23  ;;  %288 = vmatpush.bf16.msra.mxu3 %v282_v23  ;;  %v92_v44 = vmax.f32 %v76_v36, 0.0  ;;  %v59_v58 = vmul.f32 %v340_v4, %v39_v53  ;;  %v66_v59 = vadd.f32 %v345_v5, %v46_v48 }
   0xd   :  { %v67_v60 = vadd.f32 %v345_v5, %v47_v49  ;;  %v70_v61 = vadd.f32 %v345_v5, %v50_v50  ;;  %v71_v62 = vadd.f32 %v345_v5, %v51_v51  ;;  %v74_v63 = vadd.f32 %v345_v5, %v54_v55 }
   0xe   :  { %274 = vmatmul.msk.bf16.vlgmr.msra.gmra.mxu0 %vm116_vm1, %v96_v35  ;;  %276 = vmatmul.msk.bf16.vlgmr.msra.gmra.mxu1 %vm116_vm1, %v98_v38  ;;  %v102_v54 = vpack.c.bf16 %v93_v47, %v92_v44  ;;  %v75_v0 = vadd.f32 %v345_v5, %v55_v56  ;;  %v78_v1 = vadd.f32 %v345_v5, %v58_v57  ;;  %v82_v3 = vmax.f32 %v66_v59, 0.0 }
   0xf   :  { %278 = vmatmul.msk.bf16.vlgmr.msra.gmra.mxu2 %vm116_vm1, %v100_v39  ;;  %v79_v2 = vadd.f32 %v345_v5, %v59_v58  ;;  %v83_v6 = vmax.f32 %v67_v60, 0.0  ;;  %v86_v7 = vmax.f32 %v70_v61, 0.0  ;;  %v87_v4 = vmax.f32 %v71_v62, 0.0  ;;  %v435_v5 = vld [vmem:[%s526_s4] ss:$0 sm:$0xff] }
  0x10   :  { %280 = vmatmul.msk.bf16.vlgmr.msra.gmra.mxu3 %vm116_vm1, %v102_v54  ;;  %v90_v8 = vmax.f32 %v74_v63, 0.0  ;;  %v91_v9 = vmax.f32 %v75_v0, 0.0  ;;  %v94_v10 = vmax.f32 %v78_v1, 0.0 }
  0x11   :  { %v95_v11 = vmax.f32 %v79_v2, 0.0  ;;  %v97_v12 = vpack.c.bf16 %v83_v6, %v82_v3  ;;  %v99_v13 = vpack.c.bf16 %v87_v4, %v86_v7 }
  0x12   :  { %v101_v14 = vpack.c.bf16 %v91_v9, %v90_v8 }
  0x13   :  { %v103_v15 = vpack.c.bf16 %v95_v11, %v94_v10 }
  0x1e   :  { %275 = vmatmul.msk.bf16.gmra.mxu0 %vm116_vm1, %v97_v12  ;;  %277 = vmatmul.msk.bf16.gmra.mxu1 %vm116_vm1, %v99_v13 }
  0x1f   :  { %279 = vmatmul.msk.bf16.gmra.mxu2 %vm116_vm1, %v101_v14 }
  0x20   :  { %281 = vmatmul.msk.bf16.gmra.mxu3 %vm116_vm1, %v103_v15 }
  0x8b   :  { %v154_v17 = vpop.f32.mrf.mxu0  ;;  %v164_v18 = vpop.f32.mrf.mxu1 }
  0x8c   :  { %v198_v19 = vmul.f32 %v435_v5, %v154_v17  ;;  %v202_v20 = vmul.f32 %v435_v5, %v164_v18 }
  0x8e   :  { %v218_v21 = vadd.f32 %v440_v16, %v198_v19  ;;  %v222_v22 = vadd.f32 %v440_v16, %v202_v20 }
  0x90   :  { %v234_v23 = vmax.f32 %v218_v21, 0.0  ;;  %v238_v24 = vmax.f32 %v222_v22, 0.0 }
  0x92   :  { %250 = vst [vmem:[%s528_s6] sm:$0xff] %v234_v23  ;;  %v174_v25 = vpop.f32.mrf.mxu2 }
  0x93   :  { %254 = vst [vmem:[%s528_s6 + $0x20] sm:$0xff] %v238_v24  ;;  %v206_v26 = vmul.f32 %v435_v5, %v174_v25  ;;  %v156_v27 = vpop.f32.mrf.mxu0  ;;  %v166_v28 = vpop.f32.mrf.mxu1 }
  0x94   :  { %v184_v29 = vpop.f32.mrf.mxu3  ;;  %v199_v30 = vmul.f32 %v435_v5, %v156_v27  ;;  %v203_v31 = vmul.f32 %v435_v5, %v166_v28 }
  0x95   :  { %v226_v32 = vadd.f32 %v440_v16, %v206_v26  ;;  %v210_v33 = vmul.f32 %v435_v5, %v184_v29 }
  0x96   :  { %v219_v34 = vadd.f32 %v440_v16, %v199_v30  ;;  %v223_v35 = vadd.f32 %v440_v16, %v203_v31 }
  0x97   :  { %v242_v36 = vmax.f32 %v226_v32, 0.0  ;;  %v230_v37 = vadd.f32 %v440_v16, %v210_v33 }
  0x98   :  { %v235_v38 = vmax.f32 %v219_v34, 0.0  ;;  %v239_v39 = vmax.f32 %v223_v35, 0.0 }
  0x99   :  { %258 = vst [vmem:[%s528_s6 + $0x40] sm:$0xff] %v242_v36  ;;  %v246_v40 = vmax.f32 %v230_v37, 0.0 }
  0x9a   :  { %251 = vst [vmem:[%s528_s6 + $0x8] sm:$0xff] %v235_v38  ;;  %v176_v41 = vpop.f32.mrf.mxu2 }
  0x9b   :  { %262 = vst [vmem:[%s528_s6 + $0x60] sm:$0xff] %v246_v40  ;;  %v207_v42 = vmul.f32 %v435_v5, %v176_v41  ;;  %v159_v43 = vpop.f32.mrf.mxu0  ;;  %v169_v44 = vpop.f32.mrf.mxu1 }
  0x9c   :  { %255 = vst [vmem:[%s528_s6 + $0x28] sm:$0xff] %v239_v39  ;;  %v186_v45 = vpop.f32.mrf.mxu3  ;;  %v200_v46 = vmul.f32 %v435_v5, %v159_v43  ;;  %v204_v47 = vmul.f32 %v435_v5, %v169_v44 }
  0x9d   :  { %v227_v48 = vadd.f32 %v440_v16, %v207_v42  ;;  %v211_v49 = vmul.f32 %v435_v5, %v186_v45 }
  0x9e   :  { %v220_v50 = vadd.f32 %v440_v16, %v200_v46  ;;  %v224_v51 = vadd.f32 %v440_v16, %v204_v47 }
  0x9f   :  { %v243_v52 = vmax.f32 %v227_v48, 0.0  ;;  %v231_v53 = vadd.f32 %v440_v16, %v211_v49 }
  0xa0   :  { %v236_v54 = vmax.f32 %v220_v50, 0.0  ;;  %v240_v55 = vmax.f32 %v224_v51, 0.0 }
  0xa1   :  { %259 = vst [vmem:[%s528_s6 + $0x48] sm:$0xff] %v243_v52  ;;  %v247_v56 = vmax.f32 %v231_v53, 0.0 }
  0xa2   :  { %252 = vst [vmem:[%s528_s6 + $0x10] sm:$0xff] %v236_v54  ;;  %v179_v57 = vpop.f32.mrf.mxu2 }
  0xa3   :  { %263 = vst [vmem:[%s528_s6 + $0x68] sm:$0xff] %v247_v56  ;;  %v208_v58 = vmul.f32 %v435_v5, %v179_v57  ;;  %v161_v59 = vpop.f32.mrf.mxu0  ;;  %v171_v60 = vpop.f32.mrf.mxu1 }
  0xa4   :  { %256 = vst [vmem:[%s528_s6 + $0x30] sm:$0xff] %v240_v55  ;;  %v189_v61 = vpop.f32.mrf.mxu3  ;;  %v201_v62 = vmul.f32 %v435_v5, %v161_v59  ;;  %v205_v63 = vmul.f32 %v435_v5, %v171_v60 }
  0xa5   :  { %v228_v0 = vadd.f32 %v440_v16, %v208_v58  ;;  %v212_v1 = vmul.f32 %v435_v5, %v189_v61 }
  0xa6   :  { %v221_v2 = vadd.f32 %v440_v16, %v201_v62  ;;  %v225_v3 = vadd.f32 %v440_v16, %v205_v63 }
  0xa7   :  { %v244_v6 = vmax.f32 %v228_v0, 0.0  ;;  %v232_v7 = vadd.f32 %v440_v16, %v212_v1 }
  0xa8   :  { %v237_v4 = vmax.f32 %v221_v2, 0.0  ;;  %v241_v8 = vmax.f32 %v225_v3, 0.0 }
  0xa9   :  { %260 = vst [vmem:[%s528_s6 + $0x50] sm:$0xff] %v244_v6  ;;  %v248_v9 = vmax.f32 %v232_v7, 0.0 }
  0xaa   :  { %253 = vst [vmem:[%s528_s6 + $0x18] sm:$0xff] %v237_v4  ;;  %v181_v10 = vpop.f32.mrf.mxu2 }
  0xab   :  { %264 = vst [vmem:[%s528_s6 + $0x70] sm:$0xff] %v248_v9  ;;  %v209_v11 = vmul.f32 %v435_v5, %v181_v10 }
  0xac   :  { %257 = vst [vmem:[%s528_s6 + $0x38] sm:$0xff] %v241_v8  ;;  %v191_v12 = vpop.f32.mrf.mxu3 }
  0xad   :  { %v229_v13 = vadd.f32 %v440_v16, %v209_v11  ;;  %v213_v14 = vmul.f32 %v435_v5, %v191_v12 }
  0xaf   :  { %v245_v15 = vmax.f32 %v229_v13, 0.0  ;;  %v233_v17 = vadd.f32 %v440_v16, %v213_v14 }
  0xb1   :  { %261 = vst [vmem:[%s528_s6 + $0x58] sm:$0xff] %v245_v15  ;;  %v249_v18 = vmax.f32 %v233_v17, 0.0 }
  0xb3   :  { %265 = vst [vmem:[%s528_s6 + $0x78] sm:$0xff] %v249_v18 }

// kernel: forward.15
= control target key start
LH: loop header
LB: loop body
LE: loop exit
PB: predicated region body
PF: predicated region fallthrough
CT: control target
= control target key end

     0   :  { %vm308_vm0 = vcmask 261120   ;;  %s1003_s1 = inlined_call_operand.vmem [shape: bf16[288,128], index: 1, kind: input, shape index: {}]   ;;  %s1004_s0 = inlined_call_operand.vmem [shape: bf16[128,288], index: 0, kind: input, shape index: {}]   ;;  %s1005_s2 = inlined_call_operand.vmem [shape: f32[128,128], index: 2, kind: output, shape index: {}]  }
   0x1   :  { %v707_v0 = vld [vmem:[%s1003_s1 + $0x38] sm:$0xff]  ;;  %v717_v2 = vld [vmem:[%s1003_s1 + $0x88] sm:$0xff]  ;;  %v706_v3 = vld [vmem:[%s1003_s1 + $0x30] sm:$0xff] }
   0x2   :  { %v715_v1 = vld [vmem:[%s1003_s1 + $0x78] sm:$0xff]  ;;  %333 = vmatpush.bf16.msra.mxu0 %v707_v0  ;;  %718 = vmatpush.bf16.msra.mxu3 %v707_v0  ;;  %v714_v4 = vld [vmem:[%s1003_s1 + $0x70] sm:$0xff]  ;;  %v716_v5 = vld [vmem:[%s1003_s1 + $0x80] sm:$0xff] }
   0x3   :  { %382 = vmatpush.bf16.msra.mxu1 %v715_v1  ;;  %437 = vmatpush.bf16.msra.mxu2 %v717_v2  ;;  %v510_v6 = vld [vmem:[%s1004_s0 + $0x8] sm:$0xf]  ;;  %v678_v7 = vld [vmem:[%s1004_s0 + $0x10] sm:$0xf0]  ;;  %v704_v11 = vld [vmem:[%s1003_s1 + $0x20] sm:$0xff] }
   0x4   :  { %v511_v8 = vor.u32 %v678_v7, %v510_v6  ;;  %v705_v9 = vld [vmem:[%s1003_s1 + $0x28] sm:$0xff]  ;;  %v712_v12 = vld [vmem:[%s1003_s1 + $0x60] sm:$0xff]  ;;  %v703_v13 = vld [vmem:[%s1003_s1 + $0x18] sm:$0xff] }
   0x5   :  { %v713_v10 = vld [vmem:[%s1003_s1 + $0x68] sm:$0xff]  ;;  %v711_v14 = vld [vmem:[%s1003_s1 + $0x58] sm:$0xff]  ;;  %v702_v15 = vld [vmem:[%s1003_s1 + $0x10] sm:$0xff] }
   0x6   :  { %334 = vmatpush.bf16.msra.mxu0 %v706_v3  ;;  %719 = vmatpush.bf16.msra.mxu3 %v706_v3  ;;  %v710_v16 = vld [vmem:[%s1003_s1 + $0x50] sm:$0xff]  ;;  %v522_v17 = vld [vmem:[%s1004_s0 + $0x20] sm:$0xf]  ;;  %v681_v18 = vld [vmem:[%s1004_s0 + $0x28] sm:$0xf0] }
   0x7   :  { %383 = vmatpush.bf16.msra.mxu1 %v714_v4  ;;  %438 = vmatpush.bf16.msra.mxu2 %v716_v5  ;;  %v523_v19 = vor.u32 %v681_v18, %v522_v17  ;;  %v701_v20 = vld [vmem:[%s1003_s1 + $0x8] sm:$0xff]  ;;  %v700_v22 = vld [vmem:[%s1003_s1] sm:$0xff]  ;;  %v574_v26 = vld [vmem:[%s1004_s0 + $0x90] sm:$0xf] }
   0x8   :  { %v709_v21 = vld [vmem:[%s1003_s1 + $0x48] sm:$0xff]  ;;  %v708_v23 = vld [vmem:[%s1003_s1 + $0x40] sm:$0xff]  ;;  %v695_v27 = vld [vmem:[%s1004_s0 + $0x98] sm:$0xf0] }
   0x9   :  { %v502_v24 = vld [vmem:[%s1004_s0] sm:$0xf]  ;;  %v677_v25 = vld [vmem:[%s1004_s0 + $0x8] sm:$0xf0]  ;;  %v676_v28 = vld [vmem:[%s1004_s0 + $0x4] sm:$0xf]  ;;  %v575_v31 = vor.u32 %v695_v27, %v574_v26 }
   0xa   :  { %668 = vmatmul.msk.bf16.vlgmr.msra.gmra.mxu2 %vm308_vm0, %v511_v8  ;;  %335 = vmatpush.bf16.msra.mxu0 %v705_v9  ;;  %v504_v29 = vld [vmem:[%s1004_s0 + $0xc] sm:$0xf0]  ;;  %v503_v30 = vor.u32 %v677_v25, %v502_v24  ;;  %v534_v33 = vld [vmem:[%s1004_s0 + $0x38] sm:$0xf]  ;;  %v684_v34 = vld [vmem:[%s1004_s0 + $0x40] sm:$0xf0] }
   0xb   :  { %720 = vmatpush.bf16.msra.mxu3 %v705_v9  ;;  %384 = vmatpush.bf16.msra.mxu1 %v713_v10  ;;  %v507_v32 = vor.u32 %v676_v28, %v504_v29  ;;  %v535_v35 = vor.u32 %v684_v34, %v534_v33  ;;  %v514_v36 = vld [vmem:[%s1004_s0 + $0x18] sm:$0xf]  ;;  %v680_v37 = vld [vmem:[%s1004_s0 + $0x20] sm:$0xf0]  ;;  %v586_v38 = vld [vmem:[%s1004_s0 + $0xa8] sm:$0xf] }
   0xc   :  { %v698_v39 = vld [vmem:[%s1004_s0 + $0xb0] sm:$0xf0]  ;;  %v679_v40 = vld [vmem:[%s1004_s0 + $0x1c] sm:$0xf]  ;;  %v516_v41 = vld [vmem:[%s1004_s0 + $0x24] sm:$0xf0]  ;;  %v515_v42 = vor.u32 %v680_v37, %v514_v36 }
   0xd   :  { %v587_v43 = vor.u32 %v698_v39, %v586_v38  ;;  %v519_v44 = vor.u32 %v679_v40, %v516_v41  ;;  %v546_v45 = vld [vmem:[%s1004_s0 + $0x50] sm:$0xf]  ;;  %v687_v46 = vld [vmem:[%s1004_s0 + $0x58] sm:$0xf0]  ;;  %v682_v50 = vld [vmem:[%s1004_s0 + $0x34] sm:$0xf] }
   0xe   :  { %336 = vmatpush.bf16.msra.mxu0 %v704_v11  ;;  %v547_v47 = vor.u32 %v687_v46, %v546_v45  ;;  %v526_v48 = vld [vmem:[%s1004_s0 + $0x30] sm:$0xf]  ;;  %v683_v49 = vld [vmem:[%s1004_s0 + $0x38] sm:$0xf0]  ;;  %v528_v51 = vld [vmem:[%s1004_s0 + $0x3c] sm:$0xf0] }
   0xf   :  { %721 = vmatpush.bf16.msra.mxu3 %v704_v11  ;;  %385 = vmatpush.bf16.msra.mxu1 %v712_v12  ;;  %v694_v52 = vld [vmem:[%s1004_s0 + $0x94] sm:$0xf]  ;;  %v576_v53 = vld [vmem:[%s1004_s0 + $0x9c] sm:$0xf0]  ;;  %v527_v54 = vor.u32 %v683_v49, %v526_v48  ;;  %v531_v55 = vor.u32 %v682_v50, %v528_v51  ;;  %v558_v57 = vld [vmem:[%s1004_s0 + $0x68] sm:$0xf] }
  0x10   :  { %v579_v56 = vor.u32 %v694_v52, %v576_v53  ;;  %v690_v58 = vld [vmem:[%s1004_s0 + $0x70] sm:$0xf0]  ;;  %v538_v60 = vld [vmem:[%s1004_s0 + $0x48] sm:$0xf]  ;;  %v685_v62 = vld [vmem:[%s1004_s0 + $0x4c] sm:$0xf] }
  0x11   :  { %v559_v59 = vor.u32 %v690_v58, %v558_v57  ;;  %v686_v61 = vld [vmem:[%s1004_s0 + $0x50] sm:$0xf0]  ;;  %v540_v63 = vld [vmem:[%s1004_s0 + $0x54] sm:$0xf0]  ;;  %v697_v0 = vld [vmem:[%s1004_s0 + $0xac] sm:$0xf] }
  0x12   :  { %337 = vmatpush.bf16.msra.mxu0 %v703_v13  ;;  %v539_v2 = vor.u32 %v686_v61, %v538_v60  ;;  %v543_v3 = vor.u32 %v685_v62, %v540_v63  ;;  %v570_v5 = vld [vmem:[%s1004_s0 + $0x80] sm:$0xf]  ;;  %v693_v6 = vld [vmem:[%s1004_s0 + $0x88] sm:$0xf0]  ;;  %v552_v11 = vld [vmem:[%s1004_s0 + $0x6c] sm:$0xf0] }
  0x13   :  { %722 = vmatpush.bf16.msra.mxu3 %v703_v13  ;;  %386 = vmatpush.bf16.msra.mxu1 %v711_v14  ;;  %v571_v7 = vor.u32 %v693_v6, %v570_v5  ;;  %v550_v8 = vld [vmem:[%s1004_s0 + $0x60] sm:$0xf]  ;;  %v689_v9 = vld [vmem:[%s1004_s0 + $0x68] sm:$0xf0]  ;;  %v562_v17 = vld [vmem:[%s1004_s0 + $0x78] sm:$0xf] }
  0x14   :  { %v692_v18 = vld [vmem:[%s1004_s0 + $0x80] sm:$0xf0]  ;;  %v699_v24 = vld [vmem:[%s1004_s0 + $0xb8] sm:$0xf0] }
  0x16   :  { %338 = vmatpush.bf16.msra.mxu0 %v702_v15 }
  0x17   :  { %723 = vmatpush.bf16.msra.mxu3 %v702_v15  ;;  %387 = vmatpush.bf16.msra.mxu1 %v710_v16  ;;  %v696_v15 = vld [vmem:[%s1004_s0 + $0xa0] sm:$0xf0] }
  0x1a   :  { %669 = vmatmul.msk.bf16.gmra.mxu2 %vm308_vm0, %v523_v19  ;;  %339 = vmatpush.bf16.msra.mxu0 %v701_v20  ;;  %v691_v19 = vld [vmem:[%s1004_s0 + $0x7c] sm:$0xf] }
  0x1b   :  { %724 = vmatpush.bf16.msra.mxu3 %v701_v20  ;;  %388 = vmatpush.bf16.msra.mxu1 %v709_v21  ;;  %v564_v20 = vld [vmem:[%s1004_s0 + $0x84] sm:$0xf0] }
  0x1e   :  { %340 = vmatpush.bf16.msra.mxu0 %v700_v22 }
  0x1f   :  { %725 = vmatpush.bf16.msra.mxu3 %v700_v22  ;;  %389 = vmatpush.bf16.msra.mxu1 %v708_v23  ;;  %v567_v22 = vor.u32 %v691_v19, %v564_v20 }
  0x21   :  { %341 = vmatmul.bf16.vlgmr.msra.gmra.mxu0 %v503_v30 }
  0x22   :  { %371 = vmatmul.bf16.vlgmr.msra.gmra.mxu3 %v575_v31  ;;  %390 = vmatmul.bf16.vlgmr.msra.gmra.mxu1 %v507_v32 }
  0x23   :  { %726 = vmatpush.bf16.msrb.mxu3 %v715_v1  ;;  %v588_v1 = vld [vmem:[%s1004_s0 + $0xb4] sm:$0xf0] }
  0x27   :  { %727 = vmatpush.bf16.msrb.mxu3 %v714_v4  ;;  %v591_v4 = vor.u32 %v697_v0, %v588_v1 }
  0x2a   :  { %670 = vmatmul.msk.bf16.gmra.mxu2 %vm308_vm0, %v535_v35 }
  0x2b   :  { %728 = vmatpush.bf16.msrb.mxu3 %v713_v10  ;;  %v688_v10 = vld [vmem:[%s1004_s0 + $0x64] sm:$0xf] }
  0x2c   :  { %v555_v13 = vor.u32 %v688_v10, %v552_v11 }
  0x2f   :  { %729 = vmatpush.bf16.msrb.mxu3 %v712_v12  ;;  %v551_v12 = vor.u32 %v689_v9, %v550_v8 }
  0x31   :  { %346 = vmatmul.bf16.gmra.mxu0 %v515_v42 }
  0x32   :  { %376 = vmatmul.bf16.gmra.mxu3 %v587_v43  ;;  %395 = vmatmul.bf16.gmra.mxu1 %v519_v44 }
  0x33   :  { %730 = vmatpush.bf16.msrb.mxu3 %v711_v14  ;;  %v582_v14 = vld [vmem:[%s1004_s0 + $0x98] sm:$0xf] }
  0x37   :  { %731 = vmatpush.bf16.msrb.mxu3 %v710_v16  ;;  %v583_v16 = vor.u32 %v696_v15, %v582_v14 }
  0x3a   :  { %671 = vmatmul.msk.bf16.gmra.mxu2 %vm308_vm0, %v547_v47 }
  0x3b   :  { %732 = vmatpush.bf16.msrb.mxu3 %v709_v21  ;;  %v563_v21 = vor.u32 %v692_v18, %v562_v17 }
  0x3f   :  { %733 = vmatpush.bf16.msrb.mxu3 %v708_v23  ;;  %v594_v23 = vld [vmem:[%s1004_s0 + $0xb0] sm:$0xf] }
  0x40   :  { %v595_v25 = vor.u32 %v699_v24, %v594_v23 }
  0x41   :  { %351 = vmatmul.bf16.gmra.mxu0 %v527_v54 }
  0x42   :  { %400 = vmatmul.bf16.gmra.mxu1 %v531_v55  ;;  %420 = vmatmul.bf16.vlgmr.msrb.gmra.mxu3 %v579_v56 }
  0x4a   :  { %672 = vmatmul.msk.bf16.gmra.mxu2 %vm308_vm0, %v559_v59 }
  0x51   :  { %356 = vmatmul.bf16.gmra.mxu0 %v539_v2 }
  0x52   :  { %405 = vmatmul.bf16.gmra.mxu1 %v543_v3  ;;  %425 = vmatmul.bf16.gmra.mxu3 %v591_v4 }
  0x5a   :  { %673 = vmatmul.msk.bf16.gmra.mxu2 %vm308_vm0, %v571_v7 }
  0x61   :  { %361 = vmatmul.bf16.gmra.mxu0 %v551_v12 }
  0x62   :  { %410 = vmatmul.bf16.gmra.mxu1 %v555_v13 }
  0x6a   :  { %674 = vmatmul.msk.bf16.gmra.mxu2 %vm308_vm0, %v583_v16 }
  0x71   :  { %366 = vmatmul.bf16.gmra.mxu0 %v563_v21 }
  0x72   :  { %415 = vmatmul.bf16.gmra.mxu1 %v567_v22 }
  0x7a   :  { %675 = vmatmul.msk.bf16.gmra.mxu2 %vm308_vm0, %v595_v25 }
  0x8d   :  { %v440_v26 = vpop.f32.mrf.mxu2 }
  0x95   :  { %v442_v27 = vpop.f32.mrf.mxu2 }
  0x9d   :  { %v445_v28 = vpop.f32.mrf.mxu2 }
  0x9e   :  { %v342_v29 = vpop.f32.mrf.mxu0 }
  0x9f   :  { %v391_v30 = vpop.f32.mrf.mxu1 }
  0xa0   :  { %v392_v31 = vadd.f32 %v391_v30, %v342_v29 }
  0xa2   :  { %v441_v32 = vadd.f32 %v440_v26, %v392_v31 }
  0xa4   :  { %480 = vst [vmem:[%s1005_s2] sm:$0xff] %v441_v32 }
  0xa5   :  { %v447_v33 = vpop.f32.mrf.mxu2  ;;  %v372_v48 = vpop.f32.mrf.mxu3 }
  0xa6   :  { %v344_v34 = vpop.f32.mrf.mxu0 }
  0xa7   :  { %v393_v35 = vpop.f32.mrf.mxu1 }
  0xa8   :  { %v394_v36 = vadd.f32 %v393_v35, %v344_v34 }
  0xaa   :  { %v443_v37 = vadd.f32 %v442_v27, %v394_v36 }
  0xac   :  { %481 = vst [vmem:[%s1005_s2 + $0x8] sm:$0xff] %v443_v37 }
  0xad   :  { %v450_v38 = vpop.f32.mrf.mxu2  ;;  %v374_v54 = vpop.f32.mrf.mxu3 }
  0xae   :  { %v347_v39 = vpop.f32.mrf.mxu0 }
  0xaf   :  { %v396_v40 = vpop.f32.mrf.mxu1 }
  0xb0   :  { %v397_v41 = vadd.f32 %v396_v40, %v347_v39 }
  0xb2   :  { %v446_v42 = vadd.f32 %v445_v28, %v397_v41 }
  0xb4   :  { %482 = vst [vmem:[%s1005_s2 + $0x10] sm:$0xff] %v446_v42 }
  0xb5   :  { %v452_v43 = vpop.f32.mrf.mxu2  ;;  %v377_v62 = vpop.f32.mrf.mxu3 }
  0xb6   :  { %v349_v44 = vpop.f32.mrf.mxu0 }
  0xb7   :  { %v398_v45 = vpop.f32.mrf.mxu1 }
  0xb8   :  { %v399_v46 = vadd.f32 %v398_v45, %v349_v44 }
  0xba   :  { %v448_v47 = vadd.f32 %v447_v33, %v399_v46 }
  0xbc   :  { %483 = vst [vmem:[%s1005_s2 + $0x18] sm:$0xff] %v448_v47 }
  0xbd   :  { %v455_v49 = vpop.f32.mrf.mxu2  ;;  %v379_v6 = vpop.f32.mrf.mxu3 }
  0xbe   :  { %v352_v50 = vpop.f32.mrf.mxu0 }
  0xbf   :  { %v401_v51 = vpop.f32.mrf.mxu1 }
  0xc0   :  { %v402_v52 = vadd.f32 %v401_v51, %v352_v50 }
  0xc2   :  { %v451_v53 = vadd.f32 %v450_v38, %v402_v52 }
  0xc4   :  { %484 = vst [vmem:[%s1005_s2 + $0x20] sm:$0xff] %v451_v53 }
  0xc5   :  { %v457_v55 = vpop.f32.mrf.mxu2  ;;  %v421_v13 = vpop.f32.mrf.mxu3 }
  0xc6   :  { %v354_v56 = vpop.f32.mrf.mxu0  ;;  %v422_v19 = vadd.f32 %v421_v13, %v372_v48 }
  0xc7   :  { %v403_v57 = vpop.f32.mrf.mxu1 }
  0xc8   :  { %v404_v58 = vadd.f32 %v403_v57, %v354_v56 }
  0xca   :  { %v453_v59 = vadd.f32 %v452_v43, %v404_v58 }
  0xcc   :  { %485 = vst [vmem:[%s1005_s2 + $0x28] sm:$0xff] %v453_v59 }
  0xcd   :  { %v460_v60 = vpop.f32.mrf.mxu2  ;;  %v423_v20 = vpop.f32.mrf.mxu3 }
  0xce   :  { %v357_v61 = vpop.f32.mrf.mxu0  ;;  %v424_v27 = vadd.f32 %v423_v20, %v374_v54 }
  0xcf   :  { %v406_v63 = vpop.f32.mrf.mxu1 }
  0xd0   :  { %v407_v0 = vadd.f32 %v406_v63, %v357_v61 }
  0xd2   :  { %v456_v1 = vadd.f32 %v455_v49, %v407_v0 }
  0xd4   :  { %486 = vst [vmem:[%s1005_s2 + $0x30] sm:$0xff] %v456_v1 }
  0xd5   :  { %v462_v2 = vpop.f32.mrf.mxu2  ;;  %v426_v31 = vpop.f32.mrf.mxu3 }
  0xd6   :  { %v359_v3 = vpop.f32.mrf.mxu0  ;;  %v427_v35 = vadd.f32 %v426_v31, %v377_v62 }
  0xd7   :  { %v408_v4 = vpop.f32.mrf.mxu1 }
  0xd8   :  { %v409_v5 = vadd.f32 %v408_v4, %v359_v3 }
  0xda   :  { %v458_v7 = vadd.f32 %v457_v55, %v409_v5 }
  0xdc   :  { %487 = vst [vmem:[%s1005_s2 + $0x38] sm:$0xff] %v458_v7 }
  0xdd   :  { %v465_v8 = vpop.f32.mrf.mxu2  ;;  %v428_v38 = vpop.f32.mrf.mxu3 }
  0xde   :  { %v362_v9 = vpop.f32.mrf.mxu0  ;;  %v429_v39 = vadd.f32 %v428_v38, %v379_v6 }
  0xdf   :  { %v411_v10 = vpop.f32.mrf.mxu1 }
  0xe0   :  { %v412_v11 = vadd.f32 %v411_v10, %v362_v9 }
  0xe2   :  { %v461_v12 = vadd.f32 %v460_v60, %v412_v11 }
  0xe4   :  { %488 = vst [vmem:[%s1005_s2 + $0x40] sm:$0xff] %v461_v12 }
  0xe5   :  { %v467_v14 = vpop.f32.mrf.mxu2 }
  0xe6   :  { %v364_v15 = vpop.f32.mrf.mxu0 }
  0xe7   :  { %v413_v16 = vpop.f32.mrf.mxu1 }
  0xe8   :  { %v414_v17 = vadd.f32 %v413_v16, %v364_v15 }
  0xea   :  { %v463_v18 = vadd.f32 %v462_v2, %v414_v17 }
  0xec   :  { %489 = vst [vmem:[%s1005_s2 + $0x48] sm:$0xff] %v463_v18 }
  0xed   :  { %v470_v21 = vpop.f32.mrf.mxu2 }
  0xee   :  { %v471_v22 = vadd.f32 %v470_v21, %v422_v19  ;;  %v367_v23 = vpop.f32.mrf.mxu0 }
  0xef   :  { %v416_v24 = vpop.f32.mrf.mxu1 }
  0xf0   :  { %492 = vst [vmem:[%s1005_s2 + $0x60] sm:$0xff] %v471_v22  ;;  %v417_v25 = vadd.f32 %v416_v24, %v367_v23 }
  0xf2   :  { %v466_v26 = vadd.f32 %v465_v8, %v417_v25 }
  0xf4   :  { %490 = vst [vmem:[%s1005_s2 + $0x50] sm:$0xff] %v466_v26 }
  0xf5   :  { %v472_v28 = vpop.f32.mrf.mxu2 }
  0xf6   :  { %v473_v29 = vadd.f32 %v472_v28, %v424_v27  ;;  %v369_v30 = vpop.f32.mrf.mxu0 }
  0xf7   :  { %v418_v32 = vpop.f32.mrf.mxu1 }
  0xf8   :  { %493 = vst [vmem:[%s1005_s2 + $0x68] sm:$0xff] %v473_v29  ;;  %v419_v33 = vadd.f32 %v418_v32, %v369_v30 }
  0xfa   :  { %v468_v34 = vadd.f32 %v467_v14, %v419_v33 }
  0xfc   :  { %491 = vst [vmem:[%s1005_s2 + $0x58] sm:$0xff] %v468_v34 }
  0xfd   :  { %v475_v36 = vpop.f32.mrf.mxu2 }
  0xfe   :  { %v476_v37 = vadd.f32 %v475_v36, %v427_v35 }
 0x100   :  { %494 = vst [vmem:[%s1005_s2 + $0x70] sm:$0xff] %v476_v37 }
 0x105   :  { %v477_v40 = vpop.f32.mrf.mxu2 }
 0x106   :  { %v478_v41 = vadd.f32 %v477_v40, %v429_v39 }
 0x108   :  { %495 = vst [vmem:[%s1005_s2 + $0x78] sm:$0xff] %v478_v41 }

// kernel: forward.19
= control target key start
LH: loop header
LB: loop body
LE: loop exit
PB: predicated region body
PF: predicated region fallthrough
CT: control target
= control target key end

     0   :  { %vm58_vm0 = vcmask 130048   ;;  %s198_s1 = inlined_call_operand.vmem [shape: bf16[16,128], index: 1, kind: input, shape index: {}]   ;;  %s199_s0 = inlined_call_operand.vmem [shape: f32[32,16], index: 0, kind: input, shape index: {}]   ;;  %s200_s2 = inlined_call_operand.vmem [shape: f32[1,16], index: 2, kind: input, shape index: {}]   ;;  %s201_s3 = inlined_call_operand.vmem [shape: f32[1,16], index: 3, kind: input, shape index: {}]   ;;  %s202_s4 = inlined_call_operand.vmem [shape: f32[1,128], index: 4, kind: input, shape index: {}]   ;;  %s203_s5 = inlined_call_operand.vmem [shape: f32[1,128], index: 5, kind: input, shape index: {}]   ;;  %s204_s6 = inlined_call_operand.vmem [shape: f32[32,128], index: 6, kind: output, shape index: {}]  }
   0x1   :  { %v118_v0 = vld [vmem:[%s198_s1] sm:$0xff]  ;;  %v25_v2 = vld [vmem:[%s199_s0 + $0x8] sm:$0xff]  ;;  %v26_v5 = vld [vmem:[%s199_s0 + $0x10] sm:$0xff] }
   0x2   :  { %v24_v1 = vld [vmem:[%s199_s0] sm:$0xff]  ;;  %72 = vmatpush.bf16.msra.mxu0 %v118_v0  ;;  %119 = vmatpush.bf16.msra.mxu1 %v118_v0  ;;  %v27_v6 = vld [vmem:[%s199_s0 + $0x18] sm:$0xff] }
   0x3   :  { %v120_v3 = vld [vmem:[%s200_s2] ss:$0 sm:$0xff] }
   0x4   :  { %v121_v4 = vld [vmem:[%s201_s3] ss:$0 sm:$0xff]  ;;  %v32_v7 = vmul.f32 %v120_v3, %v24_v1  ;;  %v33_v8 = vmul.f32 %v120_v3, %v25_v2  ;;  %v34_v9 = vmul.f32 %v120_v3, %v26_v5  ;;  %v35_v10 = vmul.f32 %v120_v3, %v27_v6 }
   0x5   :  { %v122_v21 = vld [vmem:[%s202_s4] ss:$0 sm:$0xff] }
   0x6   :  { %v40_v11 = vadd.f32 %v121_v4, %v32_v7  ;;  %v41_v12 = vadd.f32 %v121_v4, %v33_v8  ;;  %v42_v13 = vadd.f32 %v121_v4, %v34_v9  ;;  %v43_v14 = vadd.f32 %v121_v4, %v35_v10  ;;  %v123_v22 = vld [vmem:[%s203_s5] ss:$0 sm:$0xff] }
   0x8   :  { %v44_v15 = vmax.f32 %v40_v11, 0.0  ;;  %v45_v16 = vmax.f32 %v41_v12, 0.0  ;;  %v46_v17 = vmax.f32 %v42_v13, 0.0  ;;  %v47_v18 = vmax.f32 %v43_v14, 0.0 }
   0xa   :  { %v48_v19 = vpack.c.bf16 %v45_v16, %v44_v15  ;;  %v49_v20 = vpack.c.bf16 %v47_v18, %v46_v17 }
   0xc   :  { %116 = vmatmul.msk.bf16.vlgmr.msra.gmra.mxu0 %vm58_vm0, %v48_v19  ;;  %117 = vmatmul.msk.bf16.vlgmr.msra.gmra.mxu1 %vm58_vm0, %v49_v20 }
  0x89   :  { %v74_v23 = vpop.f32.mrf.mxu0  ;;  %v79_v24 = vpop.f32.mrf.mxu1 }
  0x8a   :  { %v88_v25 = vmul.f32 %v122_v21, %v74_v23  ;;  %v90_v26 = vmul.f32 %v122_v21, %v79_v24 }
  0x8c   :  { %v96_v27 = vadd.f32 %v123_v22, %v88_v25  ;;  %v98_v28 = vadd.f32 %v123_v22, %v90_v26 }
  0x8e   :  { %v100_v29 = vmax.f32 %v96_v27, 0.0  ;;  %v102_v30 = vmax.f32 %v98_v28, 0.0 }
  0x90   :  { %104 = vst [vmem:[%s204_s6] sm:$0xff] %v100_v29 }
  0x91   :  { %106 = vst [vmem:[%s204_s6 + $0x10] sm:$0xff] %v102_v30  ;;  %v76_v31 = vpop.f32.mrf.mxu0  ;;  %v81_v32 = vpop.f32.mrf.mxu1 }
  0x92   :  { %v89_v33 = vmul.f32 %v122_v21, %v76_v31  ;;  %v91_v34 = vmul.f32 %v122_v21, %v81_v32 }
  0x94   :  { %v97_v35 = vadd.f32 %v123_v22, %v89_v33  ;;  %v99_v36 = vadd.f32 %v123_v22, %v91_v34 }
  0x96   :  { %v101_v37 = vmax.f32 %v97_v35, 0.0  ;;  %v103_v38 = vmax.f32 %v99_v36, 0.0 }
  0x98   :  { %105 = vst [vmem:[%s204_s6 + $0x8] sm:$0xff] %v101_v37 }
  0x99   :  { %107 = vst [vmem:[%s204_s6 + $0x18] sm:$0xff] %v103_v38 }

// kernel: forward.18
= control target key start
LH: loop header
LB: loop body
LE: loop exit
PB: predicated region body
PF: predicated region fallthrough
CT: control target
= control target key end

     0   :  { %vm127_vm0 = vcmask 261120   ;;  %s322_s3 = inlined_call_operand.vmem [shape: bf16[32,128], index: 3, kind: input, shape index: {}]   ;;  %s323_s0 = inlined_call_operand.vmem [shape: f32[4,32,32], index: 0, kind: input, shape index: {}]   ;;  %s324_s1 = inlined_call_operand.vmem [shape: f32[1,32], index: 1, kind: input, shape index: {}]   ;;  %s325_s2 = inlined_call_operand.vmem [shape: f32[1,32], index: 2, kind: input, shape index: {}]   ;;  %s326_s4 = inlined_call_operand.vmem [shape: f32[32,128], index: 4, kind: output, shape index: {}]  }
   0x1   :  { %v184_v0 = vld [vmem:[%s322_s3 + $0x8] sm:$0xff]  ;;  %v183_v1 = vld [vmem:[%s322_s3] sm:$0xff]  ;;  %v22_v27 = vld [vmem:[%s323_s0 + $0x10] sm:$0xff] }
   0x2   :  { %v20_v2 = vld [vmem:[%s323_s0] sm:$0xff]  ;;  %v21_v3 = vld [vmem:[%s323_s0 + $0x8] sm:$0xff]  ;;  %140 = vmatpush.bf16.msra.mxu0 %v184_v0  ;;  %185 = vmatpush.bf16.msra.mxu1 %v184_v0  ;;  %v23_v28 = vld [vmem:[%s323_s0 + $0x18] sm:$0xff] }
   0x3   :  { %v229_v4 = vld [vmem:[%s324_s1] ss:$0 sm:$0xff]  ;;  %v162_v7 = vld [vmem:[%s323_s0 + $0x28] sm:$0xff]  ;;  %v163_v33 = vld [vmem:[%s323_s0 + $0x30] sm:$0xff] }
   0x4   :  { %v234_v5 = vld [vmem:[%s325_s2] ss:$0 sm:$0xff]  ;;  %v166_v9 = vld [vmem:[%s323_s0 + $0x48] sm:$0xff]  ;;  %v27_v10 = vmul.f32 %v229_v4, %v20_v2  ;;  %v28_v11 = vmul.f32 %v229_v4, %v21_v3  ;;  %v48_v13 = vmul.f32 %v229_v4, %v162_v7  ;;  %v164_v34 = vld [vmem:[%s323_s0 + $0x38] sm:$0xff]  ;;  %v29_v43 = vmul.f32 %v229_v4, %v22_v27 }
   0x5   :  { %v161_v6 = vld [vmem:[%s323_s0 + $0x20] sm:$0xff]  ;;  %v170_v15 = vld [vmem:[%s323_s0 + $0x68] sm:$0xff]  ;;  %v69_v17 = vmul.f32 %v229_v4, %v166_v9  ;;  %v167_v35 = vld [vmem:[%s323_s0 + $0x50] sm:$0xff]  ;;  %v30_v44 = vmul.f32 %v229_v4, %v23_v28  ;;  %v49_v46 = vmul.f32 %v229_v4, %v163_v33  ;;  %v50_v47 = vmul.f32 %v229_v4, %v164_v34 }
   0x6   :  { %v165_v8 = vld [vmem:[%s323_s0 + $0x40] sm:$0xff]  ;;  %v47_v12 = vmul.f32 %v229_v4, %v161_v6  ;;  %v90_v19 = vmul.f32 %v229_v4, %v170_v15  ;;  %141 = vmatpush.bf16.msra.mxu0 %v183_v1  ;;  %186 = vmatpush.bf16.msra.mxu1 %v183_v1  ;;  %v34_v20 = vadd.f32 %v234_v5, %v27_v10  ;;  %v168_v40 = vld [vmem:[%s323_s0 + $0x58] sm:$0xff]  ;;  %v171_v57 = vld [vmem:[%s323_s0 + $0x70] sm:$0xff] }
   0x7   :  { %v169_v14 = vld [vmem:[%s323_s0 + $0x60] sm:$0xff]  ;;  %v68_v16 = vmul.f32 %v229_v4, %v165_v8  ;;  %v35_v21 = vadd.f32 %v234_v5, %v28_v11  ;;  %v52_v23 = vadd.f32 %v234_v5, %v48_v13  ;;  %v73_v25 = vadd.f32 %v234_v5, %v69_v17  ;;  %v172_v58 = vld [vmem:[%s323_s0 + $0x78] sm:$0xff] }
   0x8   :  { %v89_v18 = vmul.f32 %v229_v4, %v169_v14  ;;  %v51_v22 = vadd.f32 %v234_v5, %v47_v12  ;;  %v38_v29 = vmax.f32 %v34_v20, 0.0  ;;  %v94_v32 = vadd.f32 %v234_v5, %v90_v19 }
   0x9   :  { %v72_v24 = vadd.f32 %v234_v5, %v68_v16  ;;  %v39_v30 = vmax.f32 %v35_v21, 0.0  ;;  %v56_v36 = vmax.f32 %v52_v23, 0.0  ;;  %v77_v38 = vmax.f32 %v73_v25, 0.0 }
   0xa   :  { %v93_v26 = vadd.f32 %v234_v5, %v89_v18  ;;  %v55_v31 = vmax.f32 %v51_v22, 0.0  ;;  %v98_v42 = vmax.f32 %v94_v32, 0.0  ;;  %v70_v48 = vmul.f32 %v229_v4, %v167_v35 }
   0xb   :  { %v76_v37 = vmax.f32 %v72_v24, 0.0  ;;  %v60_v45 = vadd.f32 %v56_v36, %v39_v30  ;;  %v36_v50 = vadd.f32 %v234_v5, %v29_v43  ;;  %v37_v51 = vadd.f32 %v234_v5, %v30_v44 }
   0xc   :  { %v97_v39 = vmax.f32 %v93_v26, 0.0  ;;  %v59_v41 = vadd.f32 %v55_v31, %v38_v29  ;;  %v71_v52 = vmul.f32 %v229_v4, %v168_v40  ;;  %v53_v54 = vadd.f32 %v234_v5, %v49_v46 }
   0xd   :  { %v81_v53 = vadd.f32 %v77_v38, %v60_v45  ;;  %v54_v55 = vadd.f32 %v234_v5, %v50_v47  ;;  %v74_v56 = vadd.f32 %v234_v5, %v70_v48  ;;  %v40_v60 = vmax.f32 %v36_v50, 0.0 }
   0xe   :  { %v80_v49 = vadd.f32 %v76_v37, %v59_v41  ;;  %v41_v61 = vmax.f32 %v37_v51, 0.0  ;;  %v75_v62 = vadd.f32 %v234_v5, %v71_v52  ;;  %v57_v0 = vmax.f32 %v53_v54, 0.0 }
   0xf   :  { %v102_v63 = vadd.f32 %v98_v42, %v81_v53  ;;  %v58_v1 = vmax.f32 %v54_v55, 0.0  ;;  %v78_v2 = vmax.f32 %v74_v56, 0.0  ;;  %v91_v7 = vmul.f32 %v229_v4, %v171_v57 }
  0x10   :  { %v101_v59 = vadd.f32 %v97_v39, %v80_v49  ;;  %v79_v6 = vmax.f32 %v75_v62, 0.0  ;;  %v92_v8 = vmul.f32 %v229_v4, %v172_v58  ;;  %v61_v10 = vadd.f32 %v57_v0, %v40_v60 }
  0x11   :  { %v106_v9 = vmul.f32 0.25, %v102_v63  ;;  %v62_v11 = vadd.f32 %v58_v1, %v41_v61  ;;  %v95_v12 = vadd.f32 %v234_v5, %v91_v7 }
  0x12   :  { %v105_v3 = vmul.f32 0.25, %v101_v59  ;;  %v96_v13 = vadd.f32 %v234_v5, %v92_v8  ;;  %v82_v15 = vadd.f32 %v78_v2, %v61_v10 }
  0x13   :  { %v83_v16 = vadd.f32 %v79_v6, %v62_v11  ;;  %v99_v17 = vmax.f32 %v95_v12, 0.0 }
  0x14   :  { %v109_v14 = vpack.c.bf16 %v106_v9, %v105_v3  ;;  %v100_v18 = vmax.f32 %v96_v13, 0.0 }
  0x15   :  { %v103_v19 = vadd.f32 %v99_v17, %v82_v15 }
  0x16   :  { %181 = vmatmul.msk.bf16.vlgmr.msra.gmra.mxu0 %vm127_vm0, %v109_v14  ;;  %v104_v20 = vadd.f32 %v100_v18, %v83_v16 }
  0x17   :  { %v107_v21 = vmul.f32 0.25, %v103_v19 }
  0x18   :  { %v108_v22 = vmul.f32 0.25, %v104_v20 }
  0x1a   :  { %v110_v23 = vpack.c.bf16 %v108_v22, %v107_v21 }
  0x1c   :  { %182 = vmatmul.msk.bf16.vlgmr.msra.gmra.mxu1 %vm127_vm0, %v110_v23 }
  0x93   :  { %v143_v4 = vpop.f32.mrf.mxu0 }
  0x94   :  { %153 = vst [vmem:[%s326_s4] sm:$0xff] %v143_v4 }
  0x99   :  { %v148_v24 = vpop.f32.mrf.mxu1 }
  0x9a   :  { %155 = vst [vmem:[%s326_s4 + $0x10] sm:$0xff] %v148_v24 }
  0x9b   :  { %v145_v5 = vpop.f32.mrf.mxu0 }
  0x9c   :  { %154 = vst [vmem:[%s326_s4 + $0x8] sm:$0xff] %v145_v5 }
  0xa1   :  { %v150_v25 = vpop.f32.mrf.mxu1 }
  0xa2   :  { %156 = vst [vmem:[%s326_s4 + $0x18] sm:$0xff] %v150_v25 }

// kernel: forward.20
= control target key start
LH: loop header
LB: loop body
LE: loop exit
PB: predicated region body
PF: predicated region fallthrough
CT: control target
= control target key end

     0   :  { %vm194_vm0 = vcmask 261120   ;;  %s515_s1 = inlined_call_operand.vmem [shape: bf16[288,128], index: 1, kind: input, shape index: {}]   ;;  %s516_s0 = inlined_call_operand.vmem [shape: bf16[32,288], index: 0, kind: input, shape index: {}]   ;;  %s517_s2 = inlined_call_operand.vmem [shape: f32[32,128], index: 2, kind: output, shape index: {}]  }
   0x1   :  { %v377_v0 = vld [vmem:[%s515_s1 + $0x38] sm:$0xff]  ;;  %v376_v2 = vld [vmem:[%s515_s1 + $0x30] sm:$0xff]  ;;  %v387_v4 = vld [vmem:[%s515_s1 + $0x88] sm:$0xff] }
   0x2   :  { %v385_v1 = vld [vmem:[%s515_s1 + $0x78] sm:$0xff]  ;;  %201 = vmatpush.bf16.msra.mxu0 %v377_v0  ;;  %v384_v3 = vld [vmem:[%s515_s1 + $0x70] sm:$0xff]  ;;  %388 = vmatpush.bf16.msra.mxu3 %v377_v0  ;;  %v386_v5 = vld [vmem:[%s515_s1 + $0x80] sm:$0xff] }
   0x3   :  { %220 = vmatpush.bf16.msra.mxu1 %v385_v1  ;;  %245 = vmatpush.bf16.msra.mxu2 %v387_v4  ;;  %v276_v6 = vld [vmem:[%s516_s0 + $0x8] sm:$0xf]  ;;  %v366_v7 = vld [vmem:[%s516_s0 + $0x10] sm:$0xf0]  ;;  %v374_v11 = vld [vmem:[%s515_s1 + $0x20] sm:$0xff] }
   0x4   :  { %v375_v8 = vld [vmem:[%s515_s1 + $0x28] sm:$0xff]  ;;  %v277_v10 = vor.u32 %v366_v7, %v276_v6  ;;  %v382_v12 = vld [vmem:[%s515_s1 + $0x60] sm:$0xff]  ;;  %v373_v13 = vld [vmem:[%s515_s1 + $0x18] sm:$0xff] }
   0x5   :  { %v383_v9 = vld [vmem:[%s515_s1 + $0x68] sm:$0xff]  ;;  %v381_v14 = vld [vmem:[%s515_s1 + $0x58] sm:$0xff]  ;;  %v372_v15 = vld [vmem:[%s515_s1 + $0x10] sm:$0xff] }
   0x6   :  { %202 = vmatpush.bf16.msra.mxu0 %v376_v2  ;;  %389 = vmatpush.bf16.msra.mxu3 %v376_v2  ;;  %v380_v16 = vld [vmem:[%s515_s1 + $0x50] sm:$0xff]  ;;  %v288_v17 = vld [vmem:[%s516_s0 + $0x20] sm:$0xf]  ;;  %v369_v18 = vld [vmem:[%s516_s0 + $0x28] sm:$0xf0] }
   0x7   :  { %221 = vmatpush.bf16.msra.mxu1 %v384_v3  ;;  %246 = vmatpush.bf16.msra.mxu2 %v386_v5  ;;  %v371_v19 = vld [vmem:[%s515_s1 + $0x8] sm:$0xff]  ;;  %v289_v21 = vor.u32 %v369_v18, %v288_v17  ;;  %v370_v22 = vld [vmem:[%s515_s1] sm:$0xff]  ;;  %v270_v27 = vld [vmem:[%s516_s0 + $0xc] sm:$0xf0] }
   0x8   :  { %v379_v20 = vld [vmem:[%s515_s1 + $0x48] sm:$0xff]  ;;  %v378_v23 = vld [vmem:[%s515_s1 + $0x40] sm:$0xff]  ;;  %v280_v28 = vld [vmem:[%s516_s0 + $0x18] sm:$0xf] }
   0x9   :  { %v268_v24 = vld [vmem:[%s516_s0] sm:$0xf]  ;;  %v365_v25 = vld [vmem:[%s516_s0 + $0x8] sm:$0xf0]  ;;  %v364_v26 = vld [vmem:[%s516_s0 + $0x4] sm:$0xf] }
   0xa   :  { %203 = vmatpush.bf16.msra.mxu0 %v375_v8  ;;  %390 = vmatpush.bf16.msra.mxu3 %v375_v8  ;;  %v368_v29 = vld [vmem:[%s516_s0 + $0x20] sm:$0xf0]  ;;  %v269_v30 = vor.u32 %v365_v25, %v268_v24  ;;  %v273_v31 = vor.u32 %v364_v26, %v270_v27  ;;  %v367_v33 = vld [vmem:[%s516_s0 + $0x1c] sm:$0xf]  ;;  %v282_v34 = vld [vmem:[%s516_s0 + $0x24] sm:$0xf0] }
   0xb   :  { %222 = vmatpush.bf16.msra.mxu1 %v383_v9  ;;  %362 = vmatmul.msk.bf16.vlgmr.msra.gmra.mxu2 %vm194_vm0, %v277_v10  ;;  %v281_v32 = vor.u32 %v368_v29, %v280_v28  ;;  %v285_v35 = vor.u32 %v367_v33, %v282_v34 }
   0xe   :  { %204 = vmatpush.bf16.msra.mxu0 %v374_v11  ;;  %391 = vmatpush.bf16.msra.mxu3 %v374_v11 }
   0xf   :  { %223 = vmatpush.bf16.msra.mxu1 %v382_v12 }
  0x12   :  { %205 = vmatpush.bf16.msra.mxu0 %v373_v13  ;;  %392 = vmatpush.bf16.msra.mxu3 %v373_v13 }
  0x13   :  { %224 = vmatpush.bf16.msra.mxu1 %v381_v14 }
  0x16   :  { %206 = vmatpush.bf16.msra.mxu0 %v372_v15  ;;  %393 = vmatpush.bf16.msra.mxu3 %v372_v15 }
  0x17   :  { %225 = vmatpush.bf16.msra.mxu1 %v380_v16 }
  0x1a   :  { %207 = vmatpush.bf16.msra.mxu0 %v371_v19  ;;  %394 = vmatpush.bf16.msra.mxu3 %v371_v19 }
  0x1b   :  { %226 = vmatpush.bf16.msra.mxu1 %v379_v20  ;;  %363 = vmatmul.msk.bf16.gmra.mxu2 %vm194_vm0, %v289_v21 }
  0x1e   :  { %208 = vmatpush.bf16.msra.mxu0 %v370_v22  ;;  %395 = vmatpush.bf16.msra.mxu3 %v370_v22 }
  0x1f   :  { %227 = vmatpush.bf16.msra.mxu1 %v378_v23 }
  0x21   :  { %209 = vmatmul.bf16.vlgmr.msra.gmra.mxu0 %v269_v30  ;;  %214 = vmatmul.bf16.vlgmr.msra.gmra.mxu3 %v281_v32 }
  0x22   :  { %228 = vmatmul.bf16.vlgmr.msra.gmra.mxu1 %v273_v31 }
  0x32   :  { %233 = vmatmul.bf16.gmra.mxu1 %v285_v35 }
  0x8e   :  { %v248_v36 = vpop.f32.mrf.mxu2 }
  0x96   :  { %v250_v41 = vpop.f32.mrf.mxu2 }
  0x9e   :  { %v210_v37 = vpop.f32.mrf.mxu0  ;;  %v253_v47 = vpop.f32.mrf.mxu2 }
  0x9f   :  { %v229_v38 = vpop.f32.mrf.mxu1 }
  0xa0   :  { %v230_v39 = vadd.f32 %v229_v38, %v210_v37 }
  0xa2   :  { %v249_v40 = vadd.f32 %v248_v36, %v230_v39 }
  0xa4   :  { %258 = vst [vmem:[%s517_s2] sm:$0xff] %v249_v40  ;;  %v215_v46 = vpop.f32.mrf.mxu3 }
  0xa6   :  { %v212_v42 = vpop.f32.mrf.mxu0  ;;  %v255_v54 = vpop.f32.mrf.mxu2 }
  0xa7   :  { %v231_v43 = vpop.f32.mrf.mxu1 }
  0xa8   :  { %v232_v44 = vadd.f32 %v231_v43, %v212_v42 }
  0xaa   :  { %v251_v45 = vadd.f32 %v250_v41, %v232_v44 }
  0xac   :  { %259 = vst [vmem:[%s517_s2 + $0x8] sm:$0xff] %v251_v45  ;;  %v217_v51 = vpop.f32.mrf.mxu3 }
  0xaf   :  { %v234_v48 = vpop.f32.mrf.mxu1 }
  0xb0   :  { %v235_v49 = vadd.f32 %v234_v48, %v215_v46 }
  0xb2   :  { %v254_v50 = vadd.f32 %v253_v47, %v235_v49 }
  0xb4   :  { %260 = vst [vmem:[%s517_s2 + $0x10] sm:$0xff] %v254_v50 }
  0xb7   :  { %v236_v52 = vpop.f32.mrf.mxu1 }
  0xb8   :  { %v237_v53 = vadd.f32 %v236_v52, %v217_v51 }
  0xba   :  { %v256_v55 = vadd.f32 %v255_v54, %v237_v53 }
  0xbc   :  { %261 = vst [vmem:[%s517_s2 + $0x18] sm:$0xff] %v256_v55 }

// kernel: forward.21
= control target key start
LH: loop header
LB: loop body
LE: loop exit
PB: predicated region body
PF: predicated region fallthrough
CT: control target
= control target key end

     0   :  { %vm69_vm0 = vcmask 1043456   ;;  %vm62_vm1 = vcmask 195584   ;;  %s210_s1 = inlined_call_operand.vmem [shape: bf16[24,128], index: 1, kind: input, shape index: {}]   ;;  %s211_s0 = inlined_call_operand.vmem [shape: f32[32,24], index: 0, kind: input, shape index: {}]   ;;  %s212_s2 = inlined_call_operand.vmem [shape: f32[1,24], index: 2, kind: input, shape index: {}]   ;;  %s213_s3 = inlined_call_operand.vmem [shape: f32[1,24], index: 3, kind: input, shape index: {}]   ;;  %s214_s4 = inlined_call_operand.vmem [shape: f32[1,128], index: 4, kind: input, shape index: {}]   ;;  %s215_s5 = inlined_call_operand.vmem [shape: f32[1,128], index: 5, kind: input, shape index: {}]   ;;  %s216_s6 = inlined_call_operand.vmem [shape: f32[32,128], index: 6, kind: output, shape index: {}]  }
   0x1   :  { %v52_v0 = vld [vmem:[%s210_s1 + $0x8] sm:$0xf]  ;;  %v24_v1 = vld [vmem:[%s211_s0] sm:$0xff]  ;;  %v26_v6 = vld [vmem:[%s211_s0 + $0x10] sm:$0xff] }
   0x2   :  { %v58_v2 = vunpack.c.l.b16 %v52_v0  ;;  %v25_v3 = vld [vmem:[%s211_s0 + $0x8] sm:$0xff]  ;;  %v129_v4 = vld [vmem:[%s212_s2] ss:$0 sm:$0xff]  ;;  %v27_v10 = vld [vmem:[%s211_s0 + $0x18] sm:$0xff] }
   0x3   :  { %v130_v5 = vld [vmem:[%s213_s3] ss:$0 sm:$0xff]  ;;  %v32_v8 = vmul.f32 %v129_v4, %v24_v1  ;;  %v33_v9 = vmul.f32 %v129_v4, %v25_v3  ;;  %v34_v11 = vmul.f32 %v129_v4, %v26_v6  ;;  %v35_v12 = vmul.f32 %v129_v4, %v27_v10 }
   0x4   :  { %v60_v7 = vpack.c.b16 %v58_v2, %v58_v2  ;;  %v126_v17 = vld [vmem:[%s210_s1] sm:$0xff] }
   0x5   :  { %v40_v14 = vadd.f32 %v130_v5, %v32_v8  ;;  %v41_v15 = vadd.f32 %v130_v5, %v33_v9  ;;  %v42_v16 = vadd.f32 %v130_v5, %v34_v11  ;;  %v43_v18 = vadd.f32 %v130_v5, %v35_v12  ;;  %v131_v25 = vld [vmem:[%s214_s4] ss:$0 sm:$0xff] }
   0x6   :  { %v71_v13 = vsel %vm69_vm0, %v60_v7, 0  ;;  %v132_v26 = vld [vmem:[%s215_s5] ss:$0 sm:$0xff] }
   0x7   :  { %79 = vmatpush.bf16.msra.mxu0 %v71_v13  ;;  %127 = vmatpush.bf16.msra.mxu1 %v71_v13  ;;  %v44_v19 = vmax.f32 %v40_v14, 0.0  ;;  %v45_v20 = vmax.f32 %v41_v15, 0.0  ;;  %v46_v21 = vmax.f32 %v42_v16, 0.0  ;;  %v47_v22 = vmax.f32 %v43_v18, 0.0 }
   0x9   :  { %v48_v23 = vpack.c.bf16 %v45_v20, %v44_v19  ;;  %v49_v24 = vpack.c.bf16 %v47_v22, %v46_v21 }
   0xb   :  { %80 = vmatpush.bf16.msra.mxu0 %v126_v17  ;;  %128 = vmatpush.bf16.msra.mxu1 %v126_v17 }
   0xe   :  { %124 = vmatmul.msk.bf16.vlgmr.msra.gmra.mxu0 %vm62_vm1, %v48_v23  ;;  %125 = vmatmul.msk.bf16.vlgmr.msra.gmra.mxu1 %vm62_vm1, %v49_v24 }
  0x8b   :  { %v82_v27 = vpop.f32.mrf.mxu0  ;;  %v87_v28 = vpop.f32.mrf.mxu1 }
  0x8c   :  { %v96_v29 = vmul.f32 %v131_v25, %v82_v27  ;;  %v98_v30 = vmul.f32 %v131_v25, %v87_v28 }
  0x8e   :  { %v104_v31 = vadd.f32 %v132_v26, %v96_v29  ;;  %v106_v32 = vadd.f32 %v132_v26, %v98_v30 }
  0x90   :  { %v108_v33 = vmax.f32 %v104_v31, 0.0  ;;  %v110_v34 = vmax.f32 %v106_v32, 0.0 }
  0x92   :  { %112 = vst [vmem:[%s216_s6] sm:$0xff] %v108_v33 }
  0x93   :  { %114 = vst [vmem:[%s216_s6 + $0x10] sm:$0xff] %v110_v34  ;;  %v84_v35 = vpop.f32.mrf.mxu0  ;;  %v89_v36 = vpop.f32.mrf.mxu1 }
  0x94   :  { %v97_v37 = vmul.f32 %v131_v25, %v84_v35  ;;  %v99_v38 = vmul.f32 %v131_v25, %v89_v36 }
  0x96   :  { %v105_v39 = vadd.f32 %v132_v26, %v97_v37  ;;  %v107_v40 = vadd.f32 %v132_v26, %v99_v38 }
  0x98   :  { %v109_v41 = vmax.f32 %v105_v39, 0.0  ;;  %v111_v42 = vmax.f32 %v107_v40, 0.0 }
  0x9a   :  { %113 = vst [vmem:[%s216_s6 + $0x8] sm:$0xff] %v109_v41 }
  0x9b   :  { %115 = vst [vmem:[%s216_s6 + $0x18] sm:$0xff] %v111_v42 }

// kernel: forward.23
= control target key start
LH: loop header
LB: loop body
LE: loop exit
PB: predicated region body
PF: predicated region fallthrough
CT: control target
= control target key end

     0   :  { %v180_v6 = vmov 16.0   ;;  %s247_s0 = inlined_call_operand.vmem [shape: f32[2,16,32], index: 0, kind: input, shape index: {}]   ;;  %s248_s1 = inlined_call_operand.vmem [shape: f32[1,1,32], index: 1, kind: input, shape index: {}]   ;;  %s249_s2 = inlined_call_operand.vmem [shape: f32[1,1,32], index: 2, kind: input, shape index: {}]   ;;  %s250_s3 = inlined_call_operand.vmem [shape: bf16[32,128], index: 3, kind: input, shape index: {}]   ;;  %s251_s4 = inlined_call_operand.vmem [shape: f32[1,128], index: 4, kind: input, shape index: {}]   ;;  %s252_s5 = inlined_call_operand.hbm [shape: f32[2,128], index: 5, kind: output, shape index: {}]  }
   0x1   :  { %v146_v0 = vld [vmem:[%s250_s3 + $0x8] sm:$0xff]  ;;  %v145_v1 = vld [vmem:[%s250_s3] sm:$0xff]  ;;  %v24_v4 = vld [vmem:[%s247_s0 + $0x10] sm:$0xff]  ;;  %152 = vrcp.f32 %v180_v6 }
   0x2   :  { %v22_v2 = vld [vmem:[%s247_s0] sm:$0xff]  ;;  %v23_v3 = vld [vmem:[%s247_s0 + $0x8] sm:$0xff]  ;;  %v25_v5 = vld [vmem:[%s247_s0 + $0x18] sm:$0xff]  ;;  %112 = vmatpush.bf16.msra.mxu0 %v146_v0 }
   0x3   :  { %v149_v7 = vld [vmem:[%s248_s1] ss:$0 sm:$0xff] }
   0x4   :  { %v150_v8 = vld [vmem:[%s249_s2] ss:$0 sm:$0xff]  ;;  %v30_v9 = vmul.f32 %v149_v7, %v22_v2  ;;  %v31_v10 = vmul.f32 %v149_v7, %v23_v3  ;;  %v32_v11 = vmul.f32 %v149_v7, %v24_v4  ;;  %v33_v12 = vmul.f32 %v149_v7, %v25_v5 }
   0x5   :  { %10 = vsyncpa [#allocation3], 0  ;;  %vm46_vm0 = vcmask 261120   ;;  %vm88_vm2 = vcmask 1041409   ;;  %v151_v53 = vld [vmem:[%s251_s4] ss:$0 sm:$0xff] }
   0x6   :  { %113 = vmatpush.bf16.msra.mxu0 %v145_v1  ;;  %v38_v13 = vadd.f32 %v150_v8, %v30_v9  ;;  %v39_v14 = vadd.f32 %v150_v8, %v31_v10  ;;  %v40_v15 = vadd.f32 %v150_v8, %v32_v11  ;;  %v41_v16 = vadd.f32 %v150_v8, %v33_v12  ;;  %s181_s2 = smov [#allocation2]   ;;  %s127_s11 = sshll.u32 %s252_s5, 4  ;;  %s128_s11 = int_to_ptr.hbm [resolvable:$true] %s127_s11 }
   0x7   :  { %v153_v17 = vpop.eup %152  ;;  %s125_s8 = sshll.u32 %s181_s2, 4  ;;  %s126_s8 = int_to_ptr.vmem [resolvable:$true] %s125_s8 }
   0x8   :  { %v42_v18 = vmax.f32 %v38_v13, 0.0  ;;  %v43_v19 = vmax.f32 %v39_v14, 0.0  ;;  %v44_v20 = vmax.f32 %v40_v15, 0.0  ;;  %v45_v21 = vmax.f32 %v41_v16, 0.0 }
   0x9   :  { %v66_v22 = vmul.f32 16.0, %v153_v17  ;;  %vm70_vm1 = vweird.f32 %v153_v17 }
   0xa   :  { %v47_v23 = vsel %vm46_vm0, %v42_v18, 0.0  ;;  %v48_v24 = vsel %vm46_vm0, %v43_v19, 0.0  ;;  %v56_v25 = vsel %vm46_vm0, %v44_v20, 0.0  ;;  %v57_v26 = vsel %vm46_vm0, %v45_v21, 0.0 }
   0xb   :  { %v49_v27 = vadd.f32 %v48_v24, %v47_v23  ;;  %v58_v28 = vadd.f32 %v57_v26, %v56_v25  ;;  %v67_v29 = vsub.f32 1.0, %v66_v22 }
   0xd   :  { %v50_v30 = vrot.slane %v49_v27, 4  ;;  %v59_v31 = vrot.slane %v58_v28, 4  ;;  %v68_v32 = vmul.f32 %v153_v17, %v67_v29 }
   0xf   :  { %v51_v33 = vadd.f32 %v50_v30, %v49_v27  ;;  %v60_v34 = vadd.f32 %v59_v31, %v58_v28  ;;  %v69_v37 = vadd.f32 %v153_v17, %v68_v32 }
  0x11   :  { %v52_v35 = vrot.slane %v51_v33, 2  ;;  %v61_v36 = vrot.slane %v60_v34, 2  ;;  %v71_v42 = vsel %vm70_vm1, %v153_v17, %v69_v37 }
  0x13   :  { %v53_v38 = vadd.f32 %v52_v35, %v51_v33  ;;  %v62_v39 = vadd.f32 %v61_v36, %v60_v34 }
  0x15   :  { %v54_v40 = vrot.slane %v53_v38, 1  ;;  %v63_v41 = vrot.slane %v62_v39, 1 }
  0x17   :  { %v55_v43 = vadd.f32 %v54_v40, %v53_v38  ;;  %v64_v44 = vadd.f32 %v63_v41, %v62_v39 }
  0x19   :  { %v72_v45 = vmul.f32 %v71_v42, %v55_v43  ;;  %v73_v46 = vmul.f32 %v71_v42, %v64_v44 }
  0x1b   :  { %v74_v47 = vpack.c.bf16 %v72_v45, %v72_v45  ;;  %v75_v48 = vpack.c.bf16 %v73_v46, %v73_v46 }
  0x1d   :  { %v86_v49 = vunpack.c.l.b16 %v74_v47  ;;  %v87_v50 = vunpack.c.l.b16 %v75_v48 }
  0x1f   :  { %v89_v51 = vsel %vm88_vm2, %v87_v50, %v86_v49 }
  0x20   :  { %v90_v52 = vpack.c.b16 %v89_v51, %v89_v51 }
  0x22   :  { %144 = vmatmul.msk.bf16.vlgmr.msra.gmra.mxu0 %vm46_vm0, %v90_v52 }
  0x9f   :  { %v115_v54 = vpop.f32.mrf.mxu0 }
  0xa0   :  { %v116_v55 = vadd.f32 %v151_v53, %v115_v54 }
  0xa2   :  { %119 = vst [vmem:[#allocation2] sm:$0x3] %v116_v55 }
  0xa3   :  { %130 = dma.vmem_to_hbm [thread:$0]  %s126_s8, 32, %s128_s11, [#allocation3]  }
  0xa7   :  { %v117_v56 = vpop.f32.mrf.mxu0 }
  0xa8   :  { %178 = dma.done.wait [#allocation3], 32  }
  0xa9   :  { %179 = vsyncadd [#allocation3], 4294967264 }
  0xaa   :  { %135 = vsyncpa [#allocation3], 1 }

</bundles_post_ra>
